<compile_context>
chip_gen: v5e
topology: v5e:2x2
jax: 0.10.0
libtpu: 0.0.40
codegen_flags: <defaults>
</compile_context>

<pallas_src>
import functools

import jax
import jax.numpy as jnp
from jax.experimental import pallas as pl
from jax.experimental.pallas import tpu as pltpu


def _combined_loss_kernel(yp_ref, yt_ref, x_ref, o_ref, pad_ref, *,
                          mse_w, bmse_w, hmse_w, radius):
    bb, D, H, W = yt_ref.shape
    r = radius
    g = bb * D

    # ---- masks / dilation seed (native dtype compares; 0.5 is exact) ------
    yt = yt_ref[...].astype(jnp.float32)
    xx = x_ref[...].astype(jnp.float32)
    y1 = yt >= 0.5
    x1 = xx >= 0.5
    bone = jnp.logical_or(y1, x1).astype(jnp.float32)              # (x1+y1)>=0.5
    # hole seed: (y1 - x1) >= 0.5  <=>  y1 & ~x1
    seed = jnp.logical_and(y1, jnp.logical_not(x1)).astype(jnp.float32)
    seed_bf = seed.astype(jnp.bfloat16)

    # ---- in-kernel band matrices (review #1) -------------------------------
    def band(n):
        i = jax.lax.broadcasted_iota(jnp.int32, (n, n), 0)
        j = jax.lax.broadcasted_iota(jnp.int32, (n, n), 1)
        return (jnp.abs(i - j) <= r).astype(jnp.float32).astype(jnp.bfloat16)

    band_w = band(W)
    band_h = band(H)

    # ---- W stage: one flat MXU matmul, large M (review #2) -----------------
    # NOTE: reshapes below only merge/split leading dims into/from the sublane
    # axis (last dim untouched); requires H % 8 == 0 for a free relayout.
    s2 = seed_bf.reshape(g * H, W)
    c_w = jnp.dot(s2, band_w, preferred_element_type=jnp.float32)   # counts<=15
    d_w = (c_w > 0.0).astype(jnp.float32).astype(jnp.bfloat16).reshape(g, H, W)

    # ---- H stage: batched MXU matmul over the fused (bb*D) axis ------------
    band_h_b = jnp.broadcast_to(band_h, (g, H, H))
    c_h = jnp.einsum('gkh,ghw->gkw', band_h_b, d_w,
                     preferred_element_type=jnp.float32)             # counts<=15
    d_h = (c_h > 0.0).astype(jnp.float32).reshape(bb, D, H, W)

    # ---- D stage: shifted adds through a halo'd scratch ---------------------
    # Only the two r-row halo slabs are zeroed (middle is fully overwritten),
    # and the 2r+1 window terms are summed with a balanced tree (review #4).
    # TODO(synk): an MXU band_d @ (D, H*W) form would also kill the scratch but
    # needs a minor-dim relayout; kept the robust shifted-add lowering.
    if r > 0:
        zero_slab = jnp.zeros((bb, r, H, W), jnp.float32)
        pad_ref[:, 0:r] = zero_slab
        pad_ref[:, D + r:D + 2 * r] = zero_slab
    pad_ref[:, r:r + D] = d_h
    terms = [pad_ref[:, o:o + D] for o in range(2 * r + 1)]
    while len(terms) > 1:
        nxt = [terms[k] + terms[k + 1] for k in range(0, len(terms) - 1, 2)]
        if len(terms) % 2 == 1:
            nxt.append(terms[-1])
        terms = nxt
    hole = (terms[0] > 0.0).astype(jnp.float32)

    # ---- fused weighted reduction -------------------------------------------
    yp = yp_ref[...].astype(jnp.float32)
    diff = yp - yt
    diff2 = diff * diff
    w = mse_w + bmse_w * bone + hmse_w * hole
    partial = jnp.sum((w * diff2).reshape(g * H, W))

    o_ref[...] = jnp.full(o_ref.shape, partial, dtype=o_ref.dtype)


def combined_loss(y_pred, y_true, x, *, mse_weight=1.0, smooth_weight=1.0,
                  bmse_weight=1.0, hmse_weight=1.0, kernel_size=15,
                  smooth=1e-6):
    del smooth_weight, smooth  # unused by the reference forward pass
    B, D, H, W = y_pred.shape
    r = kernel_size // 2

    in_itemsize = max(jnp.dtype(a.dtype).itemsize for a in (y_pred, y_true, x))

    def block_footprint(bb):
        vol = bb * D * H * W
        inputs = 3 * vol * in_itemsize * 2       # double-buffered input blocks
        scratch = bb * (D + 2 * r) * H * W * 4   # halo'd f32 scratch
        temps = 10 * vol * 4                     # masks/counts/diff/bf16 copies
        return inputs + scratch + temps

    # Fold as much of B as fits into one block (lane/step-overhead efficiency
    # on small volumes, review #8); else tile B per batch.
    budget = 40 * 1024 * 1024
    bb = 1
    for cand in range(B, 0, -1):
        if B % cand == 0 and block_footprint(cand) <= budget:
            bb = cand
            break
    grid = (B // bb,)

    # Scoped VMEM sized from the actual block footprint (review #6).  Clamped
    # to 64 MiB so it is legal on every generation (v7x physical limit); for
    # volumes beyond that D must be tiled — see TODO below.
    vmem_limit = int(min(64 * 1024 * 1024,
                         max(32 * 1024 * 1024, int(block_footprint(bb) * 1.25))))

    kernel = functools.partial(
        _combined_loss_kernel,
        mse_w=float(mse_weight), bmse_w=float(bmse_weight),
        hmse_w=float(hmse_weight), radius=r)

    # TODO(synk): for very large (D, H, W) volumes, additionally tile D with a
    # 2*r halo (overlapping blocks) so each block stays within v7x's 64 MiB
    # per-core VMEM and both TensorCores get work when B is small.
    grid_spec = pltpu.PrefetchScalarGridSpec(
        num_scalar_prefetch=0,
        grid=grid,
        in_specs=[
            pl.BlockSpec((bb, D, H, W), lambda i: (i, 0, 0, 0)),
            pl.BlockSpec((bb, D, H, W), lambda i: (i, 0, 0, 0)),
            pl.BlockSpec((bb, D, H, W), lambda i: (i, 0, 0, 0)),
        ],
        out_specs=pl.BlockSpec((1, 8, 128), lambda i: (i, 0, 0)),
        scratch_shapes=[pltpu.VMEM((bb, D + 2 * r, H, W), jnp.float32)],
    )

    partials = pl.pallas_call(
        kernel,
        out_shape=jax.ShapeDtypeStruct((grid[0], 8, 128), jnp.float32),
        grid_spec=grid_spec,
        compiler_params=pltpu.CompilerParams(
            dimension_semantics=("parallel",),
            vmem_limit_bytes=vmem_limit),
    )(y_pred, y_true, x)

    # Tiny host-side reduce of the per-block partial sums.
    return jnp.sum(partials[:, 0, 0]) / (B * D * H * W)


def reference_loss(y_pred, y_true, x, k=15):
    """Pure-JAX reference matching the PyTorch forward (per-batch dilation)."""
    y_pred = y_pred.astype(jnp.float32)
    y_true = y_true.astype(jnp.float32)
    x = x.astype(jnp.float32)
    y1 = (y_true >= 0.5).astype(jnp.float32)
    x1 = (x >= 0.5).astype(jnp.float32)
    seed = ((y1 - x1) >= 0.5).astype(jnp.float32)
    r = k // 2
    cnt = jax.lax.reduce_window(seed, 0.0, jax.lax.add,
                                (1, k, k, k), (1, 1, 1, 1),
                                [(0, 0), (r, r), (r, r), (r, r)])
    hole = (cnt > 0).astype(jnp.float32)
    bone = ((x1 + y1) >= 0.5).astype(jnp.float32)
    mse = jnp.mean((y_pred - y_true) ** 2)
    hole_mse = jnp.mean((hole * y_pred - hole * y_true) ** 2)
    bone_mse = jnp.mean((bone * y_pred - bone * y_true) ** 2)
    return mse + bone_mse + hole_mse


if __name__ == "__main__":
    key = jax.random.PRNGKey(0)
    k1, k2, k3 = jax.random.split(key, 3)
    B, D, H, W = 2, 16, 16, 16
    y_pred = jax.random.uniform(k1, (B, D, H, W), dtype=jnp.float32)
    y_true = jax.random.uniform(k2, (B, D, H, W), dtype=jnp.float32)
    x = jax.random.uniform(k3, (B, D, H, W), dtype=jnp.float32)

    loss = jax.block_until_ready(combined_loss(y_pred, y_true, x))
    ref = jax.block_until_ready(reference_loss(y_pred, y_true, x))
    assert jnp.allclose(loss, ref, rtol=2e-5, atol=1e-6), (loss, ref)
    print("KERNEL_OK")
</pallas_src>

<mosaic_0001>
module attributes {stable_mosaic.version = 11 : i64} {
  func.func @_combined_loss_kernel(%arg0: i32, %arg1: memref<2x16x16x16xf32, #tpu.memory_space<vmem>>, %arg2: memref<2x16x16x16xf32, #tpu.memory_space<vmem>>, %arg3: memref<2x16x16x16xf32, #tpu.memory_space<vmem>>, %arg4: memref<1x8x128xf32, #tpu.memory_space<vmem>>, %arg5: memref<2x30x16x16xf32, #tpu.memory_space<vmem>>) attributes {dimension_semantics = [#tpu.dimension_semantics<parallel>], iteration_bounds = array<i64: 1>, scalar_prefetch = 0 : i64, scratch_operands = 1 : i64, tpu.core_type = #tpu.core_type<tc>, window_params = [{transform_indices = @transform_0, window_bounds = array<i64: 2, 16, 16, 16>}, {transform_indices = @transform_1, window_bounds = array<i64: 2, 16, 16, 16>}, {transform_indices = @transform_2, window_bounds = array<i64: 2, 16, 16, 16>}, {transform_indices = @transform_3, window_bounds = array<i64: 1, 8, 128>}]} {
    %c0 = arith.constant 0 : index
    %c0_0 = arith.constant 0 : index
    %c0_1 = arith.constant 0 : index
    %c0_2 = arith.constant 0 : index
    %0 = vector.load %arg2[%c0, %c0_0, %c0_1, %c0_2] : memref<2x16x16x16xf32, #tpu.memory_space<vmem>>, vector<2x16x16x16xf32>
    %c0_3 = arith.constant 0 : index
    %c0_4 = arith.constant 0 : index
    %c0_5 = arith.constant 0 : index
    %c0_6 = arith.constant 0 : index
    %1 = vector.load %arg3[%c0_3, %c0_4, %c0_5, %c0_6] : memref<2x16x16x16xf32, #tpu.memory_space<vmem>>, vector<2x16x16x16xf32>
    %cst = arith.constant 5.000000e-01 : f32
    %2 = vector.broadcast %cst : f32 to vector<2x16x16x16xf32>
    %3 = arith.cmpf oge, %0, %2 : vector<2x16x16x16xf32>
    %cst_7 = arith.constant 5.000000e-01 : f32
    %4 = vector.broadcast %cst_7 : f32 to vector<2x16x16x16xf32>
    %5 = arith.cmpf oge, %1, %4 : vector<2x16x16x16xf32>
    %6 = arith.ori %3, %5 : vector<2x16x16x16xi1>
    %7 = arith.extui %6 : vector<2x16x16x16xi1> to vector<2x16x16x16xi32>
    %8 = arith.sitofp %7 : vector<2x16x16x16xi32> to vector<2x16x16x16xf32>
    %cst_8 = arith.constant dense<true> : vector<2x16x16x16xi1>
    %9 = arith.xori %5, %cst_8 : vector<2x16x16x16xi1>
    %10 = arith.andi %3, %9 : vector<2x16x16x16xi1>
    %11 = arith.extui %10 : vector<2x16x16x16xi1> to vector<2x16x16x16xi32>
    %12 = arith.sitofp %11 : vector<2x16x16x16xi32> to vector<2x16x16x16xf32>
    %13 = arith.truncf %12 : vector<2x16x16x16xf32> to vector<2x16x16x16xbf16>
    %14 = tpu.iota {dimensions = array<i32: 0>} : vector<16x16xi32>
    %15 = tpu.iota {dimensions = array<i32: 1>} : vector<16x16xi32>
    %16 = arith.subi %14, %15 : vector<16x16xi32>
    %17 = math.absi %16 : vector<16x16xi32>
    %c7_i32 = arith.constant 7 : i32
    %18 = vector.broadcast %c7_i32 : i32 to vector<16x16xi32>
    %19 = arith.cmpi sle, %17, %18 : vector<16x16xi32>
    %20 = arith.extui %19 : vector<16x16xi1> to vector<16x16xi32>
    %21 = arith.sitofp %20 : vector<16x16xi32> to vector<16x16xf32>
    %22 = arith.truncf %21 : vector<16x16xf32> to vector<16x16xbf16>
    %23 = tpu.iota {dimensions = array<i32: 0>} : vector<16x16xi32>
    %24 = tpu.iota {dimensions = array<i32: 1>} : vector<16x16xi32>
    %25 = arith.subi %23, %24 : vector<16x16xi32>
    %26 = math.absi %25 : vector<16x16xi32>
    %c7_i32_9 = arith.constant 7 : i32
    %27 = vector.broadcast %c7_i32_9 : i32 to vector<16x16xi32>
    %28 = arith.cmpi sle, %26, %27 : vector<16x16xi32>
    %29 = arith.extui %28 : vector<16x16xi1> to vector<16x16xi32>
    %30 = arith.sitofp %29 : vector<16x16xi32> to vector<16x16xf32>
    %31 = arith.truncf %30 : vector<16x16xf32> to vector<16x16xbf16>
    %32 = vector.shape_cast %13 : vector<2x16x16x16xbf16> to vector<512x16xbf16>
    %cst_10 = arith.constant dense<0.000000e+00> : vector<512x16xf32>
    %33 = tpu.matmul %32, %22, %cst_10 {dimension_numbers = #tpu.dot_dimension_numbers<[1], [0], [0], [1], [0, 0, 1, 1], [], []>} : vector<512x16xbf16>, vector<16x16xbf16>, vector<512x16xf32> -> vector<512x16xf32>
    %cst_11 = arith.constant 0.000000e+00 : f32
    %34 = vector.broadcast %cst_11 : f32 to vector<512x16xf32>
    %35 = arith.cmpf ogt, %33, %34 : vector<512x16xf32>
    %36 = arith.extui %35 : vector<512x16xi1> to vector<512x16xi32>
    %37 = arith.sitofp %36 : vector<512x16xi32> to vector<512x16xf32>
    %38 = arith.truncf %37 : vector<512x16xf32> to vector<512x16xbf16>
    %39 = vector.shape_cast %38 : vector<512x16xbf16> to vector<32x16x16xbf16>
    %40 = vector.shape_cast %31 : vector<16x16xbf16> to vector<1x16x16xbf16>
    %41 = vector.broadcast %40 : vector<1x16x16xbf16> to vector<32x16x16xbf16>
    "tpu.trace_start"() <{level = 10 : i32, message = "gkh,ghw->gkw"}> : () -> ()
    %cst_12 = arith.constant dense<0.000000e+00> : vector<32x16x16xf32>
    %42 = tpu.matmul %41, %39, %cst_12 {dimension_numbers = #tpu.dot_dimension_numbers<[2], [1], [1], [2], [0, 0, 0, 1, 1, 2], [0], [0]>} : vector<32x16x16xbf16>, vector<32x16x16xbf16>, vector<32x16x16xf32> -> vector<32x16x16xf32>
    %cst_13 = arith.constant 0.000000e+00 : f32
    "tpu.trace_stop"() : () -> ()
    %43 = vector.broadcast %cst_13 : f32 to vector<32x16x16xf32>
    %44 = arith.cmpf ogt, %42, %43 : vector<32x16x16xf32>
    %45 = arith.extui %44 : vector<32x16x16xi1> to vector<32x16x16xi32>
    %46 = arith.sitofp %45 : vector<32x16x16xi32> to vector<32x16x16xf32>
    %47 = vector.shape_cast %46 : vector<32x16x16xf32> to vector<2x16x16x16xf32>
    %cst_14 = arith.constant 0.000000e+00 : f32
    %48 = vector.broadcast %cst_14 : f32 to vector<2x7x16x16xf32>
    %c0_15 = arith.constant 0 : index
    %c0_16 = arith.constant 0 : index
    %c0_17 = arith.constant 0 : index
    %c0_18 = arith.constant 0 : index
    %49 = vector.load %arg5[%c0_15, %c0_16, %c0_17, %c0_18] : memref<2x30x16x16xf32, #tpu.memory_space<vmem>>, vector<2x7x16x16xf32>
    tpu.vector_store %arg5[%c0_15, %c0_16, %c0_17, %c0_18], %48 {strides = array<i32>} : memref<2x30x16x16xf32, #tpu.memory_space<vmem>>, vector<2x7x16x16xf32>,
    %c0_19 = arith.constant 0 : index
    %c23 = arith.constant 23 : index
    %c0_20 = arith.constant 0 : index
    %c0_21 = arith.constant 0 : index
    %50 = vector.load %arg5[%c0_19, %c23, %c0_20, %c0_21] : memref<2x30x16x16xf32, #tpu.memory_space<vmem>>, vector<2x7x16x16xf32>
    tpu.vector_store %arg5[%c0_19, %c23, %c0_20, %c0_21], %48 {strides = array<i32>} : memref<2x30x16x16xf32, #tpu.memory_space<vmem>>, vector<2x7x16x16xf32>,
    %c0_22 = arith.constant 0 : index
    %c7 = arith.constant 7 : index
    %c0_23 = arith.constant 0 : index
    %c0_24 = arith.constant 0 : index
    %51 = vector.load %arg5[%c0_22, %c7, %c0_23, %c0_24] : memref<2x30x16x16xf32, #tpu.memory_space<vmem>>, vector<2x16x16x16xf32>
    tpu.vector_store %arg5[%c0_22, %c7, %c0_23, %c0_24], %47 {strides = array<i32>} : memref<2x30x16x16xf32, #tpu.memory_space<vmem>>, vector<2x16x16x16xf32>,
    %c0_25 = arith.constant 0 : index
    %c0_26 = arith.constant 0 : index
    %c0_27 = arith.constant 0 : index
    %c0_28 = arith.constant 0 : index
    %52 = vector.load %arg5[%c0_25, %c0_26, %c0_27, %c0_28] : memref<2x30x16x16xf32, #tpu.memory_space<vmem>>, vector<2x16x16x16xf32>
    %c0_29 = arith.constant 0 : index
    %c1 = arith.constant 1 : index
    %c0_30 = arith.constant 0 : index
    %c0_31 = arith.constant 0 : index
    %53 = vector.load %arg5[%c0_29, %c1, %c0_30, %c0_31] : memref<2x30x16x16xf32, #tpu.memory_space<vmem>>, vector<2x16x16x16xf32>
    %c0_32 = arith.constant 0 : index
    %c2 = arith.constant 2 : index
    %c0_33 = arith.constant 0 : index
    %c0_34 = arith.constant 0 : index
    %54 = vector.load %arg5[%c0_32, %c2, %c0_33, %c0_34] : memref<2x30x16x16xf32, #tpu.memory_space<vmem>>, vector<2x16x16x16xf32>
    %c0_35 = arith.constant 0 : index
    %c3 = arith.constant 3 : index
    %c0_36 = arith.constant 0 : index
    %c0_37 = arith.constant 0 : index
    %55 = vector.load %arg5[%c0_35, %c3, %c0_36, %c0_37] : memref<2x30x16x16xf32, #tpu.memory_space<vmem>>, vector<2x16x16x16xf32>
    %c0_38 = arith.constant 0 : index
    %c4 = arith.constant 4 : index
    %c0_39 = arith.constant 0 : index
    %c0_40 = arith.constant 0 : index
    %56 = vector.load %arg5[%c0_38, %c4, %c0_39, %c0_40] : memref<2x30x16x16xf32, #tpu.memory_space<vmem>>, vector<2x16x16x16xf32>
    %c0_41 = arith.constant 0 : index
    %c5 = arith.constant 5 : index
    %c0_42 = arith.constant 0 : index
    %c0_43 = arith.constant 0 : index
    %57 = vector.load %arg5[%c0_41, %c5, %c0_42, %c0_43] : memref<2x30x16x16xf32, #tpu.memory_space<vmem>>, vector<2x16x16x16xf32>
    %c0_44 = arith.constant 0 : index
    %c6 = arith.constant 6 : index
    %c0_45 = arith.constant 0 : index
    %c0_46 = arith.constant 0 : index
    %58 = vector.load %arg5[%c0_44, %c6, %c0_45, %c0_46] : memref<2x30x16x16xf32, #tpu.memory_space<vmem>>, vector<2x16x16x16xf32>
    %c0_47 = arith.constant 0 : index
    %c7_48 = arith.constant 7 : index
    %c0_49 = arith.constant 0 : index
    %c0_50 = arith.constant 0 : index
    %59 = vector.load %arg5[%c0_47, %c7_48, %c0_49, %c0_50] : memref<2x30x16x16xf32, #tpu.memory_space<vmem>>, vector<2x16x16x16xf32>
    %c0_51 = arith.constant 0 : index
    %c8 = arith.constant 8 : index
    %c0_52 = arith.constant 0 : index
    %c0_53 = arith.constant 0 : index
    %60 = vector.load %arg5[%c0_51, %c8, %c0_52, %c0_53] : memref<2x30x16x16xf32, #tpu.memory_space<vmem>>, vector<2x16x16x16xf32>
    %c0_54 = arith.constant 0 : index
    %c9 = arith.constant 9 : index
    %c0_55 = arith.constant 0 : index
    %c0_56 = arith.constant 0 : index
    %61 = vector.load %arg5[%c0_54, %c9, %c0_55, %c0_56] : memref<2x30x16x16xf32, #tpu.memory_space<vmem>>, vector<2x16x16x16xf32>
    %c0_57 = arith.constant 0 : index
    %c10 = arith.constant 10 : index
    %c0_58 = arith.constant 0 : index
    %c0_59 = arith.constant 0 : index
    %62 = vector.load %arg5[%c0_57, %c10, %c0_58, %c0_59] : memref<2x30x16x16xf32, #tpu.memory_space<vmem>>, vector<2x16x16x16xf32>
    %c0_60 = arith.constant 0 : index
    %c11 = arith.constant 11 : index
    %c0_61 = arith.constant 0 : index
    %c0_62 = arith.constant 0 : index
    %63 = vector.load %arg5[%c0_60, %c11, %c0_61, %c0_62] : memref<2x30x16x16xf32, #tpu.memory_space<vmem>>, vector<2x16x16x16xf32>
    %c0_63 = arith.constant 0 : index
    %c12 = arith.constant 12 : index
    %c0_64 = arith.constant 0 : index
    %c0_65 = arith.constant 0 : index
    %64 = vector.load %arg5[%c0_63, %c12, %c0_64, %c0_65] : memref<2x30x16x16xf32, #tpu.memory_space<vmem>>, vector<2x16x16x16xf32>
    %c0_66 = arith.constant 0 : index
    %c13 = arith.constant 13 : index
    %c0_67 = arith.constant 0 : index
    %c0_68 = arith.constant 0 : index
    %65 = vector.load %arg5[%c0_66, %c13, %c0_67, %c0_68] : memref<2x30x16x16xf32, #tpu.memory_space<vmem>>, vector<2x16x16x16xf32>
    %c0_69 = arith.constant 0 : index
    %c14 = arith.constant 14 : index
    %c0_70 = arith.constant 0 : index
    %c0_71 = arith.constant 0 : index
    %66 = vector.load %arg5[%c0_69, %c14, %c0_70, %c0_71] : memref<2x30x16x16xf32, #tpu.memory_space<vmem>>, vector<2x16x16x16xf32>
    %67 = arith.addf %52, %53 : vector<2x16x16x16xf32>
    %68 = arith.addf %54, %55 : vector<2x16x16x16xf32>
    %69 = arith.addf %56, %57 : vector<2x16x16x16xf32>
    %70 = arith.addf %58, %59 : vector<2x16x16x16xf32>
    %71 = arith.addf %60, %61 : vector<2x16x16x16xf32>
    %72 = arith.addf %62, %63 : vector<2x16x16x16xf32>
    %73 = arith.addf %64, %65 : vector<2x16x16x16xf32>
    %74 = arith.addf %67, %68 : vector<2x16x16x16xf32>
    %75 = arith.addf %69, %70 : vector<2x16x16x16xf32>
    %76 = arith.addf %71, %72 : vector<2x16x16x16xf32>
    %77 = arith.addf %73, %66 : vector<2x16x16x16xf32>
    %78 = arith.addf %74, %75 : vector<2x16x16x16xf32>
    %79 = arith.addf %76, %77 : vector<2x16x16x16xf32>
    %80 = arith.addf %78, %79 : vector<2x16x16x16xf32>
    %cst_72 = arith.constant 0.000000e+00 : f32
    %81 = vector.broadcast %cst_72 : f32 to vector<2x16x16x16xf32>
    %82 = arith.cmpf ogt, %80, %81 : vector<2x16x16x16xf32>
    %83 = arith.extui %82 : vector<2x16x16x16xi1> to vector<2x16x16x16xi32>
    %84 = arith.sitofp %83 : vector<2x16x16x16xi32> to vector<2x16x16x16xf32>
    %c0_73 = arith.constant 0 : index
    %c0_74 = arith.constant 0 : index
    %c0_75 = arith.constant 0 : index
    %c0_76 = arith.constant 0 : index
    %85 = vector.load %arg1[%c0_73, %c0_74, %c0_75, %c0_76] : memref<2x16x16x16xf32, #tpu.memory_space<vmem>>, vector<2x16x16x16xf32>
    %86 = arith.subf %85, %0 : vector<2x16x16x16xf32>
    %87 = arith.mulf %86, %86 : vector<2x16x16x16xf32>
    %cst_77 = arith.constant 1.000000e+00 : f32
    %88 = vector.broadcast %cst_77 : f32 to vector<2x16x16x16xf32>
    %89 = arith.mulf %88, %8 : vector<2x16x16x16xf32>
    %cst_78 = arith.constant 1.000000e+00 : f32
    %90 = vector.broadcast %cst_78 : f32 to vector<2x16x16x16xf32>
    %91 = arith.addf %90, %89 : vector<2x16x16x16xf32>
    %cst_79 = arith.constant 1.000000e+00 : f32
    %92 = vector.broadcast %cst_79 : f32 to vector<2x16x16x16xf32>
    %93 = arith.mulf %92, %84 : vector<2x16x16x16xf32>
    %94 = arith.addf %91, %93 : vector<2x16x16x16xf32>
    %95 = arith.mulf %94, %87 : vector<2x16x16x16xf32>
    %96 = vector.shape_cast %95 : vector<2x16x16x16xf32> to vector<512x16xf32>
    %97 = vector.shape_cast %96 : vector<512x16xf32> to vector<1x512x16xf32>
    %cst_80 = arith.constant dense<0.000000e+00> : vector<1xf32>
    %98 = vector.multi_reduction <add>, %97, %cst_80 [1, 2] : vector<1x512x16xf32> to vector<1xf32>
    %99 = vector.shape_cast %98 : vector<1xf32> to vector<1x1x1xf32>
    %100 = vector.extract %99[0, 0, 0] : f32 from vector<1x1x1xf32>
    %101 = vector.broadcast %100 : f32 to vector<1x8x128xf32>
    %c0_81 = arith.constant 0 : index
    %c0_82 = arith.constant 0 : index
    %c0_83 = arith.constant 0 : index
    %102 = vector.load %arg4[%c0_81, %c0_82, %c0_83] : memref<1x8x128xf32, #tpu.memory_space<vmem>>, vector<1x8x128xf32>
    tpu.vector_store %arg4[%c0_81, %c0_82, %c0_83], %101 {strides = array<i32>} : memref<1x8x128xf32, #tpu.memory_space<vmem>>, vector<1x8x128xf32>,
    return
  }
  func.func @transform_0(%arg0: i32) -> (i32, i32, i32, i32) {
    %c0_i32 = arith.constant 0 : i32
    %c0_i32_0 = arith.constant 0 : i32
    %c0_i32_1 = arith.constant 0 : i32
    %c0_i32_2 = arith.constant 0 : i32
    return %arg0, %c0_i32, %c0_i32_0, %c0_i32_1 : i32, i32, i32, i32
  }
  func.func @transform_1(%arg0: i32) -> (i32, i32, i32, i32) {
    %c0_i32 = arith.constant 0 : i32
    %c0_i32_0 = arith.constant 0 : i32
    %c0_i32_1 = arith.constant 0 : i32
    %c0_i32_2 = arith.constant 0 : i32
    return %arg0, %c0_i32, %c0_i32_0, %c0_i32_1 : i32, i32, i32, i32
  }
  func.func @transform_2(%arg0: i32) -> (i32, i32, i32, i32) {
    %c0_i32 = arith.constant 0 : i32
    %c0_i32_0 = arith.constant 0 : i32
    %c0_i32_1 = arith.constant 0 : i32
    %c0_i32_2 = arith.constant 0 : i32
    return %arg0, %c0_i32, %c0_i32_0, %c0_i32_1 : i32, i32, i32, i32
  }
  func.func @transform_3(%arg0: i32) -> (i32, i32, i32) {
    %c0_i32 = arith.constant 0 : i32
    %c0_i32_0 = arith.constant 0 : i32
    %c0_i32_1 = arith.constant 0 : i32
    return %arg0, %c0_i32, %c0_i32_0 : i32, i32, i32
  }
}

</mosaic_0001>

<bundles_post_ra>
// kernel: tpu_custom_call.1
= control target key start
LH: loop header
LB: loop body
LE: loop exit
PB: predicated region body
PF: predicated region fallthrough
CT: control target
= control target key end

     0   :  { %8 = vsyncpa [#allocation4], 0  ;;  %s8636_s0 = inlined_call_operand.hbm [shape: f32[2,16,16,16], index: 0, kind: input, shape index: {}]   ;;  %s8637_s1 = inlined_call_operand.hbm [shape: f32[2,16,16,16], index: 1, kind: input, shape index: {}]   ;;  %s8638_s2 = inlined_call_operand.hbm [shape: f32[2,16,16,16], index: 2, kind: input, shape index: {}]   ;;  %s8639_s3 = inlined_call_operand.hbm [shape: f32[1,8,128], index: 3, kind: output, shape index: {}]  }
   0x1   :  { %9 = vsyncpa [#allocation7], 0 }
   0x2   :  { %10 = vsyncpa [#allocation5], 0  ;;  %s28_s14 = sshll.u32 %s8637_s1, 4  ;;  %s5663_s15 = smov [#allocation6]   ;;  %s29_s14 = int_to_ptr.hbm [resolvable:$true] %s28_s14 }
   0x3   :  { %s30_s16 = sshll.u32 %s5663_s15, 4  ;;  %s15_s19 = sshll.u32 %s8636_s0, 4  ;;  %s31_s16 = int_to_ptr.vmem [resolvable:$true] %s30_s16  ;;  %s16_s19 = int_to_ptr.hbm [resolvable:$true] %s15_s19 }
   0x4   :  { %s5664_s20 = smov 128   ;;  %s5665_s21 = smov 8  }
   0x5   :  { %36 = dma.hbm_to_vmem [thread:$0]  %s29_s14, 8192, %s31_s16, [#allocation7], %s5664_s20, %s5664_s20, %s5665_s21  }
   0x6   :  { %s5666_s22 = smov [#allocation3]   ;;  %s41_s26 = sshll.u32 %s8638_s2, 4  ;;  %s42_s26 = int_to_ptr.hbm [resolvable:$true] %s41_s26 }
   0x7   :  { %s17_s23 = sshll.u32 %s5666_s22, 4  ;;  %s5667_s1 = smov [#allocation8]   ;;  %s18_s23 = int_to_ptr.vmem [resolvable:$true] %s17_s23 }
   0x8   :  { %23 = dma.hbm_to_vmem [thread:$0]  %s16_s19, 8192, %s18_s23, [#allocation4], %s5664_s20, %s5664_s20, %s5665_s21  }
   0x9   :  { %s43_s27 = sshll.u32 %s5667_s1, 4  ;;  %s44_s27 = int_to_ptr.vmem [resolvable:$true] %s43_s27 }
   0xa   :  { %49 = dma.hbm_to_vmem [thread:$0]  %s42_s26, 8192, %s44_s27, [#allocation7], %s5664_s20, %s5664_s20, %s5665_s21  }
   0xb   :  { %5657 = dma.done.wait [#allocation4], 8192  }
   0xc   :  { %5658 = vsyncadd [#allocation4], 4294959104 }
   0xd   :  { %5659 = dma.done.wait [#allocation7], 16384  }
   0xe   :  { %5660 = vsyncadd [#allocation7], 4294950912  ;;  %v831_v0 = vlaneseq  ;;  %vm8651_vm0 = vcmask 130048   ;;  %v8681_v1 = vmov 0.0   ;;  %v63_v8 = vld [vmem:[#allocation6] sm:$0xff]  ;;  %v64_v9 = vld [vmem:[#allocation6 + $0x8] sm:$0xff] }
   0xf   :  { %2375 = vst.msk [vmem:[#allocation2] sm:$0xff] %vm8651_vm0, %v8681_v1  ;;  %v127_v10 = vld [vmem:[#allocation8] sm:$0xff]  ;;  %v128_v13 = vld [vmem:[#allocation8 + $0x8] sm:$0xff]  ;;  %vm191_vm4 = vcmp.ge.f32.partialorder %v63_v8, 0.5  ;;  %vm192_vm6 = vcmp.ge.f32.partialorder %v64_v9, 0.5  ;;  %v8742_v16 = vmov 0 }
  0x10   :  { %v832_v2 = vshrl.u32 %v831_v0, 7  ;;  %v835_v3 = vand.u32 127, %v831_v0  ;;  %2376 = vst.msk [vmem:[#allocation2 + $0x8] sm:$0xff] %vm8651_vm0, %v8681_v1  ;;  %vm255_vm5 = vcmp.ge.f32.partialorder %v127_v10, 0.5  ;;  %vm256_vm7 = vcmp.ge.f32.partialorder %v128_v13, 0.5  ;;  %v129_v19 = vld [vmem:[#allocation8 + $0x10] sm:$0xff] }
  0x11   :  { %2377 = vst.msk [vmem:[#allocation2 + $0x10] sm:$0xff] %vm8651_vm0, %v8681_v1  ;;  %vm5719_vm8 = vmor %vm191_vm4, %vm255_vm5  ;;  %v8744_v18 = vmov 0  ;;  %vm8667_vm11 = vmmov 1   ;;  %v130_v21 = vld [vmem:[#allocation8 + $0x18] sm:$0xff]  ;;  %v65_v24 = vld [vmem:[#allocation6 + $0x10] sm:$0xff]  ;;  %vm257_vm15 = vcmp.ge.f32.partialorder %v129_v19, 0.5 }
  0x12   :  { %v833_v4 = vadd.s32 8, %v832_v2  ;;  %v836_v5 = vsub.s32 %v832_v2, %v835_v3  ;;  %2378 = vst.msk [vmem:[#allocation2 + $0x18] sm:$0xff] %vm8651_vm0, %v8681_v1  ;;  %v8743_v16 = vsel %vm5719_vm8, 4294967295, %v8742_v16  ;;  %vm5727_vm10 = vmor %vm192_vm6, %vm256_vm7  ;;  %v66_v27 = vld [vmem:[#allocation6 + $0x18] sm:$0xff]  ;;  %v67_v35 = vld [vmem:[#allocation6 + $0x20] sm:$0xff]  ;;  %v8746_v41 = vmov 0 }
  0x13   :  { %2379 = vst.msk [vmem:[#allocation2 + $0x20] sm:$0xff] %vm8651_vm0, %v8681_v1  ;;  %v8745_v18 = vsel %vm5727_vm10, 4294967295, %v8744_v18  ;;  %vm511_vm12 = vmxor %vm255_vm5, %vm8667_vm11  ;;  %vm194_vm5 = vcmp.ge.f32.partialorder %v66_v27, 0.5  ;;  %v131_v36 = vld [vmem:[#allocation8 + $0x20] sm:$0xff]  ;;  %v68_v39 = vld [vmem:[#allocation6 + $0x28] sm:$0xff]  ;;  %v8748_v42 = vmov 0 }
  0x14   :  { %v837_v6 = vsub.s32 %v833_v4, %v835_v3  ;;  %vm838_vm1 = vcmp.lt.s32.totalorder %v836_v5, 0  ;;  %v839_v7 = vsub.s32 0, %v836_v5  ;;  %2380 = vst.msk [vmem:[#allocation2 + $0x28] sm:$0xff] %vm8651_vm0, %v8681_v1  ;;  %vm512_vm13 = vmxor %vm256_vm7, %vm8667_vm11  ;;  %v132_v40 = vld [vmem:[#allocation8 + $0x28] sm:$0xff]  ;;  %v8750_v45 = vmov 0  ;;  %v69_v47 = vld [vmem:[#allocation6 + $0x30] sm:$0xff] }
  0x15   :  { %2381 = vst.msk [vmem:[#allocation2 + $0x30] sm:$0xff] %vm8651_vm0, %v8681_v1  ;;  %vm575_vm14 = vmand %vm191_vm4, %vm511_vm12  ;;  %v8752_v46 = vmov 0  ;;  %v133_v48 = vld [vmem:[#allocation8 + $0x30] sm:$0xff]  ;;  %v70_v49 = vld [vmem:[#allocation6 + $0x38] sm:$0xff]  ;;  %v8754_v53 = vmov 0  ;;  %v8756_v54 = vmov 0 }
  0x16   :  { %v840_v11 = vsel %vm838_vm1, %v839_v7, %v836_v5  ;;  %vm841_vm2 = vcmp.lt.s32.totalorder %v837_v6, 0  ;;  %v842_v12 = vsub.s32 0, %v837_v6  ;;  %2382 = vst.msk [vmem:[#allocation2 + $0x38] sm:$0xff] %vm8651_vm0, %v8681_v1  ;;  %vm576_vm1 = vmand %vm192_vm6, %vm512_vm13  ;;  %v5162_v26 = vsel %vm575_vm14, 1.0, %v8681_v1  ;;  %v134_v50 = vld [vmem:[#allocation8 + $0x38] sm:$0xff]  ;;  %v71_v56 = vld [vmem:[#allocation6 + $0x40] sm:$0xff] }
  0x17   :  { %vm844_vm3 = vcmp.le.s32.totalorder %v840_v11, 7  ;;  %2383 = vst.msk [vmem:[#allocation2 + $0x40] sm:$0xff] %vm8651_vm0, %v8681_v1  ;;  %v5163_v28 = vsel %vm576_vm1, 1.0, %v8681_v1  ;;  %v767_v29 = vpack.c.bf16 %v5162_v26, %v5162_v26  ;;  %vm513_vm4 = vmxor %vm257_vm15, %vm8667_vm11  ;;  %vm8641_vm14 = vcmp.ge.f32.partialorder %v67_v35, 0.5  ;;  %v72_v59 = vld [vmem:[#allocation6 + $0x48] sm:$0xff]  ;;  %v135_v60 = vld [vmem:[#allocation8 + $0x40] sm:$0xff] }
  0x18   :  { %v843_v14 = vsel %vm841_vm2, %v842_v12, %v837_v6  ;;  %v5226_v15 = vsel %vm844_vm3, 1.0, %v8681_v1  ;;  %2384 = vst.msk [vmem:[#allocation2 + $0x48] sm:$0xff] %vm8651_vm0, %v8681_v1  ;;  %vm258_vm2 = vcmp.ge.f32.partialorder %v130_v21, 0.5  ;;  %v768_v31 = vpack.c.bf16 %v5163_v28, %v5163_v28  ;;  %v136_v61 = vld [vmem:[#allocation8 + $0x48] sm:$0xff]  ;;  %v73_v6 = vld [vmem:[#allocation6 + $0x50] sm:$0xff]  ;;  %v74_v9 = vld [vmem:[#allocation6 + $0x58] sm:$0xff] }
  0x19   :  { %vm845_vm9 = vcmp.le.s32.totalorder %v843_v14, 7  ;;  %v850_v17 = vpack.c.bf16 %v5226_v15, %v5226_v15  ;;  %2385 = vst.msk [vmem:[#allocation2 + $0x50] sm:$0xff] %vm8651_vm0, %v8681_v1  ;;  %vm193_vm3 = vcmp.ge.f32.partialorder %v65_v24, 0.5  ;;  %v916_v32 = vunpack.c.l.b16 %v767_v29  ;;  %vm514_vm6 = vmxor %vm258_vm2, %vm8667_vm11  ;;  %v137_v10 = vld [vmem:[#allocation8 + $0x50] sm:$0xff]  ;;  %v138_v11 = vld [vmem:[#allocation8 + $0x58] sm:$0xff]  ;;  %s5087_s28 = sshll.u32 %s8639_s3, 4  ;;  %s5088_s28 = int_to_ptr.hbm [resolvable:$true] %s5087_s28 }
  0x1a   :  { %v5227_v20 = vsel %vm845_vm9, 1.0, %v8681_v1  ;;  %2386 = vst.msk [vmem:[#allocation2 + $0x58] sm:$0xff] %vm8651_vm0, %v8681_v1  ;;  %v917_v33 = vunpack.c.l.b16 %v768_v31  ;;  %vm577_vm7 = vmand %vm193_vm3, %vm513_vm4  ;;  %vm259_vm1 = vcmp.ge.f32.partialorder %v131_v36, 0.5  ;;  %v8761_v62 = vmov 0  ;;  %v75_v21 = vld [vmem:[#allocation6 + $0x60] sm:$0xff]  ;;  %v76_v24 = vld [vmem:[#allocation6 + $0x68] sm:$0xff] }
  0x1b   :  { %v851_v22 = vpack.c.bf16 %v5227_v20, %v5227_v20  ;;  %v1014_v23 = vunpack.c.l.b16 %v850_v17  ;;  %2387 = vst.msk [vmem:[#allocation2 + $0x60] sm:$0xff] %vm8651_vm0, %v8681_v1  ;;  %vm578_vm9 = vmand %vm194_vm5, %vm514_vm6  ;;  %v5164_v37 = vsel %vm577_vm7, 1.0, %v8681_v1  ;;  %vm8643_vm6 = vcmp.ge.f32.partialorder %v69_v47, 0.5  ;;  %v140_v26 = vld [vmem:[#allocation8 + $0x68] sm:$0xff]  ;;  %s5670_s29 = smov [#allocation9]  }
  0x1c   :  { %2388 = vst.msk [vmem:[#allocation2 + $0x68] sm:$0xff] %vm8651_vm0, %v8681_v1  ;;  %v980_v34 = vpack.c.b16 %v917_v33, %v916_v32  ;;  %v5165_v38 = vsel %vm578_vm9, 1.0, %v8681_v1  ;;  %vm5787_vm12 = vmor %vm193_vm3, %vm257_vm15  ;;  %v769_v43 = vpack.c.bf16 %v5164_v37, %v5164_v37  ;;  %vm8640_vm15 = vcmp.ge.f32.partialorder %v68_v39, 0.5  ;;  %s5085_s30 = sshll.u32 %s5670_s29, 4  ;;  %s5086_s30 = int_to_ptr.vmem [resolvable:$true] %s5085_s30 }
  0x1d   :  { %v1015_v25 = vunpack.c.l.b16 %v851_v22  ;;  %2389 = vst.msk [vmem:[#allocation2 + $0x1e0] sm:$0xff] %vm8651_vm0, %v8681_v1  ;;  %v8747_v41 = vsel %vm5787_vm12, 4294967295, %v8746_v41  ;;  %vm5795_vm13 = vmor %vm194_vm5, %vm258_vm2  ;;  %v770_v44 = vpack.c.bf16 %v5165_v38, %v5165_v38  ;;  %vm8642_vm3 = vcmp.ge.f32.partialorder %v132_v40, 0.5  ;;  %v78_v38 = vld [vmem:[#allocation6 + $0x78] sm:$0xff] }
  0x1e   :  { %2390 = vst.msk [vmem:[#allocation2 + $0x1e8] sm:$0xff] %vm8651_vm0, %v8681_v1  ;;  %v8749_v42 = vsel %vm5795_vm13, 4294967295, %v8748_v42  ;;  %vm5803_vm4 = vmor %vm8641_vm14, %vm259_vm1  ;;  %v918_v51 = vunpack.c.l.b16 %v769_v43  ;;  %vm8644_vm7 = vcmp.ge.f32.partialorder %v133_v48, 0.5  ;;  %vm8645_vm9 = vcmp.ge.f32.partialorder %v70_v49, 0.5 }
  0x1f   :  { %v5752_v30 = vpack.c.b16 %v1015_v25, %v1014_v23  ;;  %2391 = vst.msk [vmem:[#allocation2 + $0x1f0] sm:$0xff] %vm8651_vm0, %v8681_v1  ;;  %v8751_v45 = vsel %vm5803_vm4, 4294967295, %v8750_v45  ;;  %vm5811_vm2 = vmor %vm8640_vm15, %vm8642_vm3  ;;  %v919_v52 = vunpack.c.l.b16 %v770_v44  ;;  %vm8646_vm15 = vcmp.ge.f32.partialorder %v134_v50, 0.5  ;;  %v139_v25 = vld [vmem:[#allocation8 + $0x60] sm:$0xff] }
  0x20   :  { %2392 = vst.msk [vmem:[#allocation2 + $0x1f8] sm:$0xff] %vm8651_vm0, %v8681_v1  ;;  %v8753_v46 = vsel %vm5811_vm2, 4294967295, %v8752_v46  ;;  %vm515_vm5 = vmxor %vm259_vm1, %vm8667_vm11  ;;  %vm8758_vm1 = vcmp.ge.f32.partialorder %v132_v40, 0.5  ;;  %v8763_v2 = vmov 0  ;;  %v8769_v12 = vmov 0  ;;  %v142_v40 = vld [vmem:[#allocation8 + $0x78] sm:$0xff] }
  0x21   :  { %1122 = vmatpush.bf16.msra.mxu0 %v5752_v30  ;;  %5484 = vmatpush.bf16.msra.mxu1 %v5752_v30  ;;  %2393 = vst.msk [vmem:[#allocation2 + $0x200] sm:$0xff] %vm8651_vm0, %v8681_v1  ;;  %vm5827_vm14 = vmor %vm8643_vm6, %vm8644_vm7  ;;  %v981_v55 = vpack.c.b16 %v919_v52, %v918_v51  ;;  %vm8759_vm6 = vcmp.ge.f32.partialorder %v67_v35, 0.5  ;;  %v8771_v15 = vmov 0  ;;  %vm8777_vm13 = vcmask 130048   ;;  %v77_v35 = vld [vmem:[#allocation6 + $0x70] sm:$0xff] }
  0x22   :  { %5485 = vmatpush.bf16.msra.mxu2 %v5752_v30  ;;  %5486 = vmatpush.bf16.msra.mxu3 %v5752_v30  ;;  %2394 = vst.msk [vmem:[#allocation2 + $0x208] sm:$0xff] %vm8651_vm0, %v8681_v1  ;;  %v8755_v53 = vsel %vm5827_vm14, 4294967295, %v8754_v53  ;;  %vm5835_vm3 = vmor %vm8645_vm9, %vm8646_vm15  ;;  %vm8760_vm9 = vcmp.ge.f32.partialorder %v68_v39, 0.5  ;;  %v8778_v27 = vmov 0  ;;  %v8780_v31 = vmov 0  ;;  %v141_v39 = vld [vmem:[#allocation8 + $0x70] sm:$0xff] }
  0x23   :  { %2395 = vst.msk [vmem:[#allocation2 + $0x210] sm:$0xff] %vm8651_vm0, %v8681_v1  ;;  %v8757_v54 = vsel %vm5835_vm3, 4294967295, %v8756_v54  ;;  %vm516_vm2 = vmxor %vm8758_vm1, %vm8667_vm11  ;;  %vm8774_vm3 = vcmp.ge.f32.partialorder %v136_v61, 0.5  ;;  %v8787_v43 = vmov 0  ;;  %vm8821_vm10 = vcmask 130048  }
  0x24   :  { %5228 = vmatmul.msk.bf16.vlgmr.msra.gmra.mxu0 %vm8651_vm0, %v980_v34  ;;  %2396 = vst.msk [vmem:[#allocation2 + $0x218] sm:$0xff] %vm8651_vm0, %v8681_v1  ;;  %vm579_vm7 = vmand %vm8759_vm6, %vm515_vm5  ;;  %vm8650_vm5 = vcmp.ge.f32.partialorder %v135_v60, 0.5  ;;  %vm8647_vm6 = vcmp.ge.f32.partialorder %v72_v59, 0.5 }
  0x25   :  { %2397 = vst.msk [vmem:[#allocation2 + $0x220] sm:$0xff] %vm8651_vm0, %v8681_v1  ;;  %vm580_vm15 = vmand %vm8760_vm9, %vm516_vm2  ;;  %v5166_v57 = vsel %vm579_vm7, 1.0, %v8681_v1  ;;  %vm8648_vm2 = vcmp.ge.f32.partialorder %v71_v56, 0.5  ;;  %vm8649_vm9 = vcmp.ge.f32.partialorder %v136_v61, 0.5  ;;  %vm8765_vm7 = vcmp.ge.f32.partialorder %v133_v48, 0.5  ;;  %v79_v61 = vld [vmem:[#allocation6 + $0x80] sm:$0xff] }
  0x26   :  { %2398 = vst.msk [vmem:[#allocation2 + $0x228] sm:$0xff] %vm8651_vm0, %v8681_v1  ;;  %v5167_v58 = vsel %vm580_vm15, 1.0, %v8681_v1  ;;  %vm5866_vm1 = vmor %vm8648_vm2, %vm8650_vm5  ;;  %v771_v63 = vpack.c.bf16 %v5166_v57, %v5166_v57  ;;  %vm8766_vm2 = vcmp.ge.f32.partialorder %v134_v50, 0.5  ;;  %vm8767_vm5 = vcmp.ge.f32.partialorder %v69_v47, 0.5 }
  0x27   :  { %2399 = vst.msk [vmem:[#allocation2 + $0x230] sm:$0xff] %vm8651_vm0, %v8681_v1  ;;  %v8762_v62 = vsel %vm5866_vm1, 4294967295, %v8761_v62  ;;  %v772_v0 = vpack.c.bf16 %v5167_v58, %v5167_v58  ;;  %vm5874_vm15 = vmor %vm8647_vm6, %vm8649_vm9  ;;  %vm8768_vm1 = vcmp.ge.f32.partialorder %v70_v49, 0.5  ;;  %v8789_v48 = vmov 0 }
  0x28   :  { %2400 = vst.msk [vmem:[#allocation2 + $0x238] sm:$0xff] %vm8651_vm0, %v8681_v1  ;;  %v8764_v2 = vsel %vm5874_vm15, 4294967295, %v8763_v2  ;;  %v920_v3 = vunpack.c.l.b16 %v771_v63  ;;  %vm517_vm6 = vmxor %vm8765_vm7, %vm8667_vm11  ;;  %v143_v63 = vld [vmem:[#allocation8 + $0x80] sm:$0xff] }
  0x29   :  { %2401 = vst.msk [vmem:[#allocation2 + $0x240] sm:$0xff] %vm8651_vm0, %v8681_v1  ;;  %v921_v4 = vunpack.c.l.b16 %v772_v0  ;;  %vm518_vm9 = vmxor %vm8766_vm2, %vm8667_vm11  ;;  %vm8652_vm2 = vcmp.ge.f32.partialorder %v73_v6, 0.5  ;;  %v80_v0 = vld [vmem:[#allocation6 + $0x88] sm:$0xff] }
  0x2a   :  { %2402 = vst.msk [vmem:[#allocation2 + $0x248] sm:$0xff] %vm8651_vm0, %v8681_v1  ;;  %vm581_vm15 = vmand %vm8767_vm5, %vm517_vm6  ;;  %vm8653_vm5 = vcmp.ge.f32.partialorder %v137_v10, 0.5  ;;  %vm8654_vm6 = vcmp.ge.f32.partialorder %v74_v9, 0.5 }
  0x2b   :  { %2404 = vst.msk [vmem:[#allocation2 + $0x170] sm:$0xff] %vm8651_vm0, %v8681_v1  ;;  %v982_v5 = vpack.c.b16 %v921_v4, %v920_v3  ;;  %vm582_vm7 = vmand %vm8768_vm1, %vm518_vm9  ;;  %v5168_v7 = vsel %vm581_vm15, 1.0, %v8681_v1  ;;  %vm8655_vm9 = vcmp.ge.f32.partialorder %v138_v11, 0.5  ;;  %v144_v3 = vld [vmem:[#allocation8 + $0x88] sm:$0xff] }
  0x2c   :  { %2405 = vst.msk [vmem:[#allocation2 + $0x178] sm:$0xff] %vm8651_vm0, %v8681_v1  ;;  %v5169_v8 = vsel %vm582_vm7, 1.0, %v8681_v1  ;;  %vm5917_vm1 = vmor %vm8652_vm2, %vm8653_vm5  ;;  %v773_v13 = vpack.c.bf16 %v5168_v7, %v5168_v7  ;;  %vm8773_vm7 = vcmp.ge.f32.partialorder %v135_v60, 0.5  ;;  %vm8775_vm2 = vcmp.ge.f32.partialorder %v71_v56, 0.5 }
  0x2d   :  { %2406 = vst.msk [vmem:[#allocation2 + $0x180] sm:$0xff] %vm8651_vm0, %v8681_v1  ;;  %v8770_v12 = vsel %vm5917_vm1, 4294967295, %v8769_v12  ;;  %v774_v14 = vpack.c.bf16 %v5169_v8, %v5169_v8  ;;  %vm5923_vm15 = vmor %vm8654_vm6, %vm8655_vm9  ;;  %vm8776_vm1 = vcmp.ge.f32.partialorder %v72_v59, 0.5  ;;  %vm8656_vm6 = vcmp.ge.f32.partialorder %v75_v21, 0.5 }
  0x2e   :  { %2407 = vst.msk [vmem:[#allocation2 + $0x188] sm:$0xff] %vm8651_vm0, %v8681_v1  ;;  %v8772_v15 = vsel %vm5923_vm15, 4294967295, %v8771_v15  ;;  %v922_v17 = vunpack.c.l.b16 %v773_v13  ;;  %vm520_vm14 = vmxor %vm8774_vm3, %vm8667_vm11  ;;  %vm8658_vm9 = vcmp.ge.f32.partialorder %v76_v24, 0.5  ;;  %vm8659_vm15 = vcmp.ge.f32.partialorder %v140_v26, 0.5  ;;  %v145_v13 = vld [vmem:[#allocation8 + $0x90] sm:$0xff] }
  0x2f   :  { %2408 = vst.msk [vmem:[#allocation2 + $0x190] sm:$0xff] %vm8651_vm0, %v8681_v1  ;;  %v923_v19 = vunpack.c.l.b16 %v774_v14  ;;  %vm584_vm4 = vmand %vm8776_vm1, %vm520_vm14  ;;  %v8802_v7 = vmov 0 }
  0x30   :  { %2409 = vst.msk [vmem:[#allocation2 + $0x198] sm:$0xff] %vm8651_vm0, %v8681_v1  ;;  %v5171_v23 = vsel %vm584_vm4, 1.0, %v8681_v1  ;;  %vm8783_vm4 = vcmp.ge.f32.partialorder %v138_v11, 0.5 }
  0x31   :  { %2410 = vst.msk [vmem:[#allocation2 + $0x1a0] sm:$0xff] %vm8651_vm0, %v8681_v1  ;;  %v983_v20 = vpack.c.b16 %v923_v19, %v922_v17  ;;  %v776_v29 = vpack.c.bf16 %v5171_v23, %v5171_v23  ;;  %v81_v17 = vld [vmem:[#allocation6 + $0x90] sm:$0xff]  ;;  %v146_v19 = vld [vmem:[#allocation8 + $0x98] sm:$0xff]  ;;  %v8834_v23 = vmov 0 }
  0x32   :  { %2411 = vst.msk [vmem:[#allocation2 + $0x1a8] sm:$0xff] %vm8651_vm0, %v8681_v1 }
  0x33   :  { %2412 = vst.msk [vmem:[#allocation2 + $0x1b0] sm:$0xff] %vm8651_vm0, %v8681_v1  ;;  %v925_v33 = vunpack.c.l.b16 %v776_v29 }
  0x34   :  { %2413 = vst.msk [vmem:[#allocation2 + $0x1b8] sm:$0xff] %vm8651_vm0, %v8681_v1  ;;  %5229 = vmatmul.msk.bf16.gmra.mxu0 %vm8651_vm0, %v981_v55 }
  0x35   :  { %2414 = vst.msk [vmem:[#allocation2 + $0x1c0] sm:$0xff] %vm8651_vm0, %v8681_v1 }
  0x36   :  { %2415 = vst.msk [vmem:[#allocation2 + $0x1c8] sm:$0xff] %vm8651_vm0, %v8681_v1 }
  0x37   :  { %2416 = vst.msk [vmem:[#allocation2 + $0x1d0] sm:$0xff] %vm8651_vm0, %v8681_v1 }
  0x38   :  { %2417 = vst.msk [vmem:[#allocation2 + $0x1d8] sm:$0xff] %vm8651_vm0, %v8681_v1 }
  0x39   :  { %2418 = vst.msk [vmem:[#allocation2 + $0x350] sm:$0xff] %vm8651_vm0, %v8681_v1 }
  0x3a   :  { %2419 = vst.msk [vmem:[#allocation2 + $0x358] sm:$0xff] %vm8651_vm0, %v8681_v1 }
  0x3b   :  { %2420 = vst.msk [vmem:[#allocation2 + $0x360] sm:$0xff] %vm8651_vm0, %v8681_v1 }
  0x3c   :  { %2421 = vst.msk [vmem:[#allocation2 + $0x368] sm:$0xff] %vm8651_vm0, %v8681_v1 }
  0x3d   :  { %2422 = vst.msk [vmem:[#allocation2 + $0x370] sm:$0xff] %vm8651_vm0, %v8681_v1 }
  0x3e   :  { %2423 = vst.msk [vmem:[#allocation2 + $0x378] sm:$0xff] %vm8651_vm0, %v8681_v1 }
  0x3f   :  { %2424 = vst.msk [vmem:[#allocation2 + $0x380] sm:$0xff] %vm8651_vm0, %v8681_v1 }
  0x40   :  { %2425 = vst.msk [vmem:[#allocation2 + $0x388] sm:$0xff] %vm8651_vm0, %v8681_v1 }
  0x41   :  { %2426 = vst.msk [vmem:[#allocation2 + $0x390] sm:$0xff] %vm8651_vm0, %v8681_v1 }
  0x42   :  { %2427 = vst.msk [vmem:[#allocation2 + $0x398] sm:$0xff] %vm8651_vm0, %v8681_v1 }
  0x43   :  { %2428 = vst.msk [vmem:[#allocation2 + $0x3a0] sm:$0xff] %vm8651_vm0, %v8681_v1 }
  0x44   :  { %2429 = vst.msk [vmem:[#allocation2 + $0x3a8] sm:$0xff] %vm8651_vm0, %v8681_v1  ;;  %5230 = vmatmul.msk.bf16.gmra.mxu0 %vm8651_vm0, %v982_v5 }
  0x45   :  { %2430 = vst.msk [vmem:[#allocation2 + $0x3b0] sm:$0xff] %vm8651_vm0, %v8681_v1 }
  0x46   :  { %2431 = vst.msk [vmem:[#allocation2 + $0x3b8] sm:$0xff] %vm8651_vm0, %v8681_v1  ;;  %vm519_vm0 = vmxor %vm8773_vm7, %vm8667_vm11  ;;  %vm8657_vm7 = vcmp.ge.f32.partialorder %v139_v25, 0.5 }
  0x47   :  { %vm583_vm5 = vmand %vm8775_vm2, %vm519_vm0 }
  0x48   :  { %v5170_v22 = vsel %vm583_vm5, 1.0, %v8681_v1  ;;  %vm5938_vm3 = vmor %vm8656_vm6, %vm8657_vm7  ;;  %vm8784_vm5 = vcmp.ge.f32.partialorder %v73_v6, 0.5  ;;  %vm8785_vm6 = vcmp.ge.f32.partialorder %v74_v9, 0.5  ;;  %v8800_v6 = vmov 0 }
  0x49   :  { %v8779_v27 = vsel %vm5938_vm3, 4294967295, %v8778_v27  ;;  %v775_v28 = vpack.c.bf16 %v5170_v22, %v5170_v22  ;;  %vm5944_vm0 = vmor %vm8658_vm9, %vm8659_vm15  ;;  %vm8786_vm3 = vcmask 130048   ;;  %vm8660_vm9 = vcmp.ge.f32.partialorder %v77_v35, 0.5 }
  0x4a   :  { %v8781_v31 = vsel %vm5944_vm0, 4294967295, %v8780_v31  ;;  %vm522_vm2 = vmxor %vm8783_vm4, %vm8667_vm11  ;;  %vm8662_vm15 = vcmp.ge.f32.partialorder %v78_v38, 0.5  ;;  %vm270_vm0 = vcmp.ge.f32.partialorder %v142_v40, 0.5  ;;  %v179_v40 = vld [vmem:[#allocation8 + $0x1a0] sm:$0xff] }
  0x4b   :  { %v924_v32 = vunpack.c.l.b16 %v775_v28  ;;  %vm586_vm7 = vmand %vm8785_vm6, %vm522_vm2  ;;  %v160_v28 = vld [vmem:[#allocation8 + $0x108] sm:$0xff] }
  0x4c   :  { %v5173_v37 = vsel %vm586_vm7, 1.0, %v8681_v1  ;;  %vm5965_vm6 = vmor %vm8662_vm15, %vm270_vm0  ;;  %vm8791_vm7 = vcmp.ge.f32.partialorder %v139_v25, 0.5  ;;  %v8808_v25 = vmov 0 }
  0x4d   :  { %v984_v34 = vpack.c.b16 %v925_v33, %v924_v32  ;;  %v778_v47 = vpack.c.bf16 %v5173_v37, %v5173_v37  ;;  %v8790_v48 = vsel %vm5965_vm6, 4294967295, %v8789_v48  ;;  %vm272_vm6 = vcmp.ge.f32.partialorder %v144_v3, 0.5  ;;  %v83_v3 = vld [vmem:[#allocation6 + $0xa0] sm:$0xff] }
  0x4f   :  { %v927_v50 = vunpack.c.l.b16 %v778_v47 }
  0x54   :  { %5231 = vmatmul.msk.bf16.gmra.mxu0 %vm8777_vm13, %v983_v20  ;;  %vm8782_vm13 = vcmp.ge.f32.partialorder %v137_v10, 0.5  ;;  %v82_v20 = vld [vmem:[#allocation6 + $0x98] sm:$0xff] }
  0x55   :  { %vm521_vm14 = vmxor %vm8782_vm13, %vm8667_vm11  ;;  %vm8661_vm13 = vcmp.ge.f32.partialorder %v141_v39, 0.5 }
  0x56   :  { %vm585_vm1 = vmand %vm8784_vm5, %vm521_vm14  ;;  %vm8792_vm14 = vcmp.ge.f32.partialorder %v140_v26, 0.5  ;;  %vm8793_vm5 = vcmp.ge.f32.partialorder %v75_v21, 0.5  ;;  %v159_v26 = vld [vmem:[#allocation8 + $0x100] sm:$0xff] }
  0x57   :  { %v5172_v36 = vsel %vm585_vm1, 1.0, %v8681_v1  ;;  %vm5959_vm4 = vmor %vm8660_vm9, %vm8661_vm13  ;;  %vm8794_vm9 = vcmp.ge.f32.partialorder %v76_v24, 0.5  ;;  %v8806_v24 = vmov 0 }
  0x58   :  { %v8788_v43 = vsel %vm5959_vm4, 4294967295, %v8787_v43  ;;  %v777_v44 = vpack.c.bf16 %v5172_v36, %v5172_v36  ;;  %vm524_vm2 = vmxor %vm8792_vm14, %vm8667_vm11  ;;  %vm8795_vm4 = vcmask 130048   ;;  %v147_v36 = vld [vmem:[#allocation8 + $0xa0] sm:$0xff] }
  0x59   :  { %vm588_vm13 = vmand %vm8794_vm9, %vm524_vm2  ;;  %vm8798_vm9 = vcmp.ge.f32.partialorder %v78_v38, 0.5 }
  0x5a   :  { %v926_v49 = vunpack.c.l.b16 %v777_v44  ;;  %v5175_v55 = vsel %vm588_vm13, 1.0, %v8681_v1  ;;  %vm526_vm14 = vmxor %vm270_vm0, %vm8667_vm11  ;;  %v6027_v44 = vld [vmem:[#allocation8 + $0x1a8] sm:$0xff] }
  0x5b   :  { %v780_v57 = vpack.c.bf16 %v5175_v55, %v5175_v55  ;;  %vm590_vm2 = vmand %vm8798_vm9, %vm526_vm14  ;;  %v116_v55 = vld [vmem:[#allocation6 + $0x1a8] sm:$0xff] }
  0x5c   :  { %v985_v51 = vpack.c.b16 %v927_v50, %v926_v49  ;;  %vm8799_vm13 = vmmov %vm8795_vm4  ;;  %v5177_v5 = vsel %vm590_vm2, 1.0, %v8681_v1  ;;  %vm273_vm2 = vcmp.ge.f32.partialorder %v145_v13, 0.5  ;;  %v115_v50 = vld [vmem:[#allocation6 + $0x1a0] sm:$0xff] }
  0x5d   :  { %v929_v59 = vunpack.c.l.b16 %v780_v57  ;;  %v782_v9 = vpack.c.bf16 %v5177_v5, %v5177_v5 }
  0x5f   :  { %v931_v11 = vunpack.c.l.b16 %v782_v9  ;;  %v84_v9 = vld [vmem:[#allocation6 + $0xa8] sm:$0xff] }
  0x64   :  { %5232 = vmatmul.msk.bf16.gmra.mxu0 %vm8786_vm3, %v984_v34  ;;  %vm523_vm3 = vmxor %vm8791_vm7, %vm8667_vm11  ;;  %vm8796_vm7 = vcmp.ge.f32.partialorder %v141_v39, 0.5  ;;  %v95_v34 = vld [vmem:[#allocation6 + $0x100] sm:$0xff] }
  0x65   :  { %vm587_vm1 = vmand %vm8793_vm5, %vm523_vm3  ;;  %vm8797_vm3 = vcmp.ge.f32.partialorder %v77_v35, 0.5  ;;  %v96_v35 = vld [vmem:[#allocation6 + $0x108] sm:$0xff] }
  0x66   :  { %v5174_v52 = vsel %vm587_vm1, 1.0, %v8681_v1  ;;  %vm525_vm15 = vmxor %vm8796_vm7, %vm8667_vm11  ;;  %vm271_vm1 = vcmp.ge.f32.partialorder %v143_v63, 0.5  ;;  %vm208_vm7 = vcmp.ge.f32.partialorder %v80_v0, 0.5 }
  0x67   :  { %v779_v56 = vpack.c.bf16 %v5174_v52, %v5174_v52  ;;  %vm589_vm5 = vmand %vm8797_vm3, %vm525_vm15 }
  0x68   :  { %v5176_v4 = vsel %vm589_vm5, 1.0, %v8681_v1  ;;  %vm5991_vm15 = vmor %vm208_vm7, %vm272_vm6 }
  0x69   :  { %v928_v58 = vunpack.c.l.b16 %v779_v56  ;;  %v8803_v7 = vsel %vm5991_vm15, 4294967295, %v8802_v7  ;;  %v781_v8 = vpack.c.bf16 %v5176_v4, %v5176_v4  ;;  %vm527_vm14 = vmxor %vm271_vm1, %vm8667_vm11  ;;  %vm8664_vm15 = vcmp.ge.f32.partialorder %v81_v17, 0.5 }
  0x6a   :  { %vm528_vm3 = vmxor %vm272_vm6, %vm8667_vm11  ;;  %vm8663_vm6 = vcmp.ge.f32.partialorder %v82_v20, 0.5  ;;  %v8843_v56 = vmov 0 }
  0x6b   :  { %v986_v60 = vpack.c.b16 %v929_v59, %v928_v58  ;;  %v930_v10 = vunpack.c.l.b16 %v781_v8  ;;  %vm592_vm9 = vmand %vm208_vm7, %vm528_vm3  ;;  %vm8665_vm3 = vcmp.ge.f32.partialorder %v159_v26, 0.5  ;;  %v148_v58 = vld [vmem:[#allocation8 + $0xa8] sm:$0xff] }
  0x6c   :  { %v5179_v22 = vsel %vm592_vm9, 1.0, %v8681_v1  ;;  %vm8670_vm9 = vcmp.ge.f32.partialorder %v95_v34, 0.5 }
  0x6d   :  { %v987_v14 = vpack.c.b16 %v931_v11, %v930_v10  ;;  %v784_v32 = vpack.c.bf16 %v5179_v22, %v5179_v22 }
  0x6f   :  { %v933_v38 = vunpack.c.l.b16 %v784_v32  ;;  %v161_v32 = vld [vmem:[#allocation8 + $0x110] sm:$0xff] }
  0x74   :  { %5233 = vmatmul.msk.bf16.gmra.mxu0 %vm8795_vm4, %v985_v51  ;;  %vm207_vm4 = vcmp.ge.f32.partialorder %v79_v61, 0.5 }
  0x75   :  { %vm5987_vm0 = vmor %vm207_vm4, %vm271_vm1 }
  0x76   :  { %v8801_v6 = vsel %vm5987_vm0, 4294967295, %v8800_v6  ;;  %vm591_vm5 = vmand %vm207_vm4, %vm527_vm14  ;;  %vm274_vm0 = vcmp.ge.f32.partialorder %v146_v19, 0.5  ;;  %v8831_v19 = vmov 0 }
  0x77   :  { %v5178_v21 = vsel %vm591_vm5, 1.0, %v8681_v1  ;;  %vm6001_vm1 = vmxor %vm273_vm2, %vm8667_vm11  ;;  %vm8666_vm5 = vcmp.ge.f32.partialorder %v160_v28, 0.5 }
  0x78   :  { %vm6006_vm4 = vmor %vm8664_vm15, %vm273_vm2  ;;  %v783_v29 = vpack.c.bf16 %v5178_v21, %v5178_v21 }
  0x79   :  { %v8807_v24 = vsel %vm6006_vm4, 4294967295, %v8806_v24  ;;  %vm6011_vm7 = vmor %vm8663_vm6, %vm274_vm0 }
  0x7a   :  { %v8809_v25 = vsel %vm6011_vm7, 4294967295, %v8808_v25  ;;  %vm6016_vm14 = vmxor %vm274_vm0, %vm8667_vm11  ;;  %v932_v37 = vunpack.c.l.b16 %v783_v29  ;;  %v8836_v29 = vmov 0 }
  0x7b   :  { %vm543_vm2 = vmxor %vm8665_vm3, %vm8667_vm11  ;;  %vm8671_vm3 = vcmp.ge.f32.partialorder %v147_v36, 0.5 }
  0x7c   :  { %vm544_vm6 = vmxor %vm8666_vm5, %vm8667_vm11  ;;  %vm8812_vm5 = vcmp.ge.f32.partialorder %v81_v17, 0.5  ;;  %v988_v59 = vpack.c.b16 %v933_v38, %v932_v37 }
  0x7d   :  { %vm607_vm15 = vmand %vm8670_vm9, %vm543_vm2  ;;  %vm8672_vm9 = vcmp.ge.f32.partialorder %v116_v55, 0.5 }
  0x7e   :  { %v5194_v39 = vsel %vm607_vm15, 1.0, %v8681_v1  ;;  %vm6033_vm11 = vmand %vm8812_vm5, %vm6001_vm1  ;;  %vm8815_vm15 = vcmp.ge.f32.partialorder %v82_v20, 0.5  ;;  %vm8818_vm1 = vmmov 1  }
  0x7f   :  { %v799_v49 = vpack.c.bf16 %v5194_v39, %v5194_v39  ;;  %vm6040_vm2 = vmand %vm8815_vm15, %vm6016_vm14  ;;  %vm276_vm15 = vcmp.ge.f32.partialorder %v148_v58, 0.5  ;;  %v5180_v5 = vsel %vm6033_vm11, 1.0, %v8681_v1  ;;  %vm8829_vm11 = vcmp.ge.f32.partialorder %v160_v28, 0.5  ;;  %v98_v39 = vld [vmem:[#allocation6 + $0x118] sm:$0xff] }
  0x80   :  { %vm6047_vm5 = vmxor %vm8671_vm3, %vm8818_vm1  ;;  %v5181_v8 = vsel %vm6040_vm2, 1.0, %v8681_v1  ;;  %v785_v21 = vpack.c.bf16 %v5180_v5, %v5180_v5 }
  0x81   :  { %v948_v57 = vunpack.c.l.b16 %v799_v49  ;;  %vm8822_vm3 = vmmov %vm8821_vm10  ;;  %v786_v22 = vpack.c.bf16 %v5181_v8, %v5181_v8 }
  0x82   :  { %v934_v51 = vunpack.c.l.b16 %v785_v21  ;;  %v8855_v21 = vmov 0 }
  0x84   :  { %5234 = vmatmul.msk.bf16.gmra.mxu0 %vm8799_vm13, %v986_v60 }
  0x94   :  { %5235 = vmatmul.msk.bf16.gmra.mxu0 %vm8799_vm13, %v987_v14  ;;  %vm8669_vm13 = vcmp.ge.f32.partialorder %v96_v35, 0.5 }
  0x95   :  { %vm608_vm0 = vmand %vm8669_vm13, %vm544_vm6  ;;  %vm307_vm6 = vcmp.ge.f32.partialorder %v179_v40, 0.5  ;;  %vm8674_vm13 = vcmp.ge.f32.partialorder %v115_v50, 0.5  ;;  %v105_v40 = vld [vmem:[#allocation6 + $0x150] sm:$0xff] }
  0x96   :  { %v5195_v47 = vsel %vm608_vm0, 1.0, %v8681_v1  ;;  %vm8673_vm0 = vcmp.ge.f32.partialorder %v6027_v44, 0.5  ;;  %vm563_vm14 = vmxor %vm307_vm6, %vm8818_vm1 }
  0x97   :  { %v800_v52 = vpack.c.bf16 %v5195_v47, %v5195_v47  ;;  %vm564_vm7 = vmxor %vm8673_vm0, %vm8818_vm1  ;;  %vm8833_vm0 = vcmp.ge.f32.partialorder %v147_v36, 0.5  ;;  %v162_v47 = vld [vmem:[#allocation8 + $0x118] sm:$0xff] }
  0x98   :  { %vm627_vm4 = vmand %vm8674_vm13, %vm563_vm14 }
  0x99   :  { %v949_v60 = vunpack.c.l.b16 %v800_v52  ;;  %vm628_vm8 = vmand %vm8672_vm9, %vm564_vm7  ;;  %v5214_v4 = vsel %vm627_vm4, 1.0, %v8681_v1  ;;  %vm8826_vm4 = vcmp.ge.f32.partialorder %v95_v34, 0.5  ;;  %vm211_vm9 = vcmp.ge.f32.partialorder %v83_v3, 0.5 }
  0x9a   :  { %vm6069_vm14 = vmxor %vm276_vm15, %vm8818_vm1  ;;  %v5215_v11 = vsel %vm628_vm8, 1.0, %v8681_v1  ;;  %v819_v13 = vpack.c.bf16 %v5214_v4, %v5214_v4  ;;  %vm212_vm8 = vcmp.ge.f32.partialorder %v84_v9, 0.5  ;;  %v935_v52 = vunpack.c.l.b16 %v786_v22 }
  0x9b   :  { %v996_v0 = vpack.c.b16 %v949_v60, %v948_v57  ;;  %v820_v20 = vpack.c.bf16 %v5215_v11, %v5215_v11  ;;  %vm6088_vm13 = vmor %vm211_vm9, %vm8833_vm0  ;;  %v8848_v57 = vmov 0  ;;  %v170_v60 = vld [vmem:[#allocation8 + $0x158] sm:$0xff] }
  0x9c   :  { %v8835_v23 = vsel %vm6088_vm13, 4294967295, %v8834_v23  ;;  %v968_v28 = vunpack.c.l.b16 %v819_v13  ;;  %vm6106_vm0 = vmand %vm212_vm8, %vm6069_vm14 }
  0x9d   :  { %5244 = vmatmul.msk.bf16.vlgmr.msra.gmra.mxu1 %vm8822_vm3, %v996_v0  ;;  %vm8830_vm3 = vcmp.ge.f32.partialorder %v96_v35, 0.5  ;;  %v97_v35 = vld [vmem:[#allocation6 + $0x110] sm:$0xff]  ;;  %v969_v38 = vunpack.c.l.b16 %v820_v20  ;;  %v5183_v11 = vsel %vm6106_vm0, 1.0, %v8681_v1 }
  0x9e   :  { %vm6083_vm2 = vmor %vm8830_vm3, %vm8829_vm11  ;;  %vm8846_vm11 = vcmp.ge.f32.partialorder %v6027_v44, 0.5  ;;  %vm8847_vm3 = vcmp.ge.f32.partialorder %v116_v55, 0.5  ;;  %v106_v44 = vld [vmem:[#allocation6 + $0x158] sm:$0xff]  ;;  %v989_v55 = vpack.c.b16 %v935_v52, %v934_v51  ;;  %v85_v20 = vld [vmem:[#allocation6 + $0xb0] sm:$0xff] }
  0x9f   :  { %v8832_v19 = vsel %vm6083_vm2, 4294967295, %v8831_v19  ;;  %vm6119_vm14 = vmor %vm8847_vm3, %vm8846_vm11  ;;  %v1006_v58 = vpack.c.b16 %v969_v38, %v968_v28  ;;  %vm233_vm2 = vcmp.ge.f32.partialorder %v105_v40, 0.5  ;;  %v86_v28 = vld [vmem:[#allocation6 + $0xb8] sm:$0xff]  ;;  %v788_v38 = vpack.c.bf16 %v5183_v11, %v5183_v11 }
  0xa0   :  { %v8849_v57 = vsel %vm6119_vm14, 4294967295, %v8848_v57 }
  0xa1   :  { %v1124_v63 = vpop.f32.mrf.mxu0  ;;  %8850 = vst [vmem:[#allocation14_spill] sm:$0xff] %v8849_v57 }
  0xa2   :  { %vm1284_vm12 = vcmp.gt.f32.partialorder %v1124_v63, 0.0 }
  0xa3   :  { %v5260_v17 = vsel %vm1284_vm12, 1.0, %v8681_v1 }
  0xa4   :  { %5236 = vmatmul.msk.bf16.gmra.mxu0 %vm8821_vm10, %v988_v59  ;;  %vm8825_vm10 = vcmp.ge.f32.partialorder %v159_v26, 0.5  ;;  %v1476_v33 = vpack.c.bf16 %v5260_v17, %v5260_v17  ;;  %v169_v59 = vld [vmem:[#allocation8 + $0x150] sm:$0xff] }
  0xa5   :  { %vm6076_vm7 = vmor %vm8826_vm4, %vm8825_vm10  ;;  %vm297_vm14 = vcmp.ge.f32.partialorder %v169_v59, 0.5 }
  0xa6   :  { %vm6093_vm10 = vmor %vm212_vm8, %vm276_vm15  ;;  %vm8677_vm15 = vcmp.ge.f32.partialorder %v161_v32, 0.5  ;;  %vm8676_vm8 = vcmp.ge.f32.partialorder %v97_v35, 0.5  ;;  %v1542_v61 = vunpack.c.l.b16 %v1476_v33  ;;  %v149_v33 = vld [vmem:[#allocation8 + $0xb0] sm:$0xff] }
  0xa7   :  { %v8837_v29 = vsel %vm6093_vm10, 4294967295, %v8836_v29  ;;  %vm6099_vm4 = vmand %vm211_vm9, %vm6047_vm5  ;;  %vm8842_vm9 = vcmp.ge.f32.partialorder %v115_v50, 0.5  ;;  %vm8675_vm10 = vcmp.ge.f32.partialorder %v162_v47, 0.5 }
  0xa8   :  { %vm6112_vm5 = vmor %vm8842_vm9, %vm307_vm6  ;;  %vm8851_vm9 = vcmask 130048   ;;  %v5182_v10 = vsel %vm6099_vm4, 1.0, %v8681_v1 }
  0xa9   :  { %v1126_v26 = vpop.f32.mrf.mxu0  ;;  %v8844_v56 = vsel %vm6112_vm5, 4294967295, %v8843_v56  ;;  %vm545_vm6 = vmxor %vm8677_vm15, %vm8818_vm1  ;;  %5254 = vmatmul.msk.bf16.vlgmr.msra.gmra.mxu3 %vm8851_vm9, %v1006_v58  ;;  %vm8678_vm5 = vcmp.ge.f32.partialorder %v170_v60, 0.5  ;;  %vm234_vm9 = vcmp.ge.f32.partialorder %v106_v44, 0.5  ;;  %vm8852_vm15 = vcmask 130048  }
  0xaa   :  { %vm1285_vm12 = vcmp.gt.f32.partialorder %v1126_v26, 0.0  ;;  %8845 = vst [vmem:[#allocation13_spill] sm:$0xff] %v8844_v56  ;;  %vm546_vm11 = vmxor %vm8675_vm10, %vm8818_vm1 }
  0xab   :  { %v5261_v36 = vsel %vm1285_vm12, 1.0, %v8681_v1  ;;  %vm226_vm12 = vcmp.ge.f32.partialorder %v98_v39, 0.5  ;;  %vm609_vm3 = vmand %vm8676_vm8, %vm545_vm6  ;;  %v8867_v39 = vmov 0 }
  0xac   :  { %v1477_v49 = vpack.c.bf16 %v5261_v36, %v5261_v36  ;;  %vm610_vm13 = vmand %vm226_vm12, %vm546_vm11  ;;  %v5196_v3 = vsel %vm609_vm3, 1.0, %v8681_v1  ;;  %vm8853_vm3 = vcmp.ge.f32.partialorder %v161_v32, 0.5  ;;  %v8859_v36 = vmov 0  ;;  %v150_v32 = vld [vmem:[#allocation8 + $0xb8] sm:$0xff] }
  0xad   :  { %v5197_v4 = vsel %vm610_vm13, 1.0, %v8681_v1  ;;  %v801_v5 = vpack.c.bf16 %v5196_v3, %v5196_v3  ;;  %vm553_vm10 = vmxor %vm297_vm14, %vm8818_vm1  ;;  %v181_v3 = vld [vmem:[#allocation8 + $0x1b0] sm:$0xff] }
  0xae   :  { %v1543_v63 = vunpack.c.l.b16 %v1477_v49  ;;  %v802_v8 = vpack.c.bf16 %v5197_v4, %v5197_v4  ;;  %vm554_vm6 = vmxor %vm8678_vm5, %vm8818_vm1  ;;  %vm8854_vm5 = vcmp.ge.f32.partialorder %v97_v35, 0.5  ;;  %v787_v35 = vpack.c.bf16 %v5182_v10, %v5182_v10  ;;  %v118_v4 = vld [vmem:[#allocation6 + $0x1b8] sm:$0xff] }
  0xaf   :  { %v950_v9 = vunpack.c.l.b16 %v801_v5  ;;  %vm617_vm11 = vmand %vm233_vm2, %vm553_vm10  ;;  %vm8858_vm10 = vcmp.ge.f32.partialorder %v162_v47, 0.5  ;;  %v8862_v49 = vmov 0  ;;  %v182_v5 = vld [vmem:[#allocation8 + $0x1b8] sm:$0xff] }
  0xb0   :  { %v1544_v50 = vpack.c.b16 %v1543_v63, %v1542_v61  ;;  %v951_v13 = vunpack.c.l.b16 %v802_v8  ;;  %vm618_vm13 = vmand %vm234_vm9, %vm554_vm6  ;;  %v5204_v17 = vsel %vm617_vm11, 1.0, %v8681_v1  ;;  %vm213_vm6 = vcmp.ge.f32.partialorder %v85_v20, 0.5  ;;  %v99_v20 = vld [vmem:[#allocation6 + $0x120] sm:$0xff] }
  0xb1   :  { %v1129_v0 = vpop.f32.mrf.mxu0  ;;  %v5205_v22 = vsel %vm618_vm13, 1.0, %v8681_v1  ;;  %v809_v26 = vpack.c.bf16 %v5204_v17, %v5204_v17  ;;  %vm6156_vm4 = vmor %vm226_vm12, %vm8858_vm10  ;;  %vm214_vm11 = vcmp.ge.f32.partialorder %v86_v28, 0.5  ;;  %vm277_vm13 = vcmp.ge.f32.partialorder %v149_v33, 0.5  ;;  %v163_v33 = vld [vmem:[#allocation8 + $0x120] sm:$0xff] }
  0xb2   :  { %1556 = vmatpush.bf16.msrb.mxu1 %v1544_v50  ;;  %vm1286_vm8 = vcmp.gt.f32.partialorder %v1129_v0, 0.0  ;;  %v8860_v36 = vsel %vm6156_vm4, 4294967295, %v8859_v36  ;;  %v997_v37 = vpack.c.b16 %v951_v13, %v950_v9  ;;  %vm6162_vm0 = vmor %vm233_vm2, %vm297_vm14  ;;  %v810_v51 = vpack.c.bf16 %v5205_v22, %v5205_v22  ;;  %v117_v0 = vld [vmem:[#allocation6 + $0x1b0] sm:$0xff] }
  0xb3   :  { %v5262_v34 = vsel %vm1286_vm8, 1.0, %v8681_v1  ;;  %8861 = vst [vmem:[#allocation16_spill] sm:$0xff] %v8860_v36  ;;  %v8863_v49 = vsel %vm6162_vm0, 4294967295, %v8862_v49  ;;  %v958_v52 = vunpack.c.l.b16 %v809_v26  ;;  %vm8866_vm8 = vcmp.ge.f32.partialorder %v170_v60, 0.5  ;;  %vm6174_vm14 = vmor %vm213_vm6, %vm277_vm13 }
  0xb4   :  { %5237 = vmatmul.msk.bf16.gmra.mxu0 %vm8852_vm15, %v989_v55  ;;  %vm6148_vm15 = vmor %vm8854_vm5, %vm8853_vm3  ;;  %8864 = vst [vmem:[#allocation17_spill] sm:$0xff] %v8863_v49  ;;  %vm8865_vm5 = vcmask 130048   ;;  %v1478_v47 = vpack.c.bf16 %v5262_v34, %v5262_v34  ;;  %v959_v59 = vunpack.c.l.b16 %v810_v51  ;;  %vm278_vm2 = vcmp.ge.f32.partialorder %v150_v32, 0.5  ;;  %v100_v34 = vld [vmem:[#allocation6 + $0x128] sm:$0xff] }
  0xb5   :  { %v8856_v21 = vsel %vm6148_vm15, 4294967295, %v8855_v21  ;;  %5245 = vmatmul.msk.bf16.gmra.mxu1 %vm8865_vm5, %v997_v37  ;;  %vm6169_vm12 = vmor %vm234_vm9, %vm8866_vm8  ;;  %v8870_v61 = vmov 0  ;;  %v8873_v60 = vmov 0  ;;  %v936_v44 = vunpack.c.l.b16 %v787_v35  ;;  %v164_v37 = vld [vmem:[#allocation8 + $0x128] sm:$0xff] }
  0xb6   :  { %8857 = vst [vmem:[#allocation15_spill] sm:$0xff] %v8856_v21  ;;  %v8868_v39 = vsel %vm6169_vm12, 4294967295, %v8867_v39  ;;  %v8871_v61 = vsel %vm6174_vm14, 4294967295, %v8870_v61  ;;  %vm6180_vm10 = vmor %vm214_vm11, %vm278_vm2  ;;  %v937_v50 = vunpack.c.l.b16 %v788_v38  ;;  %v1001_v55 = vpack.c.b16 %v959_v59, %v958_v52 }
  0xb7   :  { %8869 = vst [vmem:[#allocation18_spill] sm:$0xff] %v8868_v39  ;;  %v8874_v60 = vsel %vm6180_vm10, 4294967295, %v8873_v60  ;;  %vm533_vm9 = vmxor %vm277_vm13, %vm8818_vm1  ;;  %v1565_v8 = vunpack.c.l.b16 %v1478_v47  ;;  %vm8876_vm8 = vcmask 130048   ;;  %vm245_vm14 = vcmp.ge.f32.partialorder %v117_v0, 0.5 }
  0xb8   :  { %8872 = vst [vmem:[#allocation19_spill] sm:$0xff] %v8871_v61  ;;  %vm534_vm5 = vmxor %vm278_vm2, %vm8818_vm1  ;;  %5249 = vmatmul.msk.bf16.vlgmr.msra.gmra.mxu2 %vm8876_vm8, %v1001_v55  ;;  %vm309_vm12 = vcmp.ge.f32.partialorder %v181_v3, 0.5  ;;  %v990_v11 = vpack.c.b16 %v937_v50, %v936_v44  ;;  %vm8679_vm0 = vcmp.ge.f32.partialorder %v118_v4, 0.5  ;;  %vm310_vm13 = vcmp.ge.f32.partialorder %v182_v5, 0.5  ;;  %v108_v44 = vld [vmem:[#allocation6 + $0x168] sm:$0xff]  ;;  %v171_v55 = vld [vmem:[#allocation8 + $0x160] sm:$0xff] }
  0xb9   :  { %v1131_v58 = vpop.f32.mrf.mxu0  ;;  %8875 = vst [vmem:[#allocation20_spill] sm:$0xff] %v8874_v60  ;;  %vm598_vm10 = vmand %vm214_vm11, %vm534_vm5  ;;  %v8877_v13 = vmov 0  ;;  %v8880_v22 = vmov 0 }
  0xba   :  { %vm1287_vm3 = vcmp.gt.f32.partialorder %v1131_v58, 0.0  ;;  %vm6190_vm4 = vmor %vm245_vm14, %vm309_vm12  ;;  %v5185_v28 = vsel %vm598_vm10, 1.0, %v8681_v1  ;;  %vm291_vm10 = vcmp.ge.f32.partialorder %v163_v33, 0.5  ;;  %v8885_v58 = vmov 0 }
  0xbb   :  { %v5263_v63 = vsel %vm1287_vm3, 1.0, %v8681_v1  ;;  %vm597_vm3 = vmand %vm213_vm6, %vm533_vm9  ;;  %v8878_v13 = vsel %vm6190_vm4, 4294967295, %v8877_v13  ;;  %v790_v35 = vpack.c.bf16 %v5185_v28, %v5185_v28 }
  0xbc   :  { %v1479_v40 = vpack.c.bf16 %v5263_v63, %v5263_v63  ;;  %8879 = vst [vmem:[#allocation21_spill] sm:$0xff] %v8878_v13  ;;  %vm6195_vm2 = vmor %vm8679_vm0, %vm310_vm13  ;;  %v5184_v26 = vsel %vm597_vm3, 1.0, %v8681_v1  ;;  %vm227_vm0 = vcmp.ge.f32.partialorder %v99_v20, 0.5  ;;  %vm292_vm3 = vcmp.ge.f32.partialorder %v164_v37, 0.5 }
  0xbd   :  { %v8881_v22 = vsel %vm6195_vm2, 4294967295, %v8880_v22  ;;  %vm565_vm6 = vmxor %vm309_vm12, %vm8818_vm1  ;;  %v789_v32 = vpack.c.bf16 %v5184_v26, %v5184_v26  ;;  %vm8884_vm2 = vcmp.ge.f32.partialorder %v118_v4, 0.5  ;;  %vm228_vm12 = vcmp.ge.f32.partialorder %v100_v34, 0.5 }
  0xbe   :  { %v1566_v9 = vunpack.c.l.b16 %v1479_v40  ;;  %8882 = vst [vmem:[#allocation22_spill] sm:$0xff] %v8881_v22  ;;  %vm566_vm11 = vmxor %vm310_vm13, %vm8818_vm1  ;;  %v8888_v63 = vmov 0  ;;  %v107_v40 = vld [vmem:[#allocation6 + $0x160] sm:$0xff]  ;;  %v939_v4 = vunpack.c.l.b16 %v790_v35  ;;  %v8891_v37 = vmov 0 }
  0xbf   :  { %vm8883_vm5 = vmmov %vm8876_vm8  ;;  %v938_v3 = vunpack.c.l.b16 %v789_v32  ;;  %v8895_v34 = vmov 0  ;;  %v87_v32 = vld [vmem:[#allocation6 + $0xc0] sm:$0xff] }
  0xc0   :  { %v1567_v10 = vpack.c.b16 %v1566_v9, %v1565_v8  ;;  %vm629_vm8 = vmand %vm245_vm14, %vm565_vm6  ;;  %v172_v8 = vld [vmem:[#allocation8 + $0x168] sm:$0xff] }
  0xc1   :  { %v1134_v17 = vpop.f32.mrf.mxu0  ;;  %vm630_vm4 = vmand %vm8884_vm2, %vm566_vm11  ;;  %v5216_v38 = vsel %vm629_vm8, 1.0, %v8681_v1 }
  0xc2   :  { %1576 = vmatpush.bf16.msrb.mxu2 %v1567_v10  ;;  %vm1288_vm9 = vcmp.gt.f32.partialorder %v1134_v17, 0.0  ;;  %v5217_v51 = vsel %vm630_vm4, 1.0, %v8681_v1  ;;  %v821_v52 = vpack.c.bf16 %v5216_v38, %v5216_v38  ;;  %vm6209_vm13 = vmor %vm227_vm0, %vm291_vm10 }
  0xc3   :  { %v8886_v58 = vsel %vm6209_vm13, 4294967295, %v8885_v58  ;;  %v5264_v47 = vsel %vm1288_vm9, 1.0, %v8681_v1  ;;  %v822_v59 = vpack.c.bf16 %v5217_v51, %v5217_v51  ;;  %vm6215_vm14 = vmor %vm228_vm12, %vm292_vm3  ;;  %vm235_vm9 = vcmp.ge.f32.partialorder %v107_v40, 0.5 }
  0xc4   :  { %5238 = vmatmul.msk.bf16.gmra.mxu0 %vm8883_vm5, %v990_v11  ;;  %8887 = vst [vmem:[#allocation23_spill] sm:$0xff] %v8886_v58  ;;  %v8889_v63 = vsel %vm6215_vm14, 4294967295, %v8888_v63  ;;  %v970_v50 = vunpack.c.l.b16 %v821_v52  ;;  %vm547_vm4 = vmxor %vm291_vm10, %vm8818_vm1  ;;  %v1480_v9 = vpack.c.bf16 %v5264_v47, %v5264_v47  ;;  %vm236_vm5 = vcmp.ge.f32.partialorder %v108_v44, 0.5  ;;  %v88_v52 = vld [vmem:[#allocation6 + $0xc8] sm:$0xff]  ;;  %v151_v47 = vld [vmem:[#allocation8 + $0xc0] sm:$0xff] }
  0xc5   :  { %8890 = vst [vmem:[#allocation24_spill] sm:$0xff] %v8889_v63  ;;  %v971_v5 = vunpack.c.l.b16 %v822_v59  ;;  %vm548_vm2 = vmxor %vm292_vm3, %vm8818_vm1  ;;  %vm299_vm10 = vcmp.ge.f32.partialorder %v171_v55, 0.5  ;;  %vm300_vm3 = vcmp.ge.f32.partialorder %v172_v8, 0.5  ;;  %v8902_v44 = vmov 0 }
  0xc6   :  { %vm611_vm11 = vmand %vm227_vm0, %vm547_vm4  ;;  %vm8894_vm0 = vcmask 130048   ;;  %v1585_v35 = vunpack.c.l.b16 %v1480_v9 }
  0xc7   :  { %v1007_v11 = vpack.c.b16 %v971_v5, %v970_v50  ;;  %vm612_vm8 = vmand %vm228_vm12, %vm548_vm2  ;;  %v5198_v17 = vsel %vm611_vm11, 1.0, %v8681_v1  ;;  %v152_v50 = vld [vmem:[#allocation8 + $0xc8] sm:$0xff]  ;;  %vm215_vm11 = vcmp.ge.f32.partialorder %v87_v32, 0.5 }
  0xc8   :  { %v5199_v28 = vsel %vm612_vm8, 1.0, %v8681_v1  ;;  %v803_v33 = vpack.c.bf16 %v5198_v17, %v5198_v17  ;;  %vm6227_vm14 = vmor %vm235_vm9, %vm299_vm10 }
  0xc9   :  { %v1136_v0 = vpop.f32.mrf.mxu0  ;;  %v8892_v37 = vsel %vm6227_vm14, 4294967295, %v8891_v37  ;;  %5255 = vmatmul.msk.bf16.gmra.mxu3 %vm8894_vm0, %v1007_v11  ;;  %v804_v20 = vpack.c.bf16 %v5199_v28, %v5199_v28  ;;  %vm6233_vm4 = vmor %vm236_vm5, %vm300_vm3  ;;  %vm216_vm0 = vcmp.ge.f32.partialorder %v88_v52, 0.5  ;;  %v183_v28 = vld [vmem:[#allocation8 + $0x1c0] sm:$0xff]  ;;  %v8910_v52 = vmov 0 }
  0xca   :  { %vm1289_vm6 = vcmp.gt.f32.partialorder %v1136_v0, 0.0  ;;  %8893 = vst [vmem:[#allocation25_spill] sm:$0xff] %v8892_v37  ;;  %v8896_v34 = vsel %vm6233_vm4, 4294967295, %v8895_v34  ;;  %v952_v51 = vunpack.c.l.b16 %v803_v33  ;;  %vm555_vm12 = vmxor %vm299_vm10, %vm8818_vm1  ;;  %v991_v0 = vpack.c.b16 %v939_v4, %v938_v3  ;;  %v119_v4 = vld [vmem:[#allocation6 + $0x1c0] sm:$0xff] }
  0xcb   :  { %v5265_v10 = vsel %vm1289_vm6, 1.0, %v8681_v1  ;;  %8897 = vst [vmem:[#allocation26_spill] sm:$0xff] %v8896_v34  ;;  %v953_v59 = vunpack.c.l.b16 %v804_v20  ;;  %vm556_vm2 = vmxor %vm300_vm3, %vm8818_vm1  ;;  %vm279_vm4 = vcmp.ge.f32.partialorder %v151_v47, 0.5  ;;  %vm280_vm3 = vcmp.ge.f32.partialorder %v152_v50, 0.5 }
  0xcc   :  { %v1481_v26 = vpack.c.bf16 %v5265_v10, %v5265_v10  ;;  %vm619_vm6 = vmand %vm235_vm9, %vm555_vm12  ;;  %v8898_v3 = vmov 0  ;;  %vm8901_vm9 = vcmask 130048  }
  0xcd   :  { %v998_v8 = vpack.c.b16 %v953_v59, %v952_v51  ;;  %vm620_vm8 = vmand %vm236_vm5, %vm556_vm2  ;;  %v5206_v9 = vsel %vm619_vm6, 1.0, %v8681_v1 }
  0xce   :  { %v1586_v38 = vunpack.c.l.b16 %v1481_v26  ;;  %v5207_v10 = vsel %vm620_vm8, 1.0, %v8681_v1  ;;  %v811_v11 = vpack.c.bf16 %v5206_v9, %v5206_v9  ;;  %vm6244_vm14 = vmor %vm215_vm11, %vm279_vm4  ;;  %v120_v26 = vld [vmem:[#allocation6 + $0x1c8] sm:$0xff]  ;;  %v165_v9 = vld [vmem:[#allocation8 + $0x130] sm:$0xff] }
  0xcf   :  { %v8899_v3 = vsel %vm6244_vm14, 4294967295, %v8898_v3  ;;  %5246 = vmatmul.msk.bf16.gmra.mxu1 %vm8901_vm9, %v998_v8  ;;  %v812_v40 = vpack.c.bf16 %v5207_v10, %v5207_v10  ;;  %vm6250_vm5 = vmor %vm216_vm0, %vm280_vm3  ;;  %vm311_vm14 = vcmp.ge.f32.partialorder %v183_v28, 0.5  ;;  %v102_v8 = vld [vmem:[#allocation6 + $0x138] sm:$0xff] }
  0xd0   :  { %v1587_v55 = vpack.c.b16 %v1586_v38, %v1585_v35  ;;  %8900 = vst [vmem:[#allocation27_spill] sm:$0xff] %v8899_v3  ;;  %v8903_v44 = vsel %vm6250_vm5, 4294967295, %v8902_v44  ;;  %vm8905_vm12 = vmmov %vm8901_vm9  ;;  %v960_v17 = vunpack.c.l.b16 %v811_v11  ;;  %v184_v35 = vld [vmem:[#allocation8 + $0x1c8] sm:$0xff]  ;;  %vm247_vm9 = vcmp.ge.f32.partialorder %v119_v4, 0.5  ;;  %v166_v11 = vld [vmem:[#allocation8 + $0x138] sm:$0xff] }
  0xd1   :  { %v1139_v5 = vpop.f32.mrf.mxu0  ;;  %8904 = vst [vmem:[#allocation28_spill] sm:$0xff] %v8903_v44  ;;  %vm535_vm2 = vmxor %vm279_vm4, %vm8818_vm1  ;;  %v961_v20 = vunpack.c.l.b16 %v812_v40  ;;  %vm312_vm4 = vcmp.ge.f32.partialorder %v184_v35, 0.5  ;;  %v8916_v4 = vmov 0 }
  0xd2   :  { %vm1290_vm10 = vcmp.gt.f32.partialorder %v1139_v5, 0.0  ;;  %1596 = vmatpush.bf16.msrb.mxu3 %v1587_v55  ;;  %vm536_vm6 = vmxor %vm280_vm3, %vm8818_vm1  ;;  %v8906_v55 = vmov 0  ;;  %v101_v5 = vld [vmem:[#allocation6 + $0x130] sm:$0xff] }
  0xd3   :  { %v5266_v33 = vsel %vm1290_vm10, 1.0, %v8681_v1  ;;  %vm599_vm8 = vmand %vm215_vm11, %vm535_vm2  ;;  %v1002_v38 = vpack.c.b16 %v961_v20, %v960_v17  ;;  %vm8909_vm11 = vcmask 130048  }
  0xd4   :  { %5239 = vmatmul.msk.bf16.gmra.mxu0 %vm8905_vm12, %v991_v0  ;;  %vm600_vm5 = vmand %vm216_vm0, %vm536_vm6  ;;  %v5186_v51 = vsel %vm599_vm8, 1.0, %v8681_v1  ;;  %vm248_vm12 = vcmp.ge.f32.partialorder %v120_v26, 0.5  ;;  %v1482_v47 = vpack.c.bf16 %v5266_v33, %v5266_v33  ;;  %v109_v26 = vld [vmem:[#allocation6 + $0x170] sm:$0xff] }
  0xd5   :  { %v5187_v59 = vsel %vm600_vm5, 1.0, %v8681_v1  ;;  %v791_v50 = vpack.c.bf16 %v5186_v51, %v5186_v51  ;;  %vm6263_vm10 = vmor %vm247_vm9, %vm311_vm14  ;;  %5250 = vmatmul.msk.bf16.gmra.mxu2 %vm8909_vm11, %v1002_v38  ;;  %vm229_vm11 = vcmp.ge.f32.partialorder %v101_v5, 0.5 }
  0xd6   :  { %v8907_v55 = vsel %vm6263_vm10, 4294967295, %v8906_v55  ;;  %v792_v0 = vpack.c.bf16 %v5187_v59, %v5187_v59  ;;  %vm6269_vm0 = vmor %vm248_vm12, %vm312_vm4  ;;  %v1605_v40 = vunpack.c.l.b16 %v1482_v47  ;;  %v8913_v47 = vmov 0 }
  0xd7   :  { %8908 = vst [vmem:[#allocation29_spill] sm:$0xff] %v8907_v55  ;;  %v8911_v52 = vsel %vm6269_vm0, 4294967295, %v8910_v52  ;;  %vm567_vm5 = vmxor %vm311_vm14, %vm8818_vm1  ;;  %v940_v28 = vunpack.c.l.b16 %v791_v50  ;;  %vm230_vm0 = vcmp.ge.f32.partialorder %v102_v8, 0.5  ;;  %vm293_vm14 = vcmp.ge.f32.partialorder %v165_v9, 0.5  ;;  %v110_v9 = vld [vmem:[#allocation6 + $0x178] sm:$0xff] }
  0xd8   :  { %8912 = vst [vmem:[#allocation30_spill] sm:$0xff] %v8911_v52  ;;  %vm568_vm2 = vmxor %vm312_vm4, %vm8818_vm1  ;;  %v941_v33 = vunpack.c.l.b16 %v792_v0  ;;  %v8924_v8 = vmov 0 }
  0xd9   :  { %v1141_v32 = vpop.f32.mrf.mxu0  ;;  %vm631_vm6 = vmand %vm247_vm9, %vm567_vm5 }
  0xda   :  { %vm1291_vm3 = vcmp.gt.f32.partialorder %v1141_v32, 0.0  ;;  %vm632_vm8 = vmand %vm248_vm12, %vm568_vm2  ;;  %v5218_v20 = vsel %vm631_vm6, 1.0, %v8681_v1  ;;  %v992_v32 = vpack.c.b16 %v941_v33, %v940_v28  ;;  %vm237_vm6 = vcmp.ge.f32.partialorder %v109_v26, 0.5 }
  0xdb   :  { %v5267_v10 = vsel %vm1291_vm3, 1.0, %v8681_v1  ;;  %v5219_v38 = vsel %vm632_vm8, 1.0, %v8681_v1  ;;  %v823_v51 = vpack.c.bf16 %v5218_v20, %v5218_v20  ;;  %vm294_vm3 = vcmp.ge.f32.partialorder %v166_v11, 0.5  ;;  %vm6281_vm4 = vmor %vm229_vm11, %vm293_vm14  ;;  %v174_v20 = vld [vmem:[#allocation8 + $0x178] sm:$0xff] }
  0xdc   :  { %v1483_v17 = vpack.c.bf16 %v5267_v10, %v5267_v10  ;;  %v8914_v47 = vsel %vm6281_vm4, 4294967295, %v8913_v47  ;;  %v824_v59 = vpack.c.bf16 %v5219_v38, %v5219_v38  ;;  %vm6286_vm9 = vmor %vm230_vm0, %vm294_vm3  ;;  %v173_v10 = vld [vmem:[#allocation8 + $0x170] sm:$0xff]  ;;  %vm302_vm13 = vcmp.ge.f32.partialorder %v174_v20, 0.5 }
  0xdd   :  { %8915 = vst [vmem:[#allocation31_spill] sm:$0xff] %v8914_v47  ;;  %v8917_v4 = vsel %vm6286_vm9, 4294967295, %v8916_v4  ;;  %v972_v0 = vunpack.c.l.b16 %v823_v51  ;;  %vm549_vm12 = vmxor %vm293_vm14, %vm8818_vm1  ;;  %vm238_vm9 = vcmp.ge.f32.partialorder %v110_v9, 0.5  ;;  %vm301_vm4 = vcmp.ge.f32.partialorder %v173_v10, 0.5  ;;  %v89_v51 = vld [vmem:[#allocation6 + $0xd0] sm:$0xff] }
  0xde   :  { %v1606_v35 = vunpack.c.l.b16 %v1483_v17  ;;  %8918 = vst [vmem:[#allocation32_spill] sm:$0xff] %v8917_v4  ;;  %v973_v17 = vunpack.c.l.b16 %v824_v59  ;;  %vm550_vm5 = vmxor %vm294_vm3, %vm8818_vm1  ;;  %vm8919_vm14 = vcmask 130048   ;;  %v90_v59 = vld [vmem:[#allocation6 + $0xd8] sm:$0xff] }
  0xdf   :  { %vm613_vm2 = vmand %vm229_vm11, %vm549_vm12 }
  0xe0   :  { %v1607_v50 = vpack.c.b16 %v1606_v35, %v1605_v40  ;;  %v1008_v38 = vpack.c.b16 %v973_v17, %v972_v0  ;;  %vm614_vm8 = vmand %vm230_vm0, %vm550_vm5  ;;  %v5200_v40 = vsel %vm613_vm2, 1.0, %v8681_v1  ;;  %v8920_v35 = vmov 0  ;;  %v154_v0 = vld [vmem:[#allocation8 + $0xd8] sm:$0xff] }
  0xe1   :  { %v1144_v11 = vpop.f32.mrf.mxu0  ;;  %v5201_v28 = vsel %vm614_vm8, 1.0, %v8681_v1  ;;  %v805_v33 = vpack.c.bf16 %v5200_v40, %v5200_v40  ;;  %vm6298_vm3 = vmor %vm237_vm6, %vm301_vm4  ;;  %vm217_vm8 = vcmp.ge.f32.partialorder %v89_v51, 0.5 }
  0xe2   :  { %1616 = vmatpush.bf16.msra.mxu1 %v1607_v50  ;;  %vm1292_vm10 = vcmp.gt.f32.partialorder %v1144_v11, 0.0  ;;  %v8921_v35 = vsel %vm6298_vm3, 4294967295, %v8920_v35  ;;  %vm8923_vm11 = vmmov %vm8919_vm14  ;;  %v806_v5 = vpack.c.bf16 %v5201_v28, %v5201_v28  ;;  %vm282_vm3 = vcmp.ge.f32.partialorder %v154_v0, 0.5 }
  0xe3   :  { %8922 = vst [vmem:[#allocation33_spill] sm:$0xff] %v8921_v35  ;;  %5256 = vmatmul.msk.bf16.gmra.mxu3 %vm8923_vm11, %v1008_v38  ;;  %vm6304_vm0 = vmor %vm238_vm9, %vm302_vm13  ;;  %v954_v50 = vunpack.c.l.b16 %v805_v33  ;;  %v5268_v10 = vsel %vm1292_vm10, 1.0, %v8681_v1  ;;  %v8935_v0 = vmov 0 }
  0xe4   :  { %5240 = vmatmul.msk.bf16.gmra.mxu0 %vm8919_vm14, %v992_v32  ;;  %v8925_v8 = vsel %vm6304_vm0, 4294967295, %v8924_v8  ;;  %vm557_vm12 = vmxor %vm301_vm4, %vm8818_vm1  ;;  %v153_v32 = vld [vmem:[#allocation8 + $0xd0] sm:$0xff]  ;;  %v955_v11 = vunpack.c.l.b16 %v806_v5  ;;  %vm218_vm14 = vcmp.ge.f32.partialorder %v90_v59, 0.5  ;;  %v1484_v40 = vpack.c.bf16 %v5268_v10, %v5268_v10 }
  0xe5   :  { %8926 = vst [vmem:[#allocation34_spill] sm:$0xff] %v8925_v8  ;;  %vm558_vm5 = vmxor %vm302_vm13, %vm8818_vm1  ;;  %vm281_vm0 = vcmp.ge.f32.partialorder %v153_v32, 0.5  ;;  %v8927_v5 = vmov 0  ;;  %vm8930_vm13 = vcmask 130048   ;;  %v121_v32 = vld [vmem:[#allocation6 + $0x1d0] sm:$0xff]  ;;  %v8939_v59 = vmov 0 }
  0xe6   :  { %vm621_vm2 = vmand %vm237_vm6, %vm557_vm12  ;;  %v999_v20 = vpack.c.b16 %v955_v11, %v954_v50  ;;  %v8931_v50 = vmov 0 }
  0xe7   :  { %vm622_vm11 = vmand %vm238_vm9, %vm558_vm5  ;;  %v5208_v38 = vsel %vm621_vm2, 1.0, %v8681_v1  ;;  %vm249_vm2 = vcmp.ge.f32.partialorder %v121_v32, 0.5 }
  0xe8   :  { %v5209_v28 = vsel %vm622_vm11, 1.0, %v8681_v1  ;;  %v813_v33 = vpack.c.bf16 %v5208_v38, %v5208_v38  ;;  %vm6316_vm10 = vmor %vm217_vm8, %vm281_vm0  ;;  %5247 = vmatmul.msk.bf16.gmra.mxu1 %vm8930_vm13, %v999_v20  ;;  %v185_v38 = vld [vmem:[#allocation8 + $0x1d0] sm:$0xff]  ;;  %v1625_v20 = vunpack.c.l.b16 %v1484_v40 }
  0xe9   :  { %v1146_v17 = vpop.f32.mrf.mxu0  ;;  %v8928_v5 = vsel %vm6316_vm10, 4294967295, %v8927_v5  ;;  %v814_v9 = vpack.c.bf16 %v5209_v28, %v5209_v28  ;;  %vm6324_vm9 = vmor %vm218_vm14, %vm282_vm3  ;;  %vm313_vm13 = vcmp.ge.f32.partialorder %v185_v38, 0.5  ;;  %v104_v38 = vld [vmem:[#allocation6 + $0x148] sm:$0xff] }
  0xea   :  { %vm1293_vm4 = vcmp.gt.f32.partialorder %v1146_v17, 0.0  ;;  %8929 = vst [vmem:[#allocation35_spill] sm:$0xff] %v8928_v5  ;;  %v8932_v50 = vsel %vm6324_vm9, 4294967295, %v8931_v50  ;;  %v962_v11 = vunpack.c.l.b16 %v813_v33  ;;  %vm537_vm6 = vmxor %vm281_vm0, %vm8818_vm1  ;;  %v122_v17 = vld [vmem:[#allocation6 + $0x1d8] sm:$0xff] }
  0xeb   :  { %v5269_v26 = vsel %vm1293_vm4, 1.0, %v8681_v1  ;;  %8933 = vst [vmem:[#allocation36_spill] sm:$0xff] %v8932_v50  ;;  %v963_v8 = vunpack.c.l.b16 %v814_v9  ;;  %vm538_vm12 = vmxor %vm282_vm3, %vm8818_vm1  ;;  %v186_v1 = vld [vmem:[#allocation8 + $0x1d8] sm:$0xff]  ;;  %v8934_v50 = vmov 0.0   ;;  %vm250_vm4 = vcmp.ge.f32.partialorder %v122_v17, 0.5 }
  0xec   :  { %v1485_v10 = vpack.c.bf16 %v5269_v26, %v5269_v26  ;;  %vm601_vm5 = vmand %vm217_vm8, %vm537_vm6  ;;  %vm314_vm0 = vcmp.ge.f32.partialorder %v186_v1, 0.5  ;;  %vm8938_vm8 = vcmask 130048   ;;  %v167_v1 = vld [vmem:[#allocation8 + $0x140] sm:$0xff] }
  0xed   :  { %v1003_v5 = vpack.c.b16 %v963_v8, %v962_v11  ;;  %vm602_vm11 = vmand %vm218_vm14, %vm538_vm12  ;;  %v5188_v26 = vsel %vm601_vm5, 1.0, %v8934_v50 }
  0xee   :  { %v1626_v28 = vunpack.c.l.b16 %v1485_v10  ;;  %v5189_v35 = vsel %vm602_vm11, 1.0, %v8934_v50  ;;  %v793_v9 = vpack.c.bf16 %v5188_v26, %v5188_v26  ;;  %vm6336_vm3 = vmor %vm249_vm2, %vm313_vm13  ;;  %v103_v10 = vld [vmem:[#allocation6 + $0x140] sm:$0xff] }
  0xef   :  { %v8936_v0 = vsel %vm6336_vm3, 4294967295, %v8935_v0  ;;  %5251 = vmatmul.msk.bf16.gmra.mxu2 %vm8938_vm8, %v1003_v5  ;;  %v794_v8 = vpack.c.bf16 %v5189_v35, %v5189_v35  ;;  %vm6342_vm14 = vmor %vm250_vm4, %vm314_vm0  ;;  %vm295_vm3 = vcmp.ge.f32.partialorder %v167_v1, 0.5  ;;  %v175_v1 = vld [vmem:[#allocation8 + $0x180] sm:$0xff] }
  0xf0   :  { %v1627_v33 = vpack.c.b16 %v1626_v28, %v1625_v20  ;;  %8937 = vst [vmem:[#allocation37_spill] sm:$0xff] %v8936_v0  ;;  %v8940_v59 = vsel %vm6342_vm14, 4294967295, %v8939_v59  ;;  %v942_v40 = vunpack.c.l.b16 %v793_v9  ;;  %vm569_vm6 = vmxor %vm313_vm13, %vm8818_vm1  ;;  %v168_v20 = vld [vmem:[#allocation8 + $0x148] sm:$0xff]  ;;  %vm231_vm14 = vcmp.ge.f32.partialorder %v103_v10, 0.5 }
  0xf1   :  { %v1149_v51 = vpop.f32.mrf.mxu0  ;;  %8941 = vst [vmem:[#allocation38_spill] sm:$0xff] %v8940_v59  ;;  %v943_v11 = vunpack.c.l.b16 %v794_v8  ;;  %vm570_vm12 = vmxor %vm314_vm0, %vm8818_vm1  ;;  %vm232_vm13 = vcmp.ge.f32.partialorder %v104_v38, 0.5  ;;  %vm296_vm9 = vcmp.ge.f32.partialorder %v168_v20, 0.5  ;;  %v8946_v9 = vmov 0  ;;  %v112_v8 = vld [vmem:[#allocation6 + $0x188] sm:$0xff] }
  0xf2   :  { %1636 = vmatpush.bf16.msra.mxu2 %v1627_v33  ;;  %vm1294_vm5 = vcmp.gt.f32.partialorder %v1149_v51, 0.0  ;;  %vm633_vm11 = vmand %vm249_vm2, %vm569_vm6  ;;  %v8942_v33 = vmov 0  ;;  %vm8945_vm2 = vcmask 130048   ;;  %v111_v51 = vld [vmem:[#allocation6 + $0x180] sm:$0xff]  ;;  %v8953_v38 = vmov 0 }
  0xf3   :  { %v993_v35 = vpack.c.b16 %v943_v11, %v942_v40  ;;  %vm634_vm8 = vmand %vm250_vm4, %vm570_vm12  ;;  %v5220_v5 = vsel %vm633_vm11, 1.0, %v8934_v50  ;;  %v5270_v32 = vsel %vm1294_vm5, 1.0, %v8934_v50  ;;  %vm239_vm11 = vcmp.ge.f32.partialorder %v111_v51, 0.5 }
  0xf4   :  { %v5221_v28 = vsel %vm634_vm8, 1.0, %v8934_v50  ;;  %v825_v26 = vpack.c.bf16 %v5220_v5, %v5220_v5  ;;  %vm6353_vm10 = vmor %vm231_vm14, %vm295_vm3  ;;  %v176_v5 = vld [vmem:[#allocation8 + $0x188] sm:$0xff]  ;;  %vm240_vm8 = vcmp.ge.f32.partialorder %v112_v8, 0.5  ;;  %v8960_v8 = vmov 0 }
  0xf5   :  { %v8943_v33 = vsel %vm6353_vm10, 4294967295, %v8942_v33  ;;  %5241 = vmatmul.msk.bf16.gmra.mxu0 %vm8945_vm2, %v993_v35  ;;  %v826_v17 = vpack.c.bf16 %v5221_v28, %v5221_v28  ;;  %vm6360_vm4 = vmor %vm232_vm13, %vm296_vm9 }
  0xf6   :  { %8944 = vst [vmem:[#allocation39_spill] sm:$0xff] %v8943_v33  ;;  %v8947_v9 = vsel %vm6360_vm4, 4294967295, %v8946_v9  ;;  %v974_v40 = vunpack.c.l.b16 %v825_v26  ;;  %vm551_vm0 = vmxor %vm295_vm3, %vm8818_vm1  ;;  %v1486_v33 = vpack.c.bf16 %v5270_v32, %v5270_v32  ;;  %vm303_vm3 = vcmp.ge.f32.partialorder %v175_v1, 0.5 }
  0xf7   :  { %8948 = vst [vmem:[#allocation40_spill] sm:$0xff] %v8947_v9  ;;  %v975_v20 = vunpack.c.l.b16 %v826_v17  ;;  %vm552_vm6 = vmxor %vm296_vm9, %vm8818_vm1  ;;  %vm304_vm9 = vcmp.ge.f32.partialorder %v176_v5, 0.5  ;;  %v8949_v32 = vmov 0  ;;  %v155_v5 = vld [vmem:[#allocation8 + $0xe0] sm:$0xff] }
  0xf8   :  { %vm615_vm5 = vmand %vm231_vm14, %vm551_vm0  ;;  %vm8952_vm14 = vcmask 130048  }
  0xf9   :  { %v1151_v11 = vpop.f32.mrf.mxu0  ;;  %v1009_v28 = vpack.c.b16 %v975_v20, %v974_v40  ;;  %vm616_vm2 = vmand %vm232_vm13, %vm552_vm6  ;;  %v5202_v26 = vsel %vm615_vm5, 1.0, %v8934_v50  ;;  %v1645_v40 = vunpack.c.l.b16 %v1486_v33  ;;  %v91_v20 = vld [vmem:[#allocation6 + $0xe0] sm:$0xff] }
  0xfa   :  { %vm1295_vm12 = vcmp.gt.f32.partialorder %v1151_v11, 0.0  ;;  %v5203_v17 = vsel %vm616_vm2, 1.0, %v8934_v50  ;;  %v807_v59 = vpack.c.bf16 %v5202_v26, %v5202_v26  ;;  %vm6372_vm4 = vmor %vm239_vm11, %vm303_vm3  ;;  %v92_v26 = vld [vmem:[#allocation6 + $0xe8] sm:$0xff]  ;;  %vm219_vm2 = vcmp.ge.f32.partialorder %v91_v20, 0.5 }
  0xfb   :  { %v5271_v35 = vsel %vm1295_vm12, 1.0, %v8934_v50  ;;  %v8950_v32 = vsel %vm6372_vm4, 4294967295, %v8949_v32  ;;  %5257 = vmatmul.msk.bf16.gmra.mxu3 %vm8952_vm14, %v1009_v28  ;;  %v808_v10 = vpack.c.bf16 %v5203_v17, %v5203_v17  ;;  %vm6378_vm0 = vmor %vm240_vm8, %vm304_vm9  ;;  %vm283_vm14 = vcmp.ge.f32.partialorder %v155_v5, 0.5  ;;  %v188_v5 = vld [vmem:[#allocation8 + $0x1e8] sm:$0xff] }
  0xfc   :  { %v1487_v9 = vpack.c.bf16 %v5271_v35, %v5271_v35  ;;  %8951 = vst [vmem:[#allocation41_spill] sm:$0xff] %v8950_v32  ;;  %v8954_v38 = vsel %vm6378_vm0, 4294967295, %v8953_v38  ;;  %v956_v11 = vunpack.c.l.b16 %v807_v59  ;;  %vm559_vm13 = vmxor %vm303_vm3, %vm8818_vm1  ;;  %v156_v32 = vld [vmem:[#allocation8 + $0xe8] sm:$0xff]  ;;  %vm220_vm3 = vcmp.ge.f32.partialorder %v92_v26, 0.5 }
  0xfd   :  { %8955 = vst [vmem:[#allocation42_spill] sm:$0xff] %v8954_v38  ;;  %v957_v35 = vunpack.c.l.b16 %v808_v10  ;;  %vm560_vm6 = vmxor %vm304_vm9, %vm8818_vm1  ;;  %vm284_vm0 = vcmp.ge.f32.partialorder %v156_v32, 0.5  ;;  %v8956_v10 = vmov 0  ;;  %v8967_v26 = vmov 0 }
  0xfe   :  { %v1646_v1 = vunpack.c.l.b16 %v1487_v9  ;;  %vm623_vm12 = vmand %vm239_vm11, %vm559_vm13  ;;  %vm8959_vm11 = vcmask 130048  }
  0xff   :  { %v1000_v17 = vpack.c.b16 %v957_v35, %v956_v11  ;;  %vm624_vm5 = vmand %vm240_vm8, %vm560_vm6  ;;  %v5210_v33 = vsel %vm623_vm12, 1.0, %v8934_v50  ;;  %v124_v11 = vld [vmem:[#allocation6 + $0x1e8] sm:$0xff] }
 0x100   :  { %v1647_v0 = vpack.c.b16 %v1646_v1, %v1645_v40  ;;  %v5211_v59 = vsel %vm624_vm5, 1.0, %v8934_v50  ;;  %v815_v9 = vpack.c.bf16 %v5210_v33, %v5210_v33  ;;  %vm6389_vm9 = vmor %vm219_vm2, %vm283_vm14  ;;  %v123_v40 = vld [vmem:[#allocation6 + $0x1e0] sm:$0xff] }
 0x101   :  { %v1154_v28 = vpop.f32.mrf.mxu0  ;;  %v8957_v10 = vsel %vm6389_vm9, 4294967295, %v8956_v10  ;;  %5248 = vmatmul.msk.bf16.gmra.mxu1 %vm8959_vm11, %v1000_v17  ;;  %v816_v51 = vpack.c.bf16 %v5211_v59, %v5211_v59  ;;  %vm6395_vm8 = vmor %vm220_vm3, %vm284_vm0  ;;  %vm251_vm11 = vcmp.ge.f32.partialorder %v123_v40, 0.5 }
 0x102   :  { %1656 = vmatpush.bf16.msra.mxu3 %v1647_v0  ;;  %8958 = vst [vmem:[#allocation43_spill] sm:$0xff] %v8957_v10  ;;  %v8961_v8 = vsel %vm6395_vm8, 4294967295, %v8960_v8  ;;  %vm1296_vm13 = vcmp.gt.f32.partialorder %v1154_v28, 0.0  ;;  %v964_v1 = vunpack.c.l.b16 %v815_v9  ;;  %vm539_vm6 = vmxor %vm283_vm14, %vm8818_vm1  ;;  %v187_v0 = vld [vmem:[#allocation8 + $0x1e0] sm:$0xff]  ;;  %vm252_vm14 = vcmp.ge.f32.partialorder %v124_v11, 0.5  ;;  %v93_v11 = vld [vmem:[#allocation6 + $0xf0] sm:$0xff] }
 0x103   :  { %8962 = vst [vmem:[#allocation44_spill] sm:$0xff] %v8961_v8  ;;  %v965_v32 = vunpack.c.l.b16 %v816_v51  ;;  %vm540_vm12 = vmxor %vm284_vm0, %vm8818_vm1  ;;  %v5272_v35 = vsel %vm1296_vm13, 1.0, %v8934_v50  ;;  %vm315_vm10 = vcmp.ge.f32.partialorder %v187_v0, 0.5  ;;  %vm316_vm8 = vcmp.ge.f32.partialorder %v188_v5, 0.5  ;;  %v177_v8 = vld [vmem:[#allocation8 + $0x190] sm:$0xff] }
 0x104   :  { %vm603_vm5 = vmand %vm219_vm2, %vm539_vm6  ;;  %v8963_v9 = vmov 0  ;;  %vm8966_vm2 = vcmask 130048   ;;  %v8970_v5 = vmov 0 }
 0x105   :  { %v1004_v17 = vpack.c.b16 %v965_v32, %v964_v1  ;;  %vm604_vm4 = vmand %vm220_vm3, %vm540_vm12  ;;  %v5190_v33 = vsel %vm603_vm5, 1.0, %v8934_v50  ;;  %v113_v1 = vld [vmem:[#allocation6 + $0x190] sm:$0xff]  ;;  %v114_v32 = vld [vmem:[#allocation6 + $0x198] sm:$0xff] }
 0x106   :  { %v5191_v28 = vsel %vm604_vm4, 1.0, %v8934_v50  ;;  %v795_v59 = vpack.c.bf16 %v5190_v33, %v5190_v33  ;;  %vm6408_vm0 = vmor %vm251_vm11, %vm315_vm10  ;;  %v1488_v33 = vpack.c.bf16 %v5272_v35, %v5272_v35  ;;  %vm241_vm5 = vcmp.ge.f32.partialorder %v113_v1, 0.5 }
 0x107   :  { %v8964_v9 = vsel %vm6408_vm0, 4294967295, %v8963_v9  ;;  %5252 = vmatmul.msk.bf16.gmra.mxu2 %vm8966_vm2, %v1004_v17  ;;  %v796_v20 = vpack.c.bf16 %v5191_v28, %v5191_v28  ;;  %vm6415_vm3 = vmor %vm252_vm14, %vm316_vm8  ;;  %vm242_vm2 = vcmp.ge.f32.partialorder %v114_v32, 0.5  ;;  %vm305_vm0 = vcmp.ge.f32.partialorder %v177_v8, 0.5 }
 0x108   :  { %8965 = vst [vmem:[#allocation45_spill] sm:$0xff] %v8964_v9  ;;  %v8968_v26 = vsel %vm6415_vm3, 4294967295, %v8967_v26  ;;  %v944_v38 = vunpack.c.l.b16 %v795_v59  ;;  %vm571_vm13 = vmxor %vm315_vm10, %vm8818_vm1  ;;  %v178_v9 = vld [vmem:[#allocation8 + $0x198] sm:$0xff]  ;;  %v1665_v0 = vunpack.c.l.b16 %v1488_v33  ;;  %v157_v33 = vld [vmem:[#allocation8 + $0xf0] sm:$0xff]  ;;  %v8982_v32 = vmov 0 }
 0x109   :  { %v1156_v51 = vpop.f32.mrf.mxu0  ;;  %8969 = vst [vmem:[#allocation46_spill] sm:$0xff] %v8968_v26  ;;  %v945_v10 = vunpack.c.l.b16 %v796_v20  ;;  %vm572_vm6 = vmxor %vm316_vm8, %vm8818_vm1  ;;  %vm306_vm10 = vcmp.ge.f32.partialorder %v178_v9, 0.5  ;;  %vm8973_vm8 = vcmask 130048   ;;  %v8978_v9 = vmov 0 }
 0x10a   :  { %vm1297_vm4 = vcmp.gt.f32.partialorder %v1156_v51, 0.0  ;;  %vm635_vm12 = vmand %vm251_vm11, %vm571_vm13 }
 0x10b   :  { %v5273_v17 = vsel %vm1297_vm4, 1.0, %v8934_v50  ;;  %v994_v26 = vpack.c.b16 %v945_v10, %v944_v38  ;;  %vm636_vm3 = vmand %vm252_vm14, %vm572_vm6  ;;  %v5222_v35 = vsel %vm635_vm12, 1.0, %v8934_v50  ;;  %v8974_v38 = vmov 0 }
 0x10c   :  { %v1489_v28 = vpack.c.bf16 %v5273_v17, %v5273_v17  ;;  %v5223_v20 = vsel %vm636_vm3, 1.0, %v8934_v50  ;;  %v827_v51 = vpack.c.bf16 %v5222_v35, %v5222_v35  ;;  %vm6429_vm4 = vmor %vm241_vm5, %vm305_vm0  ;;  %v94_v35 = vld [vmem:[#allocation6 + $0xf8] sm:$0xff] }
 0x10d   :  { %v8971_v5 = vsel %vm6429_vm4, 4294967295, %v8970_v5  ;;  %5242 = vmatmul.msk.bf16.gmra.mxu0 %vm8973_vm8, %v994_v26  ;;  %v828_v40 = vpack.c.bf16 %v5223_v20, %v5223_v20  ;;  %vm6436_vm11 = vmor %vm242_vm2, %vm306_vm10  ;;  %v158_v26 = vld [vmem:[#allocation8 + $0xf8] sm:$0xff] }
 0x10e   :  { %v1666_v59 = vunpack.c.l.b16 %v1489_v28  ;;  %8972 = vst [vmem:[#allocation47_spill] sm:$0xff] %v8971_v5  ;;  %v8975_v38 = vsel %vm6436_vm11, 4294967295, %v8974_v38  ;;  %v976_v8 = vunpack.c.l.b16 %v827_v51  ;;  %vm561_vm14 = vmxor %vm305_vm0, %vm8818_vm1  ;;  %vm221_vm0 = vcmp.ge.f32.partialorder %v93_v11, 0.5  ;;  %v189_v51 = vld [vmem:[#allocation8 + $0x1f0] sm:$0xff] }
 0x10f   :  { %8976 = vst [vmem:[#allocation48_spill] sm:$0xff] %v8975_v38  ;;  %v977_v17 = vunpack.c.l.b16 %v828_v40  ;;  %vm562_vm3 = vmxor %vm306_vm10, %vm8818_vm1  ;;  %vm222_vm11 = vcmp.ge.f32.partialorder %v94_v35, 0.5  ;;  %vm286_vm10 = vcmp.ge.f32.partialorder %v158_v26, 0.5  ;;  %v8987_v11 = vmov 0 }
 0x110   :  { %v1667_v10 = vpack.c.b16 %v1666_v59, %v1665_v0  ;;  %vm625_vm13 = vmand %vm241_vm5, %vm561_vm14 }
 0x111   :  { %v1159_v28 = vpop.f32.mrf.mxu0  ;;  %v1010_v20 = vpack.c.b16 %v977_v17, %v976_v8  ;;  %vm626_vm6 = vmand %vm242_vm2, %vm562_vm3  ;;  %v5212_v38 = vsel %vm625_vm13, 1.0, %v8934_v50 }
 0x112   :  { %vm8977_vm12 = vmmov %vm8973_vm8  ;;  %vm285_vm8 = vcmp.ge.f32.partialorder %v157_v33, 0.5  ;;  %v5213_v0 = vsel %vm626_vm6, 1.0, %v8934_v50  ;;  %v817_v59 = vpack.c.bf16 %v5212_v38, %v5212_v38  ;;  %v125_v38 = vld [vmem:[#allocation6 + $0x1f0] sm:$0xff]  ;;  %v6465_v33 = vld [vmem:[#allocation6 + $0x1f8] sm:$0xff]  ;;  %vm317_vm6 = vcmp.ge.f32.partialorder %v189_v51, 0.5 }
 0x113   :  { %5324 = vmatmul.msk.bf16.vlgmr.msrb.gmra.mxu1 %vm8977_vm12, %v5752_v30  ;;  %vm6450_vm4 = vmor %vm221_vm0, %vm285_vm8  ;;  %v818_v1 = vpack.c.bf16 %v5213_v0, %v5213_v0  ;;  %8986 = vst [vmem:[#allocation52_spill] sm:$0xff] %v6465_v33 }
 0x114   :  { %1676 = vmatpush.bf16.msrb.mxu1 %v1667_v10  ;;  %v8979_v9 = vsel %vm6450_vm4, 4294967295, %v8978_v9  ;;  %vm8981_vm5 = vmmov %vm8977_vm12  ;;  %v966_v40 = vunpack.c.l.b16 %v817_v59  ;;  %v6461_v10 = vld [vmem:[#allocation8 + $0x1f8] sm:$0xff] }
 0x115   :  { %8980 = vst [vmem:[#allocation49_spill] sm:$0xff] %v8979_v9  ;;  %5258 = vmatmul.msk.bf16.gmra.mxu3 %vm8981_vm5, %v1010_v20  ;;  %vm6456_vm2 = vmor %vm222_vm11, %vm286_vm10  ;;  %v967_v8 = vunpack.c.l.b16 %v818_v1  ;;  %vm253_vm5 = vcmp.ge.f32.partialorder %v125_v38, 0.5 }
 0x116   :  { %v8983_v32 = vsel %vm6456_vm2, 4294967295, %v8982_v32  ;;  %vm541_vm14 = vmxor %vm285_vm8, %vm8818_vm1  ;;  %8985 = vst [vmem:[#allocation51_spill] sm:$0xff] %v6461_v10  ;;  %vm8741_vm8 = vcmp.ge.f32.partialorder %v6461_v10, 0.5 }
 0x117   :  { %8984 = vst [vmem:[#allocation50_spill] sm:$0xff] %v8983_v32  ;;  %vm542_vm3 = vmxor %vm286_vm10, %vm8818_vm1  ;;  %v1005_v17 = vpack.c.b16 %v967_v8, %v966_v40 }
 0x118   :  { %vm605_vm13 = vmand %vm221_vm0, %vm541_vm14  ;;  %vm8990_vm0 = vcmask 130048  }
 0x119   :  { %vm606_vm12 = vmand %vm222_vm11, %vm542_vm3  ;;  %v5192_v26 = vsel %vm605_vm13, 1.0, %v8934_v50  ;;  %v1161_v20 = vpop.f32.mrf.mxu0  ;;  %5253 = vmatmul.msk.bf16.gmra.mxu2 %vm8990_vm0, %v1005_v17  ;;  %vm8740_vm11 = vcmp.ge.f32.partialorder %v6465_v33, 0.5  ;;  %vm1298_vm3 = vcmp.gt.f32.partialorder %v1159_v28, 0.0 }
 0x11a   :  { %v5193_v0 = vsel %vm606_vm12, 1.0, %v8934_v50  ;;  %v797_v59 = vpack.c.bf16 %v5192_v26, %v5192_v26  ;;  %vm1299_vm2 = vcmp.gt.f32.partialorder %v1161_v20, 0.0  ;;  %vm6472_vm10 = vmor %vm253_vm5, %vm317_vm6  ;;  %v5274_v17 = vsel %vm1298_vm3, 1.0, %v8934_v50 }
 0x11b   :  { %v8988_v11 = vsel %vm6472_vm10, 4294967295, %v8987_v11  ;;  %v798_v1 = vpack.c.bf16 %v5193_v0, %v5193_v0  ;;  %vm573_vm14 = vmxor %vm317_vm6, %vm8818_vm1  ;;  %v5275_v40 = vsel %vm1299_vm2, 1.0, %v8934_v50  ;;  %v1490_v10 = vpack.c.bf16 %v5274_v17, %v5274_v17 }
 0x11c   :  { %8989 = vst [vmem:[#allocation53_spill] sm:$0xff] %v8988_v11  ;;  %v946_v35 = vunpack.c.l.b16 %v797_v59  ;;  %vm574_vm13 = vmxor %vm8741_vm8, %vm8818_vm1  ;;  %v1491_v0 = vpack.c.bf16 %v5275_v40, %v5275_v40 }
 0x11d   :  { %v947_v51 = vunpack.c.l.b16 %v798_v1  ;;  %vm637_vm12 = vmand %vm253_vm5, %vm573_vm14  ;;  %v1685_v32 = vunpack.c.l.b16 %v1490_v10 }
 0x11e   :  { %vm638_vm10 = vmand %vm8740_vm11, %vm574_vm13  ;;  %v5224_v8 = vsel %vm637_vm12, 1.0, %v8934_v50  ;;  %v1686_v33 = vunpack.c.l.b16 %v1491_v0 }
 0x11f   :  { %v995_v26 = vpack.c.b16 %v947_v51, %v946_v35  ;;  %v5225_v28 = vsel %vm638_vm10, 1.0, %v8934_v50  ;;  %v829_v20 = vpack.c.bf16 %v5224_v8, %v5224_v8  ;;  %vm8991_vm6 = vmmov %vm8990_vm0 }
 0x120   :  { %v830_v59 = vpack.c.bf16 %v5225_v28, %v5225_v28  ;;  %vm8992_vm1 = vmmov %vm8990_vm0  ;;  %v1687_v35 = vpack.c.b16 %v1686_v33, %v1685_v32 }
 0x121   :  { %5243 = vmatmul.msk.bf16.gmra.mxu0 %vm8991_vm6, %v995_v26  ;;  %v978_v1 = vunpack.c.l.b16 %v829_v20  ;;  %v1164_v11 = vpop.f32.mrf.mxu0  ;;  %vm8993_vm2 = vmmov %vm8990_vm0 }
 0x122   :  { %v979_v38 = vunpack.c.l.b16 %v830_v59  ;;  %vm1300_vm5 = vcmp.gt.f32.partialorder %v1164_v11, 0.0  ;;  %vm8994_vm14 = vmmov %vm8990_vm0 }
 0x123   :  { %5327 = vmatmul.msk.bf16.vlgmr.msra.gmra.mxu1 %vm8992_vm1, %v5752_v30  ;;  %v5276_v40 = vsel %vm1300_vm5, 1.0, %v8934_v50  ;;  %vm8995_vm13 = vmmov %vm8990_vm0 }
 0x124   :  { %v1011_v5 = vpack.c.b16 %v979_v38, %v978_v1  ;;  %v1492_v26 = vpack.c.bf16 %v5276_v40, %v5276_v40  ;;  %vm8996_vm6 = vmmov %vm8990_vm0 }
 0x125   :  { %vm8998_vm5 = vmmov %vm8990_vm0 }
 0x126   :  { %5259 = vmatmul.msk.bf16.gmra.mxu3 %vm8993_vm2, %v1011_v5  ;;  %v1705_v20 = vunpack.c.l.b16 %v1492_v26  ;;  %v6501_v5 = vpop.f32.mrf.mxu1  ;;  %vm8997_vm2 = vmmov %vm8990_vm0 }
 0x129   :  { %v1166_v51 = vpop.f32.mrf.mxu0  ;;  %5325 = vmatmul.msk.bf16.vlgmr.msrb.gmra.mxu2 %vm8990_vm0, %v5752_v30 }
 0x12a   :  { %vm1301_vm10 = vcmp.gt.f32.partialorder %v1166_v51, 0.0  ;;  %1696 = vmatpush.bf16.msrb.mxu2 %v1687_v35 }
 0x12b   :  { %v5277_v8 = vsel %vm1301_vm10, 1.0, %v8934_v50 }
 0x12c   :  { %v1493_v17 = vpack.c.bf16 %v5277_v8, %v5277_v8  ;;  %v6514_v26 = vpop.f32.mrf.mxu3 }
 0x12e   :  { %v1706_v28 = vunpack.c.l.b16 %v1493_v17  ;;  %v6507_v40 = vpop.f32.mrf.mxu1 }
 0x130   :  { %v1707_v10 = vpack.c.b16 %v1706_v28, %v1705_v20 }
 0x131   :  { %v1169_v0 = vpop.f32.mrf.mxu0 }
 0x132   :  { %vm1302_vm3 = vcmp.gt.f32.partialorder %v1169_v0, 0.0 }
 0x133   :  { %5330 = vmatmul.msk.bf16.vlgmr.msrb.gmra.mxu1 %vm8994_vm14, %v5752_v30  ;;  %v5278_v32 = vsel %vm1302_vm3, 1.0, %v8934_v50  ;;  %vm8999_vm3 = vmmov %vm8990_vm0 }
 0x134   :  { %v1494_v11 = vpack.c.bf16 %v5278_v32, %v5278_v32 }
 0x136   :  { %5326 = vmatmul.msk.bf16.vlgmr.msrb.gmra.mxu3 %vm8995_vm13, %v5752_v30  ;;  %v1725_v38 = vunpack.c.l.b16 %v1494_v11  ;;  %v6516_v28 = vpop.f32.mrf.mxu1 }
 0x137   :  { %1716 = vmatpush.bf16.msrb.mxu3 %v1707_v10 }
 0x139   :  { %v1171_v33 = vpop.f32.mrf.mxu0  ;;  %5328 = vmatmul.msk.bf16.vlgmr.msra.gmra.mxu2 %vm8996_vm6, %v5752_v30 }
 0x13a   :  { %vm1303_vm12 = vcmp.gt.f32.partialorder %v1171_v33, 0.0 }
 0x13b   :  { %v5279_v59 = vsel %vm1303_vm12, 1.0, %v8934_v50  ;;  %vm9000_vm12 = vmmov %vm8990_vm0 }
 0x13c   :  { %v1495_v1 = vpack.c.bf16 %v5279_v59, %v5279_v59 }
 0x13e   :  { %v1726_v35 = vunpack.c.l.b16 %v1495_v1  ;;  %v6521_v1 = vpop.f32.mrf.mxu2 }
 0x140   :  { %v1727_v51 = vpack.c.b16 %v1726_v35, %v1725_v38  ;;  %v6523_v38 = vpop.f32.mrf.mxu1 }
 0x141   :  { %v1174_v8 = vpop.f32.mrf.mxu0 }
 0x142   :  { %1736 = vmatpush.bf16.msra.mxu1 %v1727_v51  ;;  %vm1304_vm1 = vcmp.gt.f32.partialorder %v1174_v8, 0.0  ;;  %v6525_v51 = vpop.f32.mrf.mxu3 }
 0x143   :  { %v5280_v17 = vsel %vm1304_vm1, 1.0, %v8934_v50  ;;  %vm9001_vm1 = vmmov %vm8990_vm0 }
 0x144   :  { %v1496_v0 = vpack.c.bf16 %v5280_v17, %v5280_v17 }
 0x145   :  { %5333 = vmatmul.msk.bf16.vlgmr.msra.gmra.mxu1 %vm8997_vm2, %v5752_v30 }
 0x146   :  { %5329 = vmatmul.msk.bf16.vlgmr.msra.gmra.mxu3 %vm8998_vm5, %v5752_v30  ;;  %v1745_v33 = vunpack.c.l.b16 %v1496_v0  ;;  %vm9002_vm5 = vmmov %vm8990_vm0 }
 0x149   :  { %v1176_v20 = vpop.f32.mrf.mxu0  ;;  %5331 = vmatmul.msk.bf16.vlgmr.msrb.gmra.mxu2 %vm8990_vm0, %v5752_v30  ;;  %vm1317_vm0 = vcmp.gt.f32.partialorder %v6507_v40, 0.0 }
 0x14a   :  { %vm1305_vm10 = vcmp.gt.f32.partialorder %v1176_v20, 0.0 }
 0x14b   :  { %v5281_v10 = vsel %vm1305_vm10, 1.0, %v8934_v50  ;;  %vm1316_vm10 = vcmp.gt.f32.partialorder %v6501_v5, 0.0 }
 0x14c   :  { %v1497_v32 = vpack.c.bf16 %v5281_v10, %v5281_v10  ;;  %v6530_v20 = vpop.f32.mrf.mxu1  ;;  %v6532_v10 = vpop.f32.mrf.mxu2 }
 0x14e   :  { %v1746_v11 = vunpack.c.l.b16 %v1497_v32 }
 0x150   :  { %v1747_v59 = vpack.c.b16 %v1746_v11, %v1745_v33  ;;  %v6537_v11 = vpop.f32.mrf.mxu3 }
 0x151   :  { %v1179_v35 = vpop.f32.mrf.mxu0 }
 0x152   :  { %1756 = vmatpush.bf16.msra.mxu2 %v1747_v59  ;;  %vm1306_vm14 = vcmp.gt.f32.partialorder %v1179_v35, 0.0 }
 0x153   :  { %v5282_v8 = vsel %vm1306_vm14, 1.0, %v8934_v50 }
 0x154   :  { %v1498_v0 = vpack.c.bf16 %v5282_v8, %v5282_v8  ;;  %v6539_v47 = vpop.f32.mrf.mxu1 }
 0x156   :  { %5332 = vmatmul.msk.bf16.vlgmr.msrb.gmra.mxu3 %vm8999_vm3, %v5752_v30  ;;  %v1765_v59 = vunpack.c.l.b16 %v1498_v0 }
 0x158   :  { %v1234_v8 = vpop.f32.mrf.mxu2 }
 0x159   :  { %v1181_v17 = vpop.f32.mrf.mxu0  ;;  %5334 = vmatmul.msk.bf16.vlgmr.msra.gmra.mxu2 %vm9000_vm12, %v5752_v30 }
 0x15a   :  { %vm1307_vm13 = vcmp.gt.f32.partialorder %v1181_v17, 0.0  ;;  %v6543_v17 = vpop.f32.mrf.mxu3 }
 0x15b   :  { %v5283_v32 = vsel %vm1307_vm13, 1.0, %v8934_v50 }
 0x15c   :  { %v1499_v33 = vpack.c.bf16 %v5283_v32, %v5283_v32 }
 0x15e   :  { %v1766_v35 = vunpack.c.l.b16 %v1499_v33 }
 0x160   :  { %v1767_v9 = vpack.c.b16 %v1766_v35, %v1765_v59  ;;  %v1236_v44 = vpop.f32.mrf.mxu2 }
 0x161   :  { %v1184_v4 = vpop.f32.mrf.mxu0 }
 0x162   :  { %1776 = vmatpush.bf16.msra.mxu3 %v1767_v9  ;;  %vm1308_vm6 = vcmp.gt.f32.partialorder %v1184_v4, 0.0 }
 0x163   :  { %v5284_v52 = vsel %vm1308_vm6, 1.0, %v8934_v50  ;;  %vm1328_vm6 = vcmp.gt.f32.partialorder %v1234_v8, 0.0 }
 0x164   :  { %v1500_v32 = vpack.c.bf16 %v5284_v52, %v5284_v52 }
 0x165   :  { %v1219_v59 = vpop.f32.mrf.mxu1 }
 0x166   :  { %5335 = vmatmul.msk.bf16.vlgmr.msra.gmra.mxu3 %vm9001_vm1, %v5752_v30  ;;  %v1785_v35 = vunpack.c.l.b16 %v1500_v32  ;;  %v6547_v4 = vpop.f32.mrf.mxu3  ;;  %vm1322_vm3 = vcmp.gt.f32.partialorder %v1219_v59, 0.0  ;;  %v5292_v32 = vsel %vm1316_vm10, 1.0, %v8934_v50  ;;  %vm1329_vm1 = vcmp.gt.f32.partialorder %v1236_v44, 0.0 }
 0x167   :  { %vm9005_vm10 = vnez %v8745_v18  ;;  %v5499_v18 = vld [vmem:[#allocation6 + $0x10] sm:$0xff] }
 0x169   :  { %v1186_v55 = vpop.f32.mrf.mxu0 }
 0x16a   :  { %vm1309_vm2 = vcmp.gt.f32.partialorder %v1186_v55, 0.0 }
 0x16b   :  { %v5285_v0 = vsel %vm1309_vm2, 1.0, %v8934_v50  ;;  %vm9003_vm2 = vmmov %vm9002_vm5 }
 0x16c   :  { %v1501_v33 = vpack.c.bf16 %v5285_v0, %v5285_v0  ;;  %v5293_v0 = vsel %vm1317_vm0, 1.0, %v8934_v50  ;;  %vm1318_vm0 = vcmp.gt.f32.partialorder %v6516_v28, 0.0 }
 0x16d   :  { %v1221_v55 = vpop.f32.mrf.mxu1  ;;  %v1509_v5 = vpack.c.bf16 %v5293_v0, %v5293_v0 }
 0x16e   :  { %v1786_v9 = vunpack.c.l.b16 %v1501_v33  ;;  %vm1323_vm13 = vcmp.gt.f32.partialorder %v1221_v55, 0.0 }
 0x16f   :  { %v5299_v40 = vsel %vm1323_vm13, 1.0, %v8934_v50  ;;  %v1866_v60 = vunpack.c.l.b16 %v1509_v5  ;;  %v4560_v5 = vld [vmem:[#allocation3 + $0x10] sm:$0xff] }
 0x170   :  { %v1787_v3 = vpack.c.b16 %v1786_v9, %v1785_v35  ;;  %v5298_v35 = vsel %vm1322_vm3, 1.0, %v8934_v50  ;;  %v1508_v9 = vpack.c.bf16 %v5292_v32, %v5292_v32  ;;  %v1515_v63 = vpack.c.bf16 %v5299_v40, %v5299_v40 }
 0x171   :  { %v1514_v59 = vpack.c.bf16 %v5298_v35, %v5298_v35  ;;  %v5099_v40 = vsel %vm9005_vm10, 1.0, %v8934_v50 }
 0x172   :  { %1796 = vmatpush.bf16.msrb.mxu1 %v1787_v3  ;;  %v1189_v34 = vpop.f32.mrf.mxu0  ;;  %v6553_v52 = vpop.f32.mrf.mxu2  ;;  %v1865_v13 = vunpack.c.l.b16 %v1508_v9  ;;  %v1926_v21 = vunpack.c.l.b16 %v1515_v63  ;;  %v5305_v63 = vsel %vm1329_vm1, 1.0, %v8934_v50 }
 0x173   :  { %vm1310_vm14 = vcmp.gt.f32.partialorder %v1189_v34, 0.0  ;;  %v6558_v3 = vpop.f32.mrf.mxu3  ;;  %v1925_v36 = vunpack.c.l.b16 %v1514_v59  ;;  %v4561_v59 = vld [vmem:[#allocation3 + $0x18] sm:$0xff] }
 0x174   :  { %v5286_v33 = vsel %vm1310_vm14, 1.0, %v8934_v50  ;;  %v1867_v0 = vpack.c.b16 %v1866_v60, %v1865_v13  ;;  %v5498_v60 = vld [vmem:[#allocation6 + $0x8] sm:$0xff]  ;;  %vm1319_vm14 = vcmp.gt.f32.partialorder %v6523_v38, 0.0 }
 0x175   :  { %5336 = vmatmul.msk.bf16.vlgmr.msrb.gmra.mxu1 %vm9002_vm5, %v5752_v30  ;;  %v1502_v34 = vpack.c.bf16 %v5286_v33, %v5286_v33  ;;  %v4558_v33 = vld [vmem:[#allocation3] sm:$0xff]  ;;  %vm9004_vm5 = vnez %v8743_v16  ;;  %v4563_v38 = vld [vmem:[#allocation3 + $0x28] sm:$0xff] }
 0x176   :  { %v5098_v8 = vsel %vm9004_vm5, 1.0, %v8934_v50  ;;  %vm9013_vm5 = vcmask 130048  }
 0x177   :  { %v1805_v39 = vunpack.c.l.b16 %v1502_v34 }
 0x17a   :  { %v1191_v37 = vpop.f32.mrf.mxu0  ;;  %v6563_v55 = vpop.f32.mrf.mxu2 }
 0x17b   :  { %vm1311_vm12 = vcmp.gt.f32.partialorder %v1191_v37, 0.0  ;;  %v1927_v37 = vpack.c.b16 %v1926_v21, %v1925_v36  ;;  %v1521_v21 = vpack.c.bf16 %v5305_v63, %v5305_v63  ;;  %v5500_v63 = vld [vmem:[#allocation6 + $0x18] sm:$0xff] }
 0x17c   :  { %v5287_v58 = vsel %vm1311_vm12, 1.0, %v8934_v50 }
 0x17d   :  { %v1503_v22 = vpack.c.bf16 %v5287_v58, %v5287_v58  ;;  %v4559_v58 = vld [vmem:[#allocation3 + $0x8] sm:$0xff] }
 0x17e   :  { %v1224_v61 = vpop.f32.mrf.mxu1  ;;  %v6565_v57 = vpop.f32.mrf.mxu3  ;;  %v4623_v13 = vsub.f32 %v4559_v58, %v5498_v60  ;;  %v1986_v58 = vunpack.c.l.b16 %v1521_v21  ;;  %v5294_v60 = vsel %vm1318_vm0, 1.0, %v8934_v50  ;;  %v6600_v21 = vadd.f32 1.0, %v5098_v8  ;;  %v4564_v8 = vld [vmem:[#allocation3 + $0x30] sm:$0xff] }
 0x17f   :  { %v1806_v49 = vunpack.c.l.b16 %v1503_v22  ;;  %v5304_v22 = vsel %vm1328_vm6, 1.0, %v8934_v50  ;;  %vm1324_vm13 = vcmp.gt.f32.partialorder %v1224_v61, 0.0  ;;  %vm9008_vm6 = vnez %v8747_v41 }
 0x180   :  { %v1520_v9 = vpack.c.bf16 %v5304_v22, %v5304_v22  ;;  %v5100_v16 = vsel %vm9008_vm6, 1.0, %v8934_v50  ;;  %v5295_v61 = vsel %vm1319_vm14, 1.0, %v8934_v50  ;;  %9009 = vst [vmem:[#allocation56_spill] sm:$0xff] %v6600_v21  ;;  %vm9016_vm0 = vnez %v8751_v45  ;;  %v5503_v45 = vld [vmem:[#allocation6 + $0x30] sm:$0xff] }
 0x181   :  { %v1807_v32 = vpack.c.b16 %v1806_v49, %v1805_v39  ;;  %v5497_v49 = vld [vmem:[#allocation6] sm:$0xff]  ;;  %vm9017_vm14 = vnez %v8753_v46  ;;  %vm9022_vm6 = vnez %v8762_v62 }
 0x182   :  { %v4622_v39 = vsub.f32 %v4558_v33, %v5497_v49  ;;  %v1985_v33 = vunpack.c.l.b16 %v1520_v9  ;;  %v4625_v49 = vsub.f32 %v4561_v59, %v5500_v63  ;;  %v5501_v59 = vld [vmem:[#allocation6 + $0x20] sm:$0xff]  ;;  %v1511_v63 = vpack.c.bf16 %v5295_v61, %v5295_v61  ;;  %v4565_v61 = vld [vmem:[#allocation3 + $0x38] sm:$0xff] }
 0x183   :  { %1816 = vmatpush.bf16.msrb.mxu2 %v1807_v32 }
 0x184   :  { %v6579_v34 = vmul.f32 %v4622_v39, %v4622_v39  ;;  %v4562_v39 = vld [vmem:[#allocation3 + $0x20] sm:$0xff] }
 0x186   :  { %5337 = vmatmul.msk.bf16.vlgmr.msrb.gmra.mxu2 %vm9003_vm2, %v5752_v30  ;;  %v1226_v35 = vpop.f32.mrf.mxu1  ;;  %9006 = vst [vmem:[#allocation54_spill] sm:$0xff] %v6579_v34  ;;  %v6583_v32 = vpop.f32.mrf.mxu3  ;;  %vm9011_vm2 = vnez %v8749_v42 }
 0x187   :  { %1876 = vmatpush.bf16.msra.mxu2 %v1867_v0  ;;  %v6585_v0 = vmul.f32 %v4623_v13, %v4623_v13  ;;  %vm1325_vm12 = vcmp.gt.f32.partialorder %v1226_v35, 0.0  ;;  %v5300_v35 = vsel %vm1324_vm13, 1.0, %v8934_v50  ;;  %v5101_v28 = vsel %vm9011_vm2, 1.0, %v8934_v50 }
 0x188   :  { %v5301_v13 = vsel %vm1325_vm12, 1.0, %v8934_v50  ;;  %vm9019_vm13 = vnez %v8757_v54  ;;  %vm9021_vm12 = vmmov %vm9013_vm5 }
 0x189   :  { %9007 = vst [vmem:[#allocation55_spill] sm:$0xff] %v6585_v0  ;;  %v1987_v0 = vpack.c.b16 %v1986_v58, %v1985_v33  ;;  %v1517_v21 = vpack.c.bf16 %v5301_v13, %v5301_v13  ;;  %v5103_v33 = vsel %vm9017_vm14, 1.0, %v8934_v50  ;;  %v5502_v58 = vld [vmem:[#allocation6 + $0x28] sm:$0xff]  ;;  %v1886_v13 = vunpack.c.l.b16 %v1511_v63 }
 0x18a   :  { %v1194_v36 = vpop.f32.mrf.mxu0  ;;  %v6571_v44 = vpop.f32.mrf.mxu2  ;;  %vm1327_vm14 = vcmp.gt.f32.partialorder %v6532_v10, 0.0 }
 0x18b   :  { %1936 = vmatpush.bf16.msrb.mxu2 %v1927_v37  ;;  %vm1312_vm3 = vcmp.gt.f32.partialorder %v1194_v36, 0.0  ;;  %v4624_v37 = vsub.f32 %v4560_v5, %v5499_v18  ;;  %v6602_v36 = vadd.f32 1.0, %v5099_v40  ;;  %v6607_v5 = vadd.f32 1.0, %v5100_v16 }
 0x18c   :  { %v5288_v41 = vsel %vm1312_vm3, 1.0, %v8934_v50  ;;  %v4626_v18 = vsub.f32 %v4562_v39, %v5501_v59  ;;  %v6614_v16 = vmul.f32 %v4625_v49, %v4625_v49  ;;  %vm9018_vm3 = vnez %v8755_v53 }
 0x18d   :  { %9010 = vst [vmem:[#allocation57_spill] sm:$0xff] %v6602_v36  ;;  %v1504_v40 = vpack.c.bf16 %v5288_v41, %v5288_v41  ;;  %v1516_v36 = vpack.c.bf16 %v5300_v35, %v5300_v35  ;;  %v6612_v42 = vmul.f32 %v4624_v37, %v4624_v37  ;;  %v5105_v49 = vsel %vm9019_vm13, 1.0, %v8934_v50  ;;  %vm9025_vm13 = vmmov %vm9021_vm12 }
 0x18e   :  { %9012 = vst [vmem:[#allocation58_spill] sm:$0xff] %v6607_v5  ;;  %v4628_v41 = vsub.f32 %v4564_v8, %v5503_v45  ;;  %v6635_v54 = vmul.f32 %v4626_v18, %v4626_v18  ;;  %v6639_v8 = vadd.f32 1.0, %v5103_v33  ;;  %v5504_v45 = vld [vmem:[#allocation6 + $0x38] sm:$0xff]  ;;  %v5505_v18 = vld [vmem:[#allocation6 + $0x40] sm:$0xff] }
 0x18f   :  { %9014 = vst [vmem:[#allocation59_spill] sm:$0xff] %v6612_v42  ;;  %v1945_v53 = vunpack.c.l.b16 %v1516_v36  ;;  %v4629_v5 = vsub.f32 %v4565_v61, %v5504_v45 }
 0x190   :  { %v1558_v22 = vpop.f32.mrf.mxu1  ;;  %9015 = vst [vmem:[#allocation60_spill] sm:$0xff] %v6614_v16  ;;  %v6633_v16 = vadd.f32 1.0, %v5101_v28  ;;  %v6645_v36 = vmul.f32 %v4628_v41, %v4628_v41 }
 0x191   :  { %vm2183_vm1 = vcmp.gt.f32.partialorder %v1558_v22, 0.0  ;;  %v1510_v22 = vpack.c.bf16 %v5294_v60, %v5294_v60  ;;  %v4627_v60 = vsub.f32 %v4563_v38, %v5502_v58  ;;  %v1825_v38 = vunpack.c.l.b16 %v1504_v40  ;;  %v4567_v40 = vld [vmem:[#allocation3 + $0x48] sm:$0xff] }
 0x192   :  { %v5356_v9 = vsel %vm2183_vm1, 1.0, %v8934_v50  ;;  %v1196_v34 = vpop.f32.mrf.mxu0  ;;  %v6610_v56 = vpop.f32.mrf.mxu2  ;;  %vm1330_vm1 = vcmp.gt.f32.partialorder %v6553_v52, 0.0 }
 0x193   :  { %2433 = vst.msk [vmem:[#allocation2 + $0x70] sm:$0xff] %vm9013_vm5, %v5356_v9  ;;  %vm1313_vm10 = vcmp.gt.f32.partialorder %v1196_v34, 0.0  ;;  %v5102_v9 = vsel %vm9016_vm0, 1.0, %v8934_v50  ;;  %v5104_v34 = vsel %vm9018_vm3, 1.0, %v8934_v50  ;;  %v1885_v35 = vunpack.c.l.b16 %v1510_v22  ;;  %v4566_v22 = vld [vmem:[#allocation3 + $0x40] sm:$0xff] }
 0x194   :  { %v5289_v39 = vsel %vm1313_vm10, 1.0, %v8934_v50  ;;  %v6637_v42 = vadd.f32 1.0, %v5102_v9  ;;  %v6641_v63 = vmul.f32 %v4627_v60, %v4627_v60  ;;  %v4630_v9 = vsub.f32 %v4566_v22, %v5505_v18  ;;  %v4569_v22 = vld [vmem:[#allocation3 + $0x58] sm:$0xff]  ;;  %v5507_v18 = vld [vmem:[#allocation6 + $0x50] sm:$0xff] }
 0x195   :  { %v1505_v37 = vpack.c.bf16 %v5289_v39, %v5289_v39  ;;  %v1946_v39 = vunpack.c.l.b16 %v1517_v21  ;;  %v5106_v21 = vsel %vm9022_vm6, 1.0, %v8934_v50  ;;  %v1887_v28 = vpack.c.b16 %v1886_v13, %v1885_v35 }
 0x196   :  { %5340 = vmatmul.msk.bf16.vlgmr.msra.gmra.mxu2 %vm9021_vm12, %v5752_v30  ;;  %vm9023_vm5 = vnez %v8764_v2  ;;  %vm1331_vm10 = vcmp.gt.f32.partialorder %v6563_v55, 0.0  ;;  %v6658_v35 = vmul.f32 %v4629_v5, %v4629_v5  ;;  %vm1326_vm0 = vcmp.gt.f32.partialorder %v6521_v1, 0.0 }
 0x197   :  { %v1826_v58 = vunpack.c.l.b16 %v1505_v37  ;;  %1996 = vmatpush.bf16.msra.mxu2 %v1987_v0  ;;  %v6647_v0 = vadd.f32 1.0, %v5105_v49  ;;  %v1947_v33 = vpack.c.b16 %v1946_v39, %v1945_v53  ;;  %v5107_v60 = vsel %vm9023_vm5, 1.0, %v8934_v50  ;;  %v4568_v53 = vld [vmem:[#allocation3 + $0x50] sm:$0xff] }
 0x198   :  { %v6629_v59 = vpop.f32.mrf.mxu3  ;;  %v1560_v46 = vpop.f32.mrf.mxu1  ;;  %9024 = vst [vmem:[#allocation62_spill] sm:$0xff] %v6658_v35  ;;  %v6663_v2 = vadd.f32 1.0, %v5106_v21  ;;  %vm1320_vm12 = vcmp.gt.f32.partialorder %v6530_v20, 0.0  ;;  %v5306_v13 = vsel %vm1330_vm1, 1.0, %v8934_v50  ;;  %vm1321_vm6 = vcmp.gt.f32.partialorder %v6539_v47, 0.0 }
 0x199   :  { %9020 = vst [vmem:[#allocation61_spill] sm:$0xff] %v6629_v59  ;;  %v6643_v59 = vadd.f32 1.0, %v5104_v34  ;;  %v1827_v37 = vpack.c.b16 %v1826_v58, %v1825_v38  ;;  %vm2184_vm2 = vcmp.gt.f32.partialorder %v1560_v46, 0.0  ;;  %v5506_v34 = vld [vmem:[#allocation6 + $0x48] sm:$0xff]  ;;  %v6674_v38 = vmul.f32 %v4630_v9, %v4630_v9 }
 0x19a   :  { %v4631_v61 = vsub.f32 %v4567_v40, %v5506_v34  ;;  %v5357_v41 = vsel %vm2184_vm2, 1.0, %v8934_v50  ;;  %9026 = vst [vmem:[#allocation63_spill] sm:$0xff] %v6663_v2  ;;  %vm9027_vm2 = vmmov %vm9025_vm13  ;;  %v6676_v58 = vadd.f32 1.0, %v5107_v60  ;;  %v5307_v39 = vsel %vm1331_vm10, 1.0, %v8934_v50 }
 0x19b   :  { %1836 = vmatpush.bf16.msrb.mxu3 %v1827_v37  ;;  %2434 = vst.msk [vmem:[#allocation2 + $0x78] sm:$0xff] %vm9025_vm13, %v5357_v41  ;;  %v5302_v45 = vsel %vm1326_vm0, 1.0, %v8934_v50  ;;  %v5303_v40 = vsel %vm1327_vm14, 1.0, %v8934_v50  ;;  %vm9031_vm1 = vnez %v8770_v12  ;;  %v5296_v21 = vsel %vm1320_vm12, 1.0, %v8934_v50  ;;  %v5508_v12 = vld [vmem:[#allocation6 + $0x58] sm:$0xff]  ;;  %vm9033_vm12 = vmmov %vm9027_vm2 }
 0x19c   :  { %v1249_v62 = vpop.f32.mrf.mxu2  ;;  %9028 = vst [vmem:[#allocation64_spill] sm:$0xff] %v6674_v38  ;;  %v6681_v52 = vmul.f32 %v4631_v61, %v4631_v61  ;;  %v5108_v55 = vsel %vm9031_vm1, 1.0, %v8934_v50  ;;  %v5297_v1 = vsel %vm1321_vm6, 1.0, %v8934_v50  ;;  %vm9032_vm10 = vnez %v8772_v15 }
 0x19d   :  { %vm1334_vm3 = vcmp.gt.f32.partialorder %v1249_v62, 0.0  ;;  %9029 = vst [vmem:[#allocation65_spill] sm:$0xff] %v6676_v58  ;;  %v5109_v10 = vsel %vm9032_vm10, 1.0, %v8934_v50  ;;  %v4632_v9 = vsub.f32 %v4568_v53, %v5507_v18  ;;  %v4633_v34 = vsub.f32 %v4569_v22, %v5508_v12 }
 0x19e   :  { %v1199_v49 = vpop.f32.mrf.mxu0  ;;  %5338 = vmatmul.msk.bf16.vlgmr.msrb.gmra.mxu3 %vm9027_vm2, %v5752_v30  ;;  %9030 = vst [vmem:[#allocation66_spill] sm:$0xff] %v6681_v52  ;;  %v5310_v37 = vsel %vm1334_vm3, 1.0, %v8934_v50  ;;  %v1518_v61 = vpack.c.bf16 %v5302_v45, %v5302_v45  ;;  %vm1340_vm0 = vcmp.gt.f32.partialorder %v6547_v4, 0.0  ;;  %v1512_v62 = vpack.c.bf16 %v5296_v21, %v5296_v21 }
 0x19f   :  { %1896 = vmatpush.bf16.msra.mxu3 %v1887_v28  ;;  %vm1314_vm5 = vcmp.gt.f32.partialorder %v1199_v49, 0.0  ;;  %v1522_v28 = vpack.c.bf16 %v5306_v13, %v5306_v13  ;;  %v1519_v49 = vpack.c.bf16 %v5303_v40, %v5303_v40  ;;  %v1526_v20 = vpack.c.bf16 %v5310_v37, %v5310_v37 }
 0x1a0   :  { %v6672_v5 = vpop.f32.mrf.mxu3  ;;  %v1618_v46 = vpop.f32.mrf.mxu1  ;;  %v5290_v60 = vsel %vm1314_vm5, 1.0, %v8934_v50  ;;  %vm1341_vm14 = vcmp.gt.f32.partialorder %v6558_v3, 0.0  ;;  %v1513_v47 = vpack.c.bf16 %v5297_v1, %v5297_v1  ;;  %v6713_v18 = vadd.f32 1.0, %v5108_v55 }
 0x1a1   :  { %v2005_v15 = vunpack.c.l.b16 %v1522_v28  ;;  %v1506_v52 = vpack.c.bf16 %v5290_v60, %v5290_v60  ;;  %vm2189_vm6 = vcmp.gt.f32.partialorder %v1618_v46, 0.0  ;;  %v2045_v37 = vunpack.c.l.b16 %v1526_v20 }
 0x1a2   :  { %v5362_v28 = vsel %vm2189_vm6, 1.0, %v8934_v50  ;;  %9034 = vst [vmem:[#allocation67_spill] sm:$0xff] %v6713_v18  ;;  %v1905_v60 = vunpack.c.l.b16 %v1512_v62  ;;  %v1906_v12 = vunpack.c.l.b16 %v1513_v47  ;;  %v5317_v46 = vsel %vm1341_vm14, 1.0, %v8934_v50  ;;  %v4570_v18 = vld [vmem:[#allocation3 + $0x60] sm:$0xff] }
 0x1a3   :  { %1956 = vmatpush.bf16.msrb.mxu3 %v1947_v33  ;;  %v1523_v33 = vpack.c.bf16 %v5307_v39, %v5307_v39  ;;  %2439 = vst.msk [vmem:[#allocation2 + $0xa0] sm:$0xff] %vm9027_vm2, %v5362_v28  ;;  %v1845_v20 = vunpack.c.l.b16 %v1506_v52  ;;  %v6726_v55 = vadd.f32 1.0, %v5109_v10  ;;  %v1965_v4 = vunpack.c.l.b16 %v1518_v61  ;;  %v4571_v28 = vld [vmem:[#allocation3 + $0x68] sm:$0xff] }
 0x1a4   :  { %v1251_v13 = vpop.f32.mrf.mxu2  ;;  %v1966_v58 = vunpack.c.l.b16 %v1519_v49  ;;  %vm9038_vm5 = vnez %v8779_v27  ;;  %vm9039_vm1 = vnez %v8781_v31  ;;  %vm1336_vm10 = vcmp.gt.f32.partialorder %v6514_v26, 0.0  ;;  %v5510_v61 = vld [vmem:[#allocation6 + $0x68] sm:$0xff] }
 0x1a5   :  { %vm1335_vm13 = vcmp.gt.f32.partialorder %v1251_v13, 0.0  ;;  %v2006_v53 = vunpack.c.l.b16 %v1523_v33  ;;  %v5316_v33 = vsel %vm1340_vm0, 1.0, %v8934_v50  ;;  %9037 = vst [vmem:[#allocation70_spill] sm:$0xff] %v6726_v55  ;;  %v5110_v3 = vsel %vm9038_vm5, 1.0, %v8934_v50 }
 0x1a6   :  { %v1201_v41 = vpop.f32.mrf.mxu0  ;;  %v5311_v22 = vsel %vm1335_vm13, 1.0, %v8934_v50  ;;  %5343 = vmatmul.msk.bf16.vlgmr.msrb.gmra.mxu2 %vm9033_vm12, %v5752_v30  ;;  %v1532_v52 = vpack.c.bf16 %v5316_v33, %v5316_v33  ;;  %v5111_v10 = vsel %vm9039_vm1, 1.0, %v8934_v50  ;;  %vm1337_vm14 = vcmp.gt.f32.partialorder %v6525_v51, 0.0  ;;  %vm9040_vm13 = vmmov %vm9027_vm2  ;;  %v4573_v33 = vld [vmem:[#allocation3 + $0x78] sm:$0xff] }
 0x1a7   :  { %vm1315_vm3 = vcmp.gt.f32.partialorder %v1201_v41, 0.0  ;;  %v1527_v21 = vpack.c.bf16 %v5311_v22, %v5311_v22  ;;  %v6724_v22 = vmul.f32 %v4633_v34, %v4633_v34  ;;  %v2007_v62 = vpack.c.b16 %v2006_v53, %v2005_v15  ;;  %v5509_v34 = vld [vmem:[#allocation6 + $0x60] sm:$0xff]  ;;  %v4572_v15 = vld [vmem:[#allocation3 + $0x70] sm:$0xff] }
 0x1a8   :  { %v5291_v39 = vsel %vm1315_vm3, 1.0, %v8934_v50  ;;  %v1620_v45 = vpop.f32.mrf.mxu1  ;;  %vm1332_vm3 = vcmp.gt.f32.partialorder %v6571_v44, 0.0  ;;  %v4635_v49 = vsub.f32 %v4571_v28, %v5510_v61  ;;  %v1967_v53 = vpack.c.b16 %v1966_v58, %v1965_v4  ;;  %v4574_v44 = vld [vmem:[#allocation3 + $0x80] sm:$0xff] }
 0x1a9   :  { %v1507_v40 = vpack.c.bf16 %v5291_v39, %v5291_v39  ;;  %v6710_v1 = vpop.f32.mrf.mxu3  ;;  %v2046_v13 = vunpack.c.l.b16 %v1527_v21  ;;  %v6722_v39 = vmul.f32 %v4632_v9, %v4632_v9  ;;  %9036 = vst [vmem:[#allocation69_spill] sm:$0xff] %v6724_v22  ;;  %v1907_v21 = vpack.c.b16 %v1906_v12, %v1905_v60 }
 0x1aa   :  { %v4634_v22 = vsub.f32 %v4570_v18, %v5509_v34  ;;  %vm2190_vm12 = vcmp.gt.f32.partialorder %v1620_v45, 0.0  ;;  %vm1333_vm6 = vcmp.gt.f32.partialorder %v6610_v56, 0.0  ;;  %vm9041_vm5 = vnez %v8788_v43 }
 0x1ab   :  { %v1846_v41 = vunpack.c.l.b16 %v1507_v40  ;;  %9035 = vst [vmem:[#allocation68_spill] sm:$0xff] %v6722_v39  ;;  %v2047_v38 = vpack.c.b16 %v2046_v13, %v2045_v37  ;;  %v1533_v40 = vpack.c.bf16 %v5317_v46, %v5317_v46  ;;  %v5363_v37 = vsel %vm2190_vm12, 1.0, %v8934_v50  ;;  %v5511_v13 = vld [vmem:[#allocation6 + $0x70] sm:$0xff] }
 0x1ac   :  { %v1578_v9 = vpop.f32.mrf.mxu2  ;;  %v5112_v18 = vsel %vm9041_vm5, 1.0, %v8934_v50  ;;  %vm9042_vm1 = vnez %v8790_v48  ;;  %v2105_v60 = vunpack.c.l.b16 %v1532_v52  ;;  %v6752_v58 = vadd.f32 1.0, %v5110_v3  ;;  %v4575_v52 = vld [vmem:[#allocation3 + $0x88] sm:$0xff] }
 0x1ad   :  { %v1847_v47 = vpack.c.b16 %v1846_v41, %v1845_v20  ;;  %vm2185_vm0 = vcmp.gt.f32.partialorder %v1578_v9, 0.0  ;;  %2056 = vmatpush.bf16.msrb.mxu2 %v2047_v38  ;;  %v5113_v45 = vsel %vm9042_vm1, 1.0, %v8934_v50  ;;  %v2106_v12 = vunpack.c.l.b16 %v1533_v40 }
 0x1ae   :  { %5341 = vmatmul.msk.bf16.vlgmr.msra.gmra.mxu3 %vm9040_vm13, %v5752_v30  ;;  %v5358_v27 = vsel %vm2185_vm0, 1.0, %v8934_v50  ;;  %vm9043_vm0 = vmmov %vm9027_vm2  ;;  %9045 = vst [vmem:[#allocation71_spill] sm:$0xff] %v6752_v58  ;;  %v5312_v46 = vsel %vm1336_vm10, 1.0, %v8934_v50  ;;  %v5313_v43 = vsel %vm1337_vm14, 1.0, %v8934_v50  ;;  %v5308_v48 = vsel %vm1332_vm3, 1.0, %v8934_v50 }
 0x1af   :  { %1856 = vmatpush.bf16.msra.mxu1 %v1847_v47  ;;  %2016 = vmatpush.bf16.msra.mxu3 %v2007_v62  ;;  %2435 = vst.msk [vmem:[#allocation2 + $0x80] sm:$0xff] %vm9027_vm2, %v5358_v27  ;;  %vm9044_vm13 = vmmov %vm9043_vm0  ;;  %v6763_v20 = vmul.f32 %v4634_v22, %v4634_v22  ;;  %v6765_v41 = vadd.f32 1.0, %v5111_v10  ;;  %v4636_v4 = vsub.f32 %v4572_v15, %v5511_v13  ;;  %v5309_v26 = vsel %vm1333_vm6, 1.0, %v8934_v50  ;;  %v5512_v47 = vld [vmem:[#allocation6 + $0x78] sm:$0xff] }
 0x1b0   :  { %v1678_v31 = vpop.f32.mrf.mxu1  ;;  %2440 = vst.msk [vmem:[#allocation2 + $0xa8] sm:$0xff] %vm9044_vm13, %v5363_v37  ;;  %v6770_v62 = vmul.f32 %v4635_v49, %v4635_v49  ;;  %v4637_v51 = vsub.f32 %v4573_v33, %v5512_v47  ;;  %v6772_v3 = vadd.f32 1.0, %v5112_v18  ;;  %v6774_v28 = vadd.f32 1.0, %v5113_v45  ;;  %vm9053_vm6 = vmmov %vm9043_vm0  ;;  %v5514_v18 = vld [vmem:[#allocation6 + $0x88] sm:$0xff]  ;;  %v4576_v33 = vld [vmem:[#allocation3 + $0x90] sm:$0xff] }
 0x1b1   :  { %v1281_v38 = vpop.f32.mrf.mxu3  ;;  %9046 = vst [vmem:[#allocation72_spill] sm:$0xff] %v6763_v20  ;;  %v1528_v22 = vpack.c.bf16 %v5312_v46, %v5312_v46  ;;  %v1529_v40 = vpack.c.bf16 %v5313_v43, %v5313_v43  ;;  %v1524_v9 = vpack.c.bf16 %v5308_v48, %v5308_v48  ;;  %v1525_v34 = vpack.c.bf16 %v5309_v26, %v5309_v26  ;;  %vm9055_vm1 = vmmov %vm9043_vm0  ;;  %v5515_v47 = vld [vmem:[#allocation6 + $0x90] sm:$0xff] }
 0x1b2   :  { %5339 = vmatmul.msk.bf16.vlgmr.msra.gmra.mxu1 %vm9043_vm0, %v5752_v30  ;;  %9047 = vst [vmem:[#allocation73_spill] sm:$0xff] %v6765_v41  ;;  %vm1346_vm10 = vcmp.gt.f32.partialorder %v6710_v1, 0.0  ;;  %vm1347_vm14 = vcmp.gt.f32.partialorder %v1281_v38, 0.0  ;;  %v6777_v56 = vmul.f32 %v4636_v4, %v4636_v4  ;;  %vm9052_vm12 = vnez %v8801_v6  ;;  %vm9056_vm13 = vmmov %vm9055_vm1 }
 0x1b3   :  { %1916 = vmatpush.bf16.msrb.mxu1 %v1907_v21  ;;  %9048 = vst [vmem:[#allocation74_spill] sm:$0xff] %v6770_v62  ;;  %v2107_v21 = vpack.c.b16 %v2106_v12, %v2105_v60  ;;  %v5114_v27 = vsel %vm9052_vm12, 1.0, %v8934_v50  ;;  %vm2195_vm2 = vcmp.gt.f32.partialorder %v1678_v31, 0.0  ;;  %vm9054_vm5 = vnez %v8803_v7  ;;  %v4577_v60 = vld [vmem:[#allocation3 + $0x98] sm:$0xff]  ;;  %vm9064_vm12 = vmmov %vm9055_vm1 }
 0x1b4   :  { %9049 = vst [vmem:[#allocation75_spill] sm:$0xff] %v6772_v3  ;;  %v1580_v10 = vpop.f32.mrf.mxu2  ;;  %v5115_v15 = vsel %vm9054_vm5, 1.0, %v8934_v50  ;;  %v4639_v45 = vsub.f32 %v4575_v52, %v5514_v18  ;;  %v5368_v12 = vsel %vm2195_vm2, 1.0, %v8934_v50  ;;  %v2065_v46 = vunpack.c.l.b16 %v1528_v22  ;;  %v5516_v52 = vld [vmem:[#allocation6 + $0x98] sm:$0xff]  ;;  %vm9069_vm5 = vmmov %vm9055_vm1 }
 0x1b5   :  { %9050 = vst [vmem:[#allocation76_spill] sm:$0xff] %v6774_v28  ;;  %vm2186_vm3 = vcmp.gt.f32.partialorder %v1580_v10, 0.0  ;;  %v5322_v31 = vsel %vm1346_vm10, 1.0, %v8934_v50  ;;  %v5323_v7 = vsel %vm1347_vm14, 1.0, %v8934_v50  ;;  %v2066_v43 = vunpack.c.l.b16 %v1529_v40 }
 0x1b6   :  { %9051 = vst [vmem:[#allocation77_spill] sm:$0xff] %v6777_v56  ;;  %v5359_v61 = vsel %vm2186_vm3, 1.0, %v8934_v50  ;;  %5346 = vmatmul.msk.bf16.vlgmr.msra.gmra.mxu2 %vm9053_vm6, %v5752_v30  ;;  %v2025_v48 = vunpack.c.l.b16 %v1524_v9  ;;  %v2026_v13 = vunpack.c.l.b16 %v1525_v34  ;;  %v6797_v26 = vmul.f32 %v4637_v51, %v4637_v51  ;;  %vm9058_vm3 = vmmov %vm9055_vm1 }
 0x1b7   :  { %1976 = vmatpush.bf16.msra.mxu1 %v1967_v53  ;;  %v5513_v53 = vld [vmem:[#allocation6 + $0x80] sm:$0xff]  ;;  %2436 = vst.msk [vmem:[#allocation2 + $0x88] sm:$0xff] %vm9055_vm1, %v5359_v61  ;;  %2116 = vmatpush.bf16.msra.mxu2 %v2107_v21  ;;  %v4641_v22 = vsub.f32 %v4577_v60, %v5516_v52  ;;  %vm9059_vm14 = vnez %v8807_v24  ;;  %v1538_v38 = vpack.c.bf16 %v5322_v31, %v5322_v31  ;;  %v6808_v51 = vadd.f32 1.0, %v5114_v27  ;;  %v4591_v27 = vld [vmem:[#allocation3 + $0x108] sm:$0xff] }
 0x1b8   :  { %v1680_v49 = vpop.f32.mrf.mxu1  ;;  %v4638_v37 = vsub.f32 %v4574_v44, %v5513_v53  ;;  %2445 = vst.msk [vmem:[#allocation2 + $0xd0] sm:$0xff] %vm9056_vm13, %v5368_v12  ;;  %v4640_v44 = vsub.f32 %v4576_v33, %v5515_v47  ;;  %v5116_v1 = vsel %vm9059_vm14, 1.0, %v8934_v50  ;;  %v1539_v21 = vpack.c.bf16 %v5323_v7, %v5323_v7  ;;  %vm9070_vm13 = vmmov %vm9058_vm3  ;;  %v5517_v31 = vld [vmem:[#allocation6 + $0x100] sm:$0xff]  ;;  %v4579_v47 = vld [vmem:[#allocation3 + $0xa8] sm:$0xff] }
 0x1b9   :  { %v1598_v6 = vpop.f32.mrf.mxu3  ;;  %9057 = vst [vmem:[#allocation78_spill] sm:$0xff] %v6797_v26  ;;  %vm2196_vm10 = vcmp.gt.f32.partialorder %v1680_v49, 0.0  ;;  %v6806_v10 = vmul.f32 %v4639_v45, %v4639_v45  ;;  %v6810_v34 = vadd.f32 1.0, %v5115_v15  ;;  %vm9065_vm6 = vnez %v8809_v25  ;;  %v4590_v49 = vld [vmem:[#allocation3 + $0x100] sm:$0xff] }
 0x1ba   :  { %vm2187_vm0 = vcmp.gt.f32.partialorder %v1598_v6, 0.0  ;;  %v5369_v40 = vsel %vm2196_vm10, 1.0, %v8934_v50  ;;  %v6804_v9 = vmul.f32 %v4638_v37, %v4638_v37  ;;  %9062 = vst [vmem:[#allocation81_spill] sm:$0xff] %v6808_v51  ;;  %v5117_v24 = vsel %vm9065_vm6, 1.0, %v8934_v50  ;;  %vm9073_vm6 = vmmov %vm9058_vm3 }
 0x1bb   :  { %v5360_v4 = vsel %vm2187_vm0, 1.0, %v8934_v50  ;;  %9061 = vst [vmem:[#allocation80_spill] sm:$0xff] %v6806_v10  ;;  %v2067_v53 = vpack.c.b16 %v2066_v43, %v2065_v46  ;;  %v2027_v18 = vpack.c.b16 %v2026_v13, %v2025_v48  ;;  %v6816_v33 = vmul.f32 %v4640_v44, %v4640_v44  ;;  %v4578_v43 = vld [vmem:[#allocation3 + $0xa0] sm:$0xff]  ;;  %v5518_v13 = vld [vmem:[#allocation6 + $0x108] sm:$0xff] }
 0x1bc   :  { %2437 = vst.msk [vmem:[#allocation2 + $0x90] sm:$0xff] %vm9058_vm3, %v5360_v4  ;;  %v1638_v61 = vpop.f32.mrf.mxu2  ;;  %v6818_v37 = vmul.f32 %v4641_v22, %v4641_v22  ;;  %v6820_v45 = vadd.f32 1.0, %v5116_v1  ;;  %vm1342_vm1 = vcmp.gt.f32.partialorder %v6565_v57, 0.0  ;;  %vm1343_vm0 = vcmp.gt.f32.partialorder %v6583_v32, 0.0  ;;  %v5520_v57 = vld [vmem:[#allocation6 + $0xa8] sm:$0xff] }
 0x1bd   :  { %9060 = vst [vmem:[#allocation79_spill] sm:$0xff] %v6804_v9  ;;  %vm2191_vm2 = vcmp.gt.f32.partialorder %v1638_v61, 0.0  ;;  %v2165_v25 = vunpack.c.l.b16 %v1538_v38  ;;  %v2166_v60 = vunpack.c.l.b16 %v1539_v21  ;;  %v6828_v12 = vadd.f32 1.0, %v5117_v24  ;;  %v5519_v38 = vld [vmem:[#allocation6 + $0xa0] sm:$0xff] }
 0x1be   :  { %9063 = vst [vmem:[#allocation82_spill] sm:$0xff] %v6810_v34  ;;  %5344 = vmatmul.msk.bf16.vlgmr.msrb.gmra.mxu3 %vm9069_vm5, %v5752_v30  ;;  %v5364_v15 = vsel %vm2191_vm2, 1.0, %v8934_v50  ;;  %v5130_v46 = vsel %vm6076_vm7, 1.0, %v8934_v50  ;;  %v4654_v7 = vsub.f32 %v4590_v49, %v5517_v31  ;;  %v4655_v4 = vsub.f32 %v4591_v27, %v5518_v13  ;;  %v4610_v49 = vld [vmem:[#allocation3 + $0x1a0] sm:$0xff]  ;;  %v2628_v34 = vld [vmem:[#allocation2 + $0x28] sm:$0xff] }
 0x1bf   :  { %2446 = vst.msk [vmem:[#allocation2 + $0xd8] sm:$0xff] %vm9064_vm12, %v5369_v40  ;;  %2076 = vmatpush.bf16.msrb.mxu3 %v2067_v53  ;;  %vm1338_vm14 = vcmp.gt.f32.partialorder %v6537_v11, 0.0  ;;  %vm1339_vm12 = vcmp.gt.f32.partialorder %v6543_v17, 0.0  ;;  %vm9072_vm7 = vnez %v8832_v19  ;;  %v5318_v52 = vsel %vm1342_vm1, 1.0, %v8934_v50  ;;  %vm9076_vm1 = vmmov %vm9058_vm3  ;;  %v5521_v31 = vld [vmem:[#allocation6 + $0x1a0] sm:$0xff]  ;;  %v2514_v26 = vld [vmem:[#allocation2 + $0x88] sm:$0xff] }
 0x1c0   :  { %9066 = vst [vmem:[#allocation83_spill] sm:$0xff] %v6816_v33  ;;  %v5131_v14 = vsel %vm9072_vm7, 1.0, %v8934_v50  ;;  %v5319_v22 = vsel %vm1343_vm0, 1.0, %v8934_v50  ;;  %v6848_v1 = vadd.f32 1.0, %v5130_v46  ;;  %v4642_v21 = vsub.f32 %v4578_v43, %v5519_v38  ;;  %v4593_v38 = vld [vmem:[#allocation3 + $0x118] sm:$0xff] }
 0x1c1   :  { %9067 = vst [vmem:[#allocation84_spill] sm:$0xff] %v6818_v37  ;;  %v1600_v6 = vpop.f32.mrf.mxu3  ;;  %v2167_v40 = vpack.c.b16 %v2166_v60, %v2165_v25  ;;  %vm9075_vm5 = vnez %v8835_v23  ;;  %v4643_v24 = vsub.f32 %v4579_v47, %v5520_v57  ;;  %v5314_v32 = vsel %vm1338_vm14, 1.0, %v8934_v50  ;;  %v4611_v23 = vld [vmem:[#allocation3 + $0x1a8] sm:$0xff]  ;;  %v2497_v57 = vld [vmem:[#allocation2] sm:$0xff] }
 0x1c2   :  { %9068 = vst [vmem:[#allocation85_spill] sm:$0xff] %v6820_v45  ;;  %5342 = vmatmul.msk.bf16.vlgmr.msrb.gmra.mxu1 %vm9058_vm3, %v5752_v30  ;;  %vm2188_vm10 = vcmp.gt.f32.partialorder %v1600_v6, 0.0  ;;  %v1738_v48 = vpop.f32.mrf.mxu1  ;;  %v5118_v19 = vsel %vm9075_vm5, 1.0, %v8934_v50  ;;  %v5315_v53 = vsel %vm1339_vm12, 1.0, %v8934_v50  ;;  %vm9077_vm0 = vnez %v8837_v29  ;;  %vm9081_vm3 = vmmov %vm9076_vm1  ;;  %v9106_v37 = vld [vmem:[#allocation17_spill] sm:$0xff] }
 0x1c3   :  { %2441 = vst.msk [vmem:[#allocation2 + $0xb0] sm:$0xff] %vm9070_vm13, %v5364_v15  ;;  %2036 = vmatpush.bf16.msrb.mxu1 %v2027_v18  ;;  %v5361_v44 = vsel %vm2188_vm10, 1.0, %v8934_v50  ;;  %vm2201_vm2 = vcmp.gt.f32.partialorder %v1738_v48, 0.0  ;;  %v5119_v27 = vsel %vm9077_vm0, 1.0, %v8934_v50  ;;  %v1534_v15 = vpack.c.bf16 %v5318_v52, %v5318_v52  ;;  %vm9083_vm10 = vmmov %vm9076_vm1  ;;  %v4592_v52 = vld [vmem:[#allocation3 + $0x110] sm:$0xff] }
 0x1c4   :  { %9071 = vst [vmem:[#allocation86_spill] sm:$0xff] %v6828_v12  ;;  %v5374_v61 = vsel %vm2201_vm2, 1.0, %v8934_v50  ;;  %v1640_v18 = vpop.f32.mrf.mxu2  ;;  %v1535_v25 = vpack.c.bf16 %v5319_v22, %v5319_v22  ;;  %v6864_v60 = vmul.f32 %v4654_v7, %v4654_v7  ;;  %v6866_v6 = vmul.f32 %v4655_v4, %v4655_v4  ;;  %v9085_v4 = vld [vmem:[#allocation13_spill] sm:$0xff]  ;;  %vm9091_vm2 = vmmov %vm9076_vm1  ;;  %v6949_v12 = vld [vmem:[#allocation2 + $0xd0] sm:$0xff] }
 0x1c5   :  { %2438 = vst.msk [vmem:[#allocation2 + $0x98] sm:$0xff] %vm9073_vm6, %v5361_v44  ;;  %vm2192_vm13 = vcmp.gt.f32.partialorder %v1640_v18, 0.0  ;;  %v6868_v11 = vadd.f32 1.0, %v5131_v14  ;;  %v6873_v46 = vadd.f32 1.0, %v5118_v19  ;;  %v4674_v29 = vsub.f32 %v4610_v49, %v5521_v31  ;;  %v5522_v44 = vld [vmem:[#allocation6 + $0x1a8] sm:$0xff]  ;;  %v6881_v49 = vld [vmem:[#allocation2 + $0x40] sm:$0xff]  ;;  %vm9094_vm5 = vmmov %vm9076_vm1 }
 0x1c6   :  { %9074 = vst [vmem:[#allocation87_spill] sm:$0xff] %v6848_v1  ;;  %v5365_v17 = vsel %vm2192_vm13, 1.0, %v8934_v50  ;;  %5349 = vmatmul.msk.bf16.vlgmr.msrb.gmra.mxu2 %vm9081_vm3, %v5752_v30  ;;  %v1530_v43 = vpack.c.bf16 %v5314_v32, %v5314_v32  ;;  %v1531_v48 = vpack.c.bf16 %v5315_v53, %v5315_v53  ;;  %v6876_v7 = vadd.f32 1.0, %v5119_v27  ;;  %v9089_v18 = vld [vmem:[#allocation14_spill] sm:$0xff]  ;;  %v6914_v1 = vld [vmem:[#allocation2 + $0xa0] sm:$0xff]  ;;  %vm9103_vm3 = vmmov %vm9091_vm2 }
 0x1c7   :  { %2451 = vst.msk [vmem:[#allocation2 + $0x100] sm:$0xff] %vm9076_vm1, %v5374_v61  ;;  %2176 = vmatpush.bf16.msrb.mxu2 %v2167_v40  ;;  %vm9086_vm14 = vnez %v9085_v4  ;;  %v4675_v14 = vsub.f32 %v4611_v23, %v5522_v44  ;;  %v2125_v61 = vunpack.c.l.b16 %v1534_v15  ;;  %v2126_v19 = vunpack.c.l.b16 %v1535_v25  ;;  %v6891_v23 = vld [vmem:[#allocation2 + $0x60] sm:$0xff]  ;;  %v6895_v15 = vld [vmem:[#allocation2 + $0x50] sm:$0xff]  ;;  %v7024_v41 = vld [vmem:[#allocation2 + $0xd8] sm:$0xff] }
 0x1c8   :  { %9078 = vst [vmem:[#allocation88_spill] sm:$0xff] %v6864_v60  ;;  %v5150_v47 = vsel %vm9086_vm14, 1.0, %v8934_v50  ;;  %v6884_v40 = vmul.f32 %v4642_v21, %v4642_v21  ;;  %v6886_v53 = vmul.f32 %v4643_v24, %v4643_v24  ;;  %vm9090_vm6 = vnez %v9089_v18  ;;  %v6903_v4 = vld [vmem:[#allocation2 + $0x70] sm:$0xff]  ;;  %v2627_v44 = vld [vmem:[#allocation2 + $0x20] sm:$0xff]  ;;  %vm9108_vm14 = vmmov %vm9091_vm2 }
 0x1c9   :  { %9079 = vst [vmem:[#allocation89_spill] sm:$0xff] %v6866_v6  ;;  %v1658_v13 = vpop.f32.mrf.mxu3  ;;  %v5151_v27 = vsel %vm9090_vm6, 1.0, %v8934_v50  ;;  %v6899_v31 = vmul.f32 %v4674_v29, %v4674_v29  ;;  %v6901_v21 = vadd.f32 1.0, %v5150_v47  ;;  %v2085_v24 = vunpack.c.l.b16 %v1530_v43  ;;  %v5524_v29 = vld [vmem:[#allocation6 + $0x118] sm:$0xff]  ;;  %vm9110_vm6 = vmmov %vm9091_vm2 }
 0x1ca   :  { %9080 = vst [vmem:[#allocation90_spill] sm:$0xff] %v6868_v11  ;;  %vm2193_vm12 = vcmp.gt.f32.partialorder %v1658_v13, 0.0  ;;  %v1740_v22 = vpop.f32.mrf.mxu1  ;;  %v2086_v13 = vunpack.c.l.b16 %v1531_v48  ;;  %v6906_v18 = vmul.f32 %v4675_v14, %v4675_v14  ;;  %v5523_v11 = vld [vmem:[#allocation6 + $0x110] sm:$0xff]  ;;  %v2127_v43 = vpack.c.b16 %v2126_v19, %v2125_v61 }
 0x1cb   :  { %9082 = vst [vmem:[#allocation91_spill] sm:$0xff] %v6873_v46  ;;  %v5366_v32 = vsel %vm2193_vm12, 1.0, %v8934_v50  ;;  %vm2202_vm7 = vcmp.gt.f32.partialorder %v1740_v22, 0.0  ;;  %v2692_v22 = vld [vmem:[#allocation2 + $0x30] sm:$0xff]  ;;  %v4656_v60 = vsub.f32 %v4592_v52, %v5523_v11  ;;  %v6918_v14 = vadd.f32 %v6895_v15, %v6881_v49  ;;  %v6926_v52 = vld [vmem:[#allocation2 + $0x80] sm:$0xff] }
 0x1cc   :  { %2442 = vst.msk [vmem:[#allocation2 + $0xb8] sm:$0xff] %vm9083_vm10, %v5365_v17  ;;  %v6893_v17 = vld [vmem:[#allocation2 + $0x10] sm:$0xff]  ;;  %v5375_v25 = vsel %vm2202_vm7, 1.0, %v8934_v50  ;;  %v1698_v47 = vpop.f32.mrf.mxu2  ;;  %v6922_v6 = vadd.f32 %v6903_v4, %v6891_v23  ;;  %v6924_v11 = vadd.f32 %v2692_v22, %v2627_v44  ;;  %vm9107_vm10 = vnez %v9106_v37 }
 0x1cd   :  { %9084 = vst [vmem:[#allocation92_spill] sm:$0xff] %v6876_v7  ;;  %v3470_v48 = vadd.f32 %v6893_v17, %v2497_v57  ;;  %vm2197_vm1 = vcmp.gt.f32.partialorder %v1698_v47, 0.0  ;;  %v6930_v61 = vld [vmem:[#allocation2 + $0xb0] sm:$0xff]  ;;  %v9099_v57 = vld [vmem:[#allocation16_spill] sm:$0xff]  ;;  %v9102_v47 = vld [vmem:[#allocation61_spill] sm:$0xff]  ;;  %v5140_v10 = vsel %vm9107_vm10, 1.0, %v8934_v50  ;;  %v3480_v51 = vadd.f32 %v6895_v15, %v6891_v23 }
 0x1ce   :  { %9087 = vst [vmem:[#allocation13_spill] sm:$0xff] %v6884_v40  ;;  %v5370_v19 = vsel %vm2197_vm1, 1.0, %v8934_v50  ;;  %vm9100_vm0 = vnez %v9099_v57  ;;  %vm1344_vm13 = vcmp.gt.f32.partialorder %v9102_v47, 0.0  ;;  %v4600_v7 = vld [vmem:[#allocation3 + $0x150] sm:$0xff]  ;;  %v4601_v57 = vld [vmem:[#allocation3 + $0x158] sm:$0xff]  ;;  %vm1345_vm7 = vcmp.gt.f32.partialorder %v6672_v5, 0.0  ;;  %vm9114_vm1 = vmmov %vm9103_vm3 }
 0x1cf   :  { %9088 = vst [vmem:[#allocation93_spill] sm:$0xff] %v6886_v53  ;;  %v5526_v47 = vld [vmem:[#allocation6 + $0x158] sm:$0xff]  ;;  %v6989_v9 = vadd.f32 1.0, %v5140_v10  ;;  %v7004_v5 = vld [vmem:[#allocation2 + $0xa8] sm:$0xff] }
 0x1d0   :  { %2443 = vst.msk [vmem:[#allocation2 + $0xc0] sm:$0xff] %vm9091_vm2, %v5366_v32  ;;  %v5132_v32 = vsel %vm6148_vm15, 1.0, %v8934_v50  ;;  %vm9098_vm15 = vmmov %vm9091_vm2  ;;  %v2693_v40 = vld [vmem:[#allocation2 + $0x38] sm:$0xff] }
 0x1d1   :  { %9092 = vst [vmem:[#allocation14_spill] sm:$0xff] %v6899_v31  ;;  %v4657_v31 = vsub.f32 %v4593_v38, %v5524_v29  ;;  %v6928_v38 = vld [vmem:[#allocation2 + $0x90] sm:$0xff]  ;;  %5347 = vmatmul.msk.bf16.vlgmr.msra.gmra.mxu3 %vm9098_vm15, %v5752_v30  ;;  %v2087_v29 = vpack.c.b16 %v2086_v13, %v2085_v24  ;;  %vm9115_vm15 = vmmov %vm9114_vm1 }
 0x1d2   :  { %9093 = vst [vmem:[#allocation94_spill] sm:$0xff] %v6901_v21  ;;  %v6911_v21 = vadd.f32 1.0, %v5151_v27  ;;  %v5133_v27 = vsel %vm9100_vm0, 1.0, %v8934_v50  ;;  %2136 = vmatpush.bf16.msra.mxu3 %v2127_v43  ;;  %5345 = vmatmul.msk.bf16.vlgmr.msra.gmra.mxu1 %vm9108_vm14, %v5752_v30  ;;  %v6973_v43 = vadd.f32 %v6922_v6, %v6918_v14  ;;  %vm9117_vm14 = vmmov %vm9114_vm1 }
 0x1d3   :  { %2452 = vst.msk [vmem:[#allocation2 + $0x108] sm:$0xff] %vm9094_vm5, %v5375_v25  ;;  %v6938_v25 = vadd.f32 1.0, %v5132_v32  ;;  %v6944_v53 = vmul.f32 %v4657_v31, %v4657_v31  ;;  %v6960_v31 = vadd.f32 %v6930_v61, %v6914_v1  ;;  %2096 = vmatpush.bf16.msra.mxu1 %v2087_v29  ;;  %v6965_v13 = vadd.f32 1.0, %v5133_v27  ;;  %v9111_v29 = vld [vmem:[#allocation18_spill] sm:$0xff] }
 0x1d4   :  { %9095 = vst [vmem:[#allocation95_spill] sm:$0xff] %v6906_v18  ;;  %v1660_v18 = vpop.f32.mrf.mxu3  ;;  %v3918_v32 = vadd.f32 %v6924_v11, %v3470_v48  ;;  %vm9112_vm2 = vnez %v9111_v29  ;;  %v5525_v27 = vld [vmem:[#allocation6 + $0x150] sm:$0xff]  ;;  %v2563_v48 = vld [vmem:[#allocation2 + $0x18] sm:$0xff]  ;;  %v3472_v29 = vadd.f32 %v2627_v44, %v6893_v17  ;;  %v1700_v46 = vpop.f32.mrf.mxu2  ;;  %v7007_v44 = vadd.f32 %v2693_v40, %v2628_v34 }
 0x1d5   :  { %9097 = vst [vmem:[#allocation15_spill] sm:$0xff] %v6911_v21  ;;  %v6942_v21 = vmul.f32 %v4656_v60, %v4656_v60  ;;  %vm2194_vm12 = vcmp.gt.f32.partialorder %v1660_v18, 0.0  ;;  %v6956_v60 = vadd.f32 %v6928_v38, %v6926_v52  ;;  %v5320_v18 = vsel %vm1344_vm13, 1.0, %v8934_v50  ;;  %vm9116_vm13 = vmmov %vm9114_vm1 }
 0x1d6   :  { %9101 = vst [vmem:[#allocation16_spill] sm:$0xff] %v6938_v25  ;;  %v5367_v24 = vsel %vm2194_vm12, 1.0, %v8934_v50  ;;  %v6983_v25 = vsub.f32 %v4601_v57, %v5526_v47  ;;  %v2510_v57 = vld [vmem:[#allocation2 + $0x68] sm:$0xff]  ;;  %v2571_v47 = vld [vmem:[#allocation2 + $0x58] sm:$0xff]  ;;  %v1536_v45 = vpack.c.bf16 %v5320_v18, %v5320_v18  ;;  %vm2198_vm5 = vcmp.gt.f32.partialorder %v1700_v46, 0.0  ;;  %5352 = vmatmul.msk.bf16.vlgmr.msra.gmra.mxu2 %vm9114_vm1, %v5752_v30  ;;  %vm9119_vm12 = vmmov %vm9114_vm1 }
 0x1d7   :  { %2447 = vst.msk [vmem:[#allocation2 + $0xe0] sm:$0xff] %vm9103_vm3, %v5370_v19  ;;  %v6962_v37 = vld [vmem:[#allocation2 + $0xc0] sm:$0xff]  ;;  %v2498_v19 = vld [vmem:[#allocation2 + $0x8] sm:$0xff]  ;;  %v7002_v10 = vadd.f32 %v6960_v31, %v6956_v60  ;;  %v4174_v17 = vadd.f32 %v6973_v43, %v3918_v32  ;;  %v5371_v23 = vsel %vm2198_vm5, 1.0, %v8934_v50  ;;  %v3473_v3 = vadd.f32 %v2628_v34, %v2563_v48 }
 0x1d8   :  { %9104 = vst [vmem:[#allocation61_spill] sm:$0xff] %v6942_v21  ;;  %v6979_v21 = vsel %vm9112_vm2, 1.0, %v8934_v50  ;;  %v6987_v33 = vadd.f32 %v6949_v12, %v6962_v37  ;;  %v2145_v39 = vunpack.c.l.b16 %v1536_v45  ;;  %v3484_v34 = vadd.f32 %v6926_v52, %v6903_v4  ;;  %vm9122_vm2 = vmmov %vm9114_vm1 }
 0x1d9   :  { %9105 = vst [vmem:[#allocation96_spill] sm:$0xff] %v6944_v53  ;;  %v2506_v53 = vld [vmem:[#allocation2 + $0x48] sm:$0xff]  ;;  %v3488_v45 = vadd.f32 %v6914_v1, %v6928_v38  ;;  %v3492_v4 = vadd.f32 %v6962_v37, %v6930_v61  ;;  %v9118_v61 = vld [vmem:[#allocation56_spill] sm:$0xff] }
 0x1da   :  { %9109 = vst [vmem:[#allocation17_spill] sm:$0xff] %v6965_v13  ;;  %v6981_v13 = vsub.f32 %v4600_v7, %v5525_v27  ;;  %v6996_v7 = vadd.f32 %v2692_v22, %v6881_v49  ;;  %v2512_v27 = vld [vmem:[#allocation2 + $0x78] sm:$0xff]  ;;  %v3471_v49 = vadd.f32 %v2563_v48, %v2498_v19  ;;  %v3479_v28 = vadd.f32 %v2571_v47, %v2506_v53 }
 0x1db   :  { %2444 = vst.msk [vmem:[#allocation2 + $0xc8] sm:$0xff] %vm9110_vm6, %v5367_v24  ;;  %v5321_v24 = vsel %vm1345_vm7, 1.0, %v8934_v50  ;;  %v7009_v22 = vld [vmem:[#allocation2 + $0x98] sm:$0xff]  ;;  %v7018_v56 = vadd.f32 %v2512_v27, %v2510_v57  ;;  %v3537_v62 = vadd.f32 %v2693_v40, %v2506_v53  ;;  %v3481_v53 = vadd.f32 %v2571_v47, %v2510_v57  ;;  %vm9120_vm7 = vmmov %vm9114_vm1 }
 0x1dc   :  { %9113 = vst [vmem:[#allocation18_spill] sm:$0xff] %v6989_v9  ;;  %v7011_v9 = vld [vmem:[#allocation2 + $0xb8] sm:$0xff]  ;;  %v1537_v15 = vpack.c.bf16 %v5321_v24, %v5321_v24  ;;  %v1718_v32 = vpop.f32.mrf.mxu3  ;;  %v3920_v19 = vadd.f32 %v6996_v7, %v3472_v29  ;;  %v7027_v20 = vadd.f32 %v7009_v22, %v2514_v26  ;;  %v3919_v40 = vadd.f32 %v7007_v44, %v3471_v49  ;;  %v1758_v52 = vpop.f32.mrf.mxu2 }
 0x1dd   :  { %2448 = vst.msk [vmem:[#allocation2 + $0xe8] sm:$0xff] %vm9115_vm15, %v5371_v23  ;;  %vm2199_vm0 = vcmp.gt.f32.partialorder %v1718_v32, 0.0  ;;  %v7031_v24 = vadd.f32 %v7011_v9, %v7004_v5  ;;  %v7040_v29 = vadd.f32 %v7018_v56, %v3479_v28  ;;  %v3921_v35 = vadd.f32 %v3537_v62, %v3473_v3  ;;  %vm9123_vm15 = vmmov %vm9122_vm2 }
 0x1de   :  { %v7013_v18 = vld [vmem:[#allocation2 + $0xe0] sm:$0xff]  ;;  %v5372_v23 = vsel %vm2199_vm0, 1.0, %v8934_v50  ;;  %v2146_v48 = vunpack.c.l.b16 %v1537_v15  ;;  %v3922_v57 = vadd.f32 %v6924_v11, %v6918_v14  ;;  %vm2203_vm10 = vcmp.gt.f32.partialorder %v1758_v52, 0.0 }
 0x1df   :  { %v4110_v46 = vadd.f32 %v6987_v33, %v7013_v18  ;;  %2449 = vst.msk [vmem:[#allocation2 + $0xf0] sm:$0xff] %vm9116_vm13, %v5372_v23  ;;  %v7055_v47 = vadd.f32 %v7031_v24, %v7027_v20  ;;  %v7061_v3 = vadd.f32 %v7013_v18, %v6949_v12  ;;  %v5376_v14 = vsel %vm2203_vm10, 1.0, %v8934_v50  ;;  %v9121_v23 = vld [vmem:[#allocation54_spill] sm:$0xff]  ;;  %v7085_v52 = vld [vmem:[#allocation2 + $0x100] sm:$0xff]  ;;  %vm9125_vm13 = vmmov %vm9122_vm2 }
 0x1e0   :  { %v2147_v11 = vpack.c.b16 %v2146_v48, %v2145_v39  ;;  %v4175_v38 = vadd.f32 %v7040_v29, %v3919_v40  ;;  %2453 = vst.msk [vmem:[#allocation2 + $0x110] sm:$0xff] %vm9119_vm12, %v5376_v14  ;;  %v3924_v49 = vadd.f32 %v6996_v7, %v3480_v51  ;;  %v7075_v15 = vadd.f32 %v3492_v4, %v3488_v45  ;;  %vm9129_vm10 = vmmov %vm9122_vm2 }
 0x1e1   :  { %v4238_v55 = vadd.f32 %v4110_v46, %v7002_v10  ;;  %v7045_v46 = vadd.f32 %v2514_v26, %v2512_v27  ;;  %5350 = vmatmul.msk.bf16.vlgmr.msrb.gmra.mxu3 %vm9117_vm14, %v5752_v30  ;;  %v7081_v39 = vadd.f32 %v6956_v60, %v6922_v6  ;;  %v7095_v60 = vadd.f32 %v3537_v62, %v3481_v53 }
 0x1e2   :  { %v2522_v58 = vld [vmem:[#allocation2 + $0xc8] sm:$0xff]  ;;  %5348 = vmatmul.msk.bf16.vlgmr.msrb.gmra.mxu1 %vm9120_vm7, %v5752_v30  ;;  %vm9131_vm7 = vmmov %vm9122_vm2 }
 0x1e3   :  { %v4302_v32 = vadd.f32 %v4238_v55, %v4174_v17  ;;  %v7043_v2 = vadd.f32 %v7024_v41, %v2522_v58  ;;  %v7057_v55 = vadd.f32 %v3484_v34, %v3480_v51  ;;  %v7072_v12 = vadd.f32 %v7045_v46, %v3481_v53  ;;  %2156 = vmatpush.bf16.msrb.mxu1 %v2147_v11 }
 0x1e4   :  { %v2526_v1 = vld [vmem:[#allocation2 + $0xe8] sm:$0xff]  ;;  %v1720_v17 = vpop.f32.mrf.mxu3 }
 0x1e5   :  { %vm4366_vm3 = vcmp.gt.f32.partialorder %v4302_v32, 0.0  ;;  %v4111_v27 = vadd.f32 %v7043_v2, %v2526_v1  ;;  %vm2200_vm6 = vcmp.gt.f32.partialorder %v1720_v17, 0.0  ;;  %v4176_v7 = vadd.f32 %v7057_v55, %v3920_v19  ;;  %v1760_v19 = vpop.f32.mrf.mxu2 }
 0x1e6   :  { %v5420_v26 = vsel %vm4366_vm3, 1.0, %v8934_v50  ;;  %v2527_v32 = vld [vmem:[#allocation2 + $0xf0] sm:$0xff]  ;;  %v5373_v51 = vsel %vm2200_vm6, 1.0, %v8934_v50  ;;  %v4177_v53 = vadd.f32 %v7072_v12, %v3921_v35  ;;  %vm2204_vm1 = vcmp.gt.f32.partialorder %v1760_v19, 0.0  ;;  %5355 = vmatmul.msk.bf16.vlgmr.msrb.gmra.mxu2 %vm9123_vm15, %v5752_v30  ;;  %vm9127_vm3 = vmmov %vm9122_vm2 }
 0x1e7   :  { %v4814_v37 = vadd.f32 %v5420_v26, %v9118_v61  ;;  %v4239_v48 = vadd.f32 %v4111_v27, %v7055_v47  ;;  %v3923_v26 = vadd.f32 %v7007_v44, %v3479_v28  ;;  %v7091_v14 = vadd.f32 %v2527_v32, %v7013_v18  ;;  %2450 = vst.msk [vmem:[#allocation2 + $0xf8] sm:$0xff] %vm9122_vm2, %v5373_v51  ;;  %vm9132_vm6 = vmmov %vm9122_vm2 }
 0x1e8   :  { %v4112_v6 = vadd.f32 %v7061_v3, %v2527_v32  ;;  %v7099_v61 = vadd.f32 %v6987_v33, %v6960_v31  ;;  %v3489_v28 = vadd.f32 %v7004_v5, %v7009_v22  ;;  %v7107_v44 = vadd.f32 %v2522_v58, %v7011_v9  ;;  %v7120_v5 = vld [vmem:[#allocation2 + $0x110] sm:$0xff]  ;;  %v9124_v22 = vld [vmem:[#allocation57_spill] sm:$0xff] }
 0x1e9   :  { %v4878_v40 = vmul.f32 %v4814_v37, %v9121_v23  ;;  %v4303_v11 = vadd.f32 %v4239_v48, %v4175_v38  ;;  %v7102_v37 = vadd.f32 %v7085_v52, %v2527_v32  ;;  %v4114_v62 = vadd.f32 %v7091_v14, %v7085_v52 }
 0x1ea   :  { %v4240_v18 = vadd.f32 %v4112_v6, %v7075_v15  ;;  %v4178_v31 = vadd.f32 %v7081_v39, %v3922_v57  ;;  %v7114_v38 = vadd.f32 %v3488_v45, %v3484_v34  ;;  %v7117_v27 = vadd.f32 %v2526_v1, %v7024_v41 }
 0x1eb   :  { %vm4367_vm5 = vcmp.gt.f32.partialorder %v4303_v11, 0.0  ;;  %v7126_v35 = vadd.f32 %v7027_v20, %v7018_v56  ;;  %v4242_v34 = vadd.f32 %v4114_v62, %v7099_v61  ;;  %v4116_v41 = vadd.f32 %v7102_v37, %v7120_v5  ;;  %v9126_v56 = vld [vmem:[#allocation55_spill] sm:$0xff]  ;;  %v9128_v11 = vld [vmem:[#allocation58_spill] sm:$0xff] }
 0x1ec   :  { %v5421_v58 = vsel %vm4367_vm5, 1.0, %v8934_v50  ;;  %v4304_v9 = vadd.f32 %v4240_v18, %v4176_v7  ;;  %v1778_v45 = vpop.f32.mrf.mxu3  ;;  %v7133_v17 = vadd.f32 %v7107_v44, %v3489_v28  ;;  %v7136_v23 = vadd.f32 %v7061_v3, %v3492_v4  ;;  %vm9133_vm5 = vmmov %vm9127_vm3 }
 0x1ed   :  { %v4815_v57 = vadd.f32 %v5421_v58, %v9124_v22  ;;  %v5377_v48 = vsel %vm2204_vm1, 1.0, %v8934_v50  ;;  %v4942_v20 = vsel %vm9125_vm13, %v4878_v40, 0.0  ;;  %v4306_v7 = vadd.f32 %v4242_v34, %v4178_v31  ;;  %vm9134_vm1 = vmmov %vm9127_vm3 }
 0x1ee   :  { %vm4368_vm0 = vcmp.gt.f32.partialorder %v4304_v9, 0.0  ;;  %v2528_v6 = vld [vmem:[#allocation2 + $0xf8] sm:$0xff]  ;;  %2454 = vst.msk [vmem:[#allocation2 + $0x118] sm:$0xff] %vm9127_vm3, %v5377_v48  ;;  %v4244_v19 = vadd.f32 %v4116_v41, %v7136_v23  ;;  %v4180_v58 = vadd.f32 %v7114_v38, %v3924_v49  ;;  %v7150_v9 = vld [vmem:[#allocation2 + $0x108] sm:$0xff]  ;;  %vm2205_vm12 = vcmp.gt.f32.partialorder %v1778_v45, 0.0  ;;  %vm9137_vm13 = vmmov %vm9134_vm1 }
 0x1ef   :  { %v4879_v32 = vmul.f32 %v4815_v57, %v9126_v56  ;;  %v5422_v51 = vsel %vm4368_vm0, 1.0, %v8934_v50  ;;  %v7144_v62 = vadd.f32 %v2528_v6, %v2526_v1  ;;  %v4113_v4 = vadd.f32 %v7117_v27, %v2528_v6  ;;  %v9130_v57 = vld [vmem:[#allocation59_spill] sm:$0xff] }
 0x1f0   :  { %v4816_v18 = vadd.f32 %v5422_v51, %v9128_v11  ;;  %vm4370_vm14 = vcmp.gt.f32.partialorder %v4306_v7, 0.0  ;;  %v7154_v31 = vadd.f32 %v7043_v2, %v7031_v24  ;;  %v4179_v48 = vadd.f32 %v7126_v35, %v3923_v26 }
 0x1f1   :  { %v4943_v40 = vsel %vm9129_vm10, %v4879_v32, 0.0  ;;  %v5424_v34 = vsel %vm4370_vm14, 1.0, %v8934_v50  ;;  %v4241_v49 = vadd.f32 %v4113_v4, %v7133_v17  ;;  %v4308_v56 = vadd.f32 %v4244_v19, %v4180_v58  ;;  %5353 = vmatmul.msk.bf16.vlgmr.msra.gmra.mxu3 %vm9132_vm6, %v5752_v30  ;;  %vm9145_vm6 = vmmov %vm9134_vm1 }
 0x1f2   :  { %v4944_v22 = vadd.f32 %v4943_v40, %v4942_v20  ;;  %v4880_v1 = vmul.f32 %v4816_v18, %v9130_v57  ;;  %v4818_v41 = vadd.f32 %v5424_v34, %v6637_v42  ;;  %v7163_v45 = vadd.f32 %v7150_v9, %v2528_v6  ;;  %5351 = vmatmul.msk.bf16.vlgmr.msra.gmra.mxu1 %vm9134_vm1, %v5752_v30  ;;  %v1798_v19 = vpop.f32.mrf.mxu1 }
 0x1f3   :  { %v4115_v24 = vadd.f32 %v7144_v62, %v7150_v9  ;;  %v5378_v20 = vsel %vm2205_vm12, 1.0, %v8934_v50  ;;  %v4305_v42 = vadd.f32 %v4241_v49, %v4177_v53  ;;  %vm4372_vm2 = vcmp.gt.f32.partialorder %v4308_v56, 0.0  ;;  %vm9141_vm12 = vmmov %vm9134_vm1  ;;  %v9143_v56 = vld [vmem:[#allocation20_spill] sm:$0xff] }
 0x1f4   :  { %v4945_v32 = vsel %vm9131_vm7, %v4880_v1, 0.0  ;;  %v4882_v26 = vmul.f32 %v4818_v41, %v6635_v54  ;;  %2455 = vst.msk [vmem:[#allocation2 + $0x120] sm:$0xff] %vm9133_vm5, %v5378_v20  ;;  %v1780_v7 = vpop.f32.mrf.mxu3  ;;  %v7173_v11 = vadd.f32 %v3489_v28, %v7045_v46  ;;  %v5426_v6 = vsel %vm4372_vm2, 1.0, %v8934_v50  ;;  %v9140_v41 = vld [vmem:[#allocation60_spill] sm:$0xff]  ;;  %vm9146_vm2 = vmmov %vm9134_vm1 }
 0x1f5   :  { %v4946_v51 = vadd.f32 %v4945_v32, %v4944_v22  ;;  %v4243_v18 = vadd.f32 %v4115_v24, %v7154_v31  ;;  %v7177_v4 = vld [vmem:[#allocation2 + $0x118] sm:$0xff]  ;;  %vm2206_vm15 = vcmp.gt.f32.partialorder %v1780_v7, 0.0  ;;  %v7182_v54 = vadd.f32 1.0, %v6979_v21 }
 0x1f6   :  { %v7186_v53 = vadd.f32 %v7117_v27, %v7107_v44  ;;  %vm4369_vm0 = vcmp.gt.f32.partialorder %v4305_v42, 0.0  ;;  %v4820_v46 = vadd.f32 %v5426_v6, %v6643_v59  ;;  %v4117_v40 = vadd.f32 %v7163_v45, %v7177_v4 }
 0x1f7   :  { %9135 = vst [vmem:[#allocation56_spill] sm:$0xff] %v7182_v54  ;;  %v5423_v28 = vsel %vm4369_vm0, 1.0, %v8934_v50  ;;  %v4307_v58 = vadd.f32 %v4243_v18, %v4179_v48  ;;  %v5379_v22 = vsel %vm2206_vm15, 1.0, %v8934_v50  ;;  %v7195_v57 = vmul.f32 %v6981_v13, %v6981_v13  ;;  %v9138_v48 = vld [vmem:[#allocation19_spill] sm:$0xff]  ;;  %vm9147_vm15 = vmmov %vm9146_vm2 }
 0x1f8   :  { %v4817_v21 = vadd.f32 %v5423_v28, %v6633_v16  ;;  %v4884_v44 = vmul.f32 %v4820_v46, %v6645_v36  ;;  %2456 = vst.msk [vmem:[#allocation2 + $0x128] sm:$0xff] %vm9137_vm13, %v5379_v22  ;;  %vm2207_vm3 = vcmp.gt.f32.partialorder %v1798_v19, 0.0  ;;  %v4181_v59 = vadd.f32 %v7173_v11, %v7095_v60  ;;  %v4580_v28 = vld [vmem:[#allocation3 + $0xb0] sm:$0xff]  ;;  %vm9148_vm0 = vmmov %vm9146_vm2 }
 0x1f9   :  { %9136 = vst [vmem:[#allocation54_spill] sm:$0xff] %v7195_v57  ;;  %vm4371_vm10 = vcmp.gt.f32.partialorder %v4307_v58, 0.0  ;;  %v4245_v1 = vadd.f32 %v4117_v40, %v7186_v53  ;;  %v5380_v34 = vsel %vm2207_vm3, 1.0, %v8934_v50  ;;  %vm9139_vm14 = vnez %v9138_v48  ;;  %vm9149_vm13 = vmmov %vm9148_vm0  ;;  %v5527_v48 = vld [vmem:[#allocation6 + $0xb0] sm:$0xff] }
 0x1fa   :  { %v5120_v13 = vsel %vm9139_vm14, 1.0, %v8934_v50  ;;  %v4881_v49 = vmul.f32 %v4817_v21, %v9140_v41  ;;  %v7210_v16 = vadd.f32 %v7120_v5, %v7085_v52  ;;  %v5425_v36 = vsel %vm4371_vm10, 1.0, %v8934_v50  ;;  %2457 = vst.msk [vmem:[#allocation2 + $0x130] sm:$0xff] %vm9141_vm12, %v5380_v34  ;;  %v1800_v46 = vpop.f32.mrf.mxu1  ;;  %v4581_v34 = vld [vmem:[#allocation3 + $0xb8] sm:$0xff]  ;;  %vm9151_vm10 = vmmov %vm9148_vm0 }
 0x1fb   :  { %v7216_v60 = vmul.f32 %v6983_v25, %v6983_v25  ;;  %vm9144_vm7 = vnez %v9143_v56  ;;  %v4819_v24 = vadd.f32 %v5425_v36, %v6639_v8  ;;  %v4309_v20 = vadd.f32 %v4245_v1, %v4181_v59  ;;  %v7222_v42 = vld [vmem:[#allocation2 + $0x120] sm:$0xff]  ;;  %vm9154_vm14 = vmmov %vm9148_vm0 }
 0x1fc   :  { %v5121_v32 = vsel %vm9144_vm7, 1.0, %v8934_v50  ;;  %v7226_v52 = vadd.f32 %v7091_v14, %v6987_v33  ;;  %v4949_v7 = vsel %vm9145_vm6, %v4882_v26, 0.0  ;;  %v4947_v6 = vsel %vm9146_vm2, %v4881_v49, 0.0  ;;  %v9150_v49 = vld [vmem:[#allocation62_spill] sm:$0xff]  ;;  %vm9158_vm6 = vmmov %vm9148_vm0 }
 0x1fd   :  { %9142 = vst [vmem:[#allocation57_spill] sm:$0xff] %v7216_v60  ;;  %v4118_v25 = vadd.f32 %v7210_v16, %v7222_v42  ;;  %v4182_v18 = vadd.f32 %v7002_v10, %v6973_v43  ;;  %v4948_v19 = vadd.f32 %v4947_v6, %v4946_v51  ;;  %v4883_v8 = vmul.f32 %v4819_v24, %v6641_v63 }
 0x1fe   :  { %vm4373_vm5 = vcmp.gt.f32.partialorder %v4309_v20, 0.0  ;;  %v7237_v33 = vadd.f32 %v7177_v4, %v7150_v9  ;;  %vm2208_vm1 = vcmp.gt.f32.partialorder %v1800_v46, 0.0  ;;  %v7248_v21 = vadd.f32 %v7144_v62, %v7043_v2  ;;  %v9152_v46 = vld [vmem:[#allocation63_spill] sm:$0xff] }
 0x1ff   :  { %v5427_v26 = vsel %vm4373_vm5, 1.0, %v8934_v50  ;;  %v4246_v58 = vadd.f32 %v4118_v25, %v7226_v52  ;;  %v4950_v40 = vadd.f32 %v4949_v7, %v4948_v19  ;;  %v4951_v22 = vsel %vm9147_vm15, %v4883_v8, 0.0  ;;  %v7243_v51 = vld [vmem:[#allocation2 + $0x128] sm:$0xff]  ;;  %vm9171_vm15 = vmmov %vm9148_vm0 }
 0x200   :  { %v4821_v43 = vadd.f32 %v5427_v26, %v6647_v0  ;;  %v5381_v63 = vsel %vm2208_vm1, 1.0, %v8934_v50  ;;  %v4953_v9 = vsel %vm9148_vm0, %v4884_v44, 0.0  ;;  %v4119_v1 = vadd.f32 %v7237_v33, %v7243_v51 }
 0x201   :  { %v4310_v59 = vadd.f32 %v4246_v58, %v4182_v18  ;;  %2458 = vst.msk [vmem:[#allocation2 + $0x138] sm:$0xff] %vm9149_vm13, %v5381_v63  ;;  %v4644_v41 = vsub.f32 %v4580_v28, %v5527_v48  ;;  %v4952_v0 = vadd.f32 %v4951_v22, %v4950_v40  ;;  %v7257_v56 = vadd.f32 %v7222_v42, %v7120_v5  ;;  %v7259_v2 = vld [vmem:[#allocation2 + $0x130] sm:$0xff]  ;;  %v5528_v18 = vld [vmem:[#allocation6 + $0xb8] sm:$0xff]  ;;  %vm9176_vm13 = vmmov %vm9158_vm6 }
 0x202   :  { %v4885_v36 = vmul.f32 %v4821_v43, %v9150_v49  ;;  %v4183_v44 = vadd.f32 %v7055_v47, %v7040_v29  ;;  %v7265_v24 = vadd.f32 %v7102_v37, %v7061_v3  ;;  %v4247_v20 = vadd.f32 %v4119_v1, %v7248_v21  ;;  %v4612_v29 = vld [vmem:[#allocation3 + $0x1b0] sm:$0xff]  ;;  %v4613_v58 = vld [vmem:[#allocation3 + $0x1b8] sm:$0xff]  ;;  %5354 = vmatmul.msk.bf16.vlgmr.msrb.gmra.mxu1 %vm9154_vm14, %v5752_v30 }
 0x203   :  { %vm4374_vm3 = vcmp.gt.f32.partialorder %v4310_v59, 0.0  ;;  %v4954_v7 = vadd.f32 %v4953_v9, %v4952_v0  ;;  %v4120_v5 = vadd.f32 %v7257_v56, %v7259_v2  ;;  %v4645_v19 = vsub.f32 %v4581_v34, %v5528_v18  ;;  %v5530_v30 = vld [vmem:[#allocation6 + $0x1b8] sm:$0xff] }
 0x204   :  { %v4955_v6 = vsel %vm9151_vm10, %v4885_v36, 0.0  ;;  %v5428_v25 = vsel %vm4374_vm3, 1.0, %v8934_v50  ;;  %v7272_v8 = vadd.f32 1.0, %v5120_v13  ;;  %v4311_v3 = vadd.f32 %v4247_v20, %v4183_v44  ;;  %v9155_v13 = vld [vmem:[#allocation64_spill] sm:$0xff]  ;;  %v9159_v44 = vld [vmem:[#allocation65_spill] sm:$0xff] }
 0x205   :  { %v4822_v28 = vadd.f32 %v5428_v25, %v9152_v46  ;;  %v7275_v26 = vadd.f32 1.0, %v5121_v32  ;;  %v4184_v40 = vadd.f32 %v7075_v15, %v7057_v55  ;;  %v4956_v22 = vadd.f32 %v4955_v6, %v4954_v7  ;;  %v9156_v32 = vld [vmem:[#allocation21_spill] sm:$0xff]  ;;  %v5529_v55 = vld [vmem:[#allocation6 + $0x1b0] sm:$0xff]  ;;  %v4594_v46 = vld [vmem:[#allocation3 + $0x120] sm:$0xff] }
 0x206   :  { %v4248_v43 = vadd.f32 %v4120_v5, %v7265_v24  ;;  %v7282_v63 = vmul.f32 %v4644_v41, %v4644_v41  ;;  %v7287_v59 = vadd.f32 %v7243_v51, %v7177_v4  ;;  %vm4375_vm12 = vcmp.gt.f32.partialorder %v4311_v3, 0.0  ;;  %v9160_v7 = vld [vmem:[#allocation22_spill] sm:$0xff] }
 0x207   :  { %9153 = vst [vmem:[#allocation55_spill] sm:$0xff] %v7275_v26  ;;  %v4886_v9 = vmul.f32 %v4822_v28, %v9155_v13  ;;  %vm9157_vm7 = vnez %v9156_v32  ;;  %v4676_v34 = vsub.f32 %v4612_v29, %v5529_v55  ;;  %v5429_v48 = vsel %vm4375_vm12, 1.0, %v8934_v50  ;;  %v9164_v28 = vld [vmem:[#allocation66_spill] sm:$0xff]  ;;  %v4595_v13 = vld [vmem:[#allocation3 + $0x128] sm:$0xff] }
 0x208   :  { %v5152_v1 = vsel %vm9157_vm7, 1.0, %v8934_v50  ;;  %v4312_v0 = vadd.f32 %v4248_v43, %v4184_v40  ;;  %v7293_v49 = vld [vmem:[#allocation2 + $0x138] sm:$0xff]  ;;  %v4677_v41 = vsub.f32 %v4613_v58, %v5530_v30  ;;  %v4823_v20 = vadd.f32 %v5429_v48, %v9159_v44  ;;  %vm9182_vm7 = vmmov %vm9158_vm6 }
 0x209   :  { %v4957_v36 = vsel %vm9158_vm6, %v4886_v9, 0.0  ;;  %v4121_v4 = vadd.f32 %v7287_v59, %v7293_v49  ;;  %vm9161_vm2 = vnez %v9160_v7  ;;  %v7304_v25 = vadd.f32 %v7163_v45, %v7117_v27  ;;  %v9165_v40 = vld [vmem:[#allocation23_spill] sm:$0xff]  ;;  %v4602_v9 = vld [vmem:[#allocation3 + $0x160] sm:$0xff]  ;;  %v1818_v60 = vpop.f32.mrf.mxu2 }
 0x20a   :  { %v5153_v6 = vsel %vm9161_vm2, 1.0, %v8934_v50  ;;  %v4958_v5 = vadd.f32 %v4957_v36, %v4956_v22  ;;  %vm4376_vm5 = vcmp.gt.f32.partialorder %v4312_v0, 0.0  ;;  %v7306_v18 = vmul.f32 %v4645_v19, %v4645_v19  ;;  %v9167_v22 = vld [vmem:[#allocation67_spill] sm:$0xff]  ;;  %v4603_v0 = vld [vmem:[#allocation3 + $0x168] sm:$0xff]  ;;  %v5531_v36 = vld [vmem:[#allocation6 + $0x120] sm:$0xff] }
 0x20b   :  { %v7308_v29 = vadd.f32 1.0, %v5152_v1  ;;  %v4887_v3 = vmul.f32 %v4823_v20, %v9164_v28  ;;  %v5430_v58 = vsel %vm4376_vm5, 1.0, %v8934_v50  ;;  %vm9166_vm1 = vnez %v9165_v40  ;;  %v4582_v20 = vld [vmem:[#allocation3 + $0xc0] sm:$0xff]  ;;  %vm9197_vm5 = vmmov %vm9182_vm7 }
 0x20c   :  { %9162 = vst [vmem:[#allocation58_spill] sm:$0xff] %v7306_v18  ;;  %v5134_v43 = vsel %vm9166_vm1, 1.0, %v8934_v50  ;;  %v4185_v27 = vadd.f32 %v7133_v17, %v7072_v12  ;;  %v4824_v32 = vadd.f32 %v5430_v58, %v9167_v22  ;;  %v4249_v19 = vadd.f32 %v4121_v4, %v7304_v25  ;;  %v9172_v28 = vld [vmem:[#allocation68_spill] sm:$0xff] }
 0x20d   :  { %9163 = vst [vmem:[#allocation59_spill] sm:$0xff] %v7308_v29  ;;  %v7319_v1 = vmul.f32 %v4676_v34, %v4676_v34  ;;  %v7321_v55 = vmul.f32 %v4677_v41, %v4677_v41  ;;  %v7323_v48 = vadd.f32 1.0, %v5153_v6  ;;  %v4959_v30 = vsel %vm9171_vm15, %v4887_v3, 0.0  ;;  %v9173_v58 = vld [vmem:[#allocation24_spill] sm:$0xff]  ;;  %v5532_v34 = vld [vmem:[#allocation6 + $0x128] sm:$0xff] }
 0x20e   :  { %v4658_v44 = vsub.f32 %v4594_v46, %v5531_v36  ;;  %v4960_v7 = vadd.f32 %v4959_v30, %v4958_v5  ;;  %v4888_v40 = vmul.f32 %v4824_v32, %v9172_v28  ;;  %v4313_v12 = vadd.f32 %v4249_v19, %v4185_v27  ;;  %v5533_v6 = vld [vmem:[#allocation6 + $0x160] sm:$0xff]  ;;  %v5534_v3 = vld [vmem:[#allocation6 + $0x168] sm:$0xff]  ;;  %v9179_v36 = vld [vmem:[#allocation26_spill] sm:$0xff] }
 0x20f   :  { %9168 = vst [vmem:[#allocation19_spill] sm:$0xff] %v7319_v1  ;;  %vm9174_vm0 = vnez %v9173_v58  ;;  %v4659_v22 = vsub.f32 %v4595_v13, %v5532_v34  ;;  %v7330_v41 = vadd.f32 1.0, %v5134_v43  ;;  %v4583_v1 = vld [vmem:[#allocation3 + $0xc8] sm:$0xff]  ;;  %v4667_v57 = vsub.f32 %v4603_v0, %v5534_v3  ;;  %v4614_v46 = vld [vmem:[#allocation3 + $0x1c0] sm:$0xff] }
 0x210   :  { %9169 = vst [vmem:[#allocation60_spill] sm:$0xff] %v7321_v55  ;;  %v5135_v4 = vsel %vm9174_vm0, 1.0, %v8934_v50  ;;  %v4666_v55 = vsub.f32 %v4602_v9, %v5533_v6  ;;  %v4961_v5 = vsel %vm9176_vm13, %v4888_v40, 0.0  ;;  %vm4377_vm3 = vcmp.gt.f32.partialorder %v4313_v12, 0.0  ;;  %v5535_v27 = vld [vmem:[#allocation6 + $0xc0] sm:$0xff]  ;;  %v9177_v43 = vld [vmem:[#allocation25_spill] sm:$0xff] }
 0x211   :  { %9170 = vst [vmem:[#allocation20_spill] sm:$0xff] %v7323_v48  ;;  %vm2209_vm10 = vcmp.gt.f32.partialorder %v1818_v60, 0.0  ;;  %v4646_v32 = vsub.f32 %v4582_v20, %v5535_v27  ;;  %v4962_v19 = vadd.f32 %v4961_v5, %v4960_v7  ;;  %v5431_v30 = vsel %vm4377_vm3, 1.0, %v8934_v50  ;;  %v5536_v28 = vld [vmem:[#allocation6 + $0xc8] sm:$0xff]  ;;  %v9181_v40 = vld [vmem:[#allocation70_spill] sm:$0xff]  ;;  %v9184_v20 = vld [vmem:[#allocation27_spill] sm:$0xff]  ;;  %v1820_v29 = vpop.f32.mrf.mxu2 }
 0x212   :  { %9175 = vst [vmem:[#allocation62_spill] sm:$0xff] %v7330_v41  ;;  %v5382_v13 = vsel %vm2209_vm10, 1.0, %v8934_v50  ;;  %vm9178_vm14 = vnez %v9177_v43  ;;  %vm9180_vm12 = vnez %v9179_v36  ;;  %v4647_v58 = vsub.f32 %v4583_v1, %v5536_v28  ;;  %v9186_v34 = vld [vmem:[#allocation28_spill] sm:$0xff]  ;;  %v4597_v48 = vld [vmem:[#allocation3 + $0x138] sm:$0xff]  ;;  %vm9205_vm3 = vmmov %vm9197_vm5 }
 0x213   :  { %v5142_v9 = vsel %vm9178_vm14, 1.0, %v8934_v50  ;;  %v5143_v0 = vsel %vm9180_vm12, 1.0, %v8934_v50  ;;  %v4825_v12 = vadd.f32 %v5431_v30, %v9181_v40  ;;  %2459 = vst.msk [vmem:[#allocation2 + $0x140] sm:$0xff] %vm9182_vm7, %v5382_v13  ;;  %v7343_v60 = vmul.f32 %v4658_v44, %v4658_v44  ;;  %v5537_v3 = vld [vmem:[#allocation6 + $0x1c0] sm:$0xff]  ;;  %v4615_v30 = vld [vmem:[#allocation3 + $0x1c8] sm:$0xff]  ;;  %v4596_v13 = vld [vmem:[#allocation3 + $0x130] sm:$0xff] }
 0x214   :  { %vm9185_vm6 = vnez %v9184_v20  ;;  %vm9187_vm2 = vnez %v9186_v34  ;;  %v4678_v5 = vsub.f32 %v4614_v46, %v5537_v3  ;;  %v7351_v27 = vmul.f32 %v4659_v22, %v4659_v22  ;;  %v9191_v44 = vld [vmem:[#allocation69_spill] sm:$0xff]  ;;  %v4605_v3 = vld [vmem:[#allocation3 + $0x178] sm:$0xff] }
 0x215   :  { %9183 = vst [vmem:[#allocation63_spill] sm:$0xff] %v7343_v60  ;;  %v5122_v7 = vsel %vm9185_vm6, 1.0, %v8934_v50  ;;  %v5123_v6 = vsel %vm9187_vm2, 1.0, %v8934_v50  ;;  %v7353_v43 = vadd.f32 1.0, %v5135_v4  ;;  %v7355_v1 = vmul.f32 %v4666_v55, %v4666_v55  ;;  %v4604_v55 = vld [vmem:[#allocation3 + $0x170] sm:$0xff] }
 0x216   :  { %9188 = vst [vmem:[#allocation64_spill] sm:$0xff] %v7351_v27  ;;  %v4889_v36 = vmul.f32 %v4825_v12, %v9191_v44  ;;  %v7358_v28 = vmul.f32 %v4667_v57, %v4667_v57  ;;  %v7360_v40 = vadd.f32 1.0, %v5142_v9  ;;  %v7362_v20 = vadd.f32 1.0, %v5143_v0  ;;  %v5538_v12 = vld [vmem:[#allocation6 + $0x1c8] sm:$0xff]  ;;  %v5539_v9 = vld [vmem:[#allocation6 + $0x130] sm:$0xff]  ;;  %v4617_v27 = vld [vmem:[#allocation3 + $0x1d8] sm:$0xff] }
 0x217   :  { %9189 = vst [vmem:[#allocation21_spill] sm:$0xff] %v7353_v43  ;;  %v7364_v34 = vmul.f32 %v4646_v32, %v4646_v32  ;;  %v7366_v46 = vmul.f32 %v4647_v58, %v4647_v58  ;;  %v7368_v22 = vadd.f32 1.0, %v5122_v7  ;;  %v7370_v4 = vadd.f32 1.0, %v5123_v6  ;;  %v9199_v58 = vld [vmem:[#allocation29_spill] sm:$0xff]  ;;  %v5540_v6 = vld [vmem:[#allocation6 + $0x138] sm:$0xff] }
 0x218   :  { %9190 = vst [vmem:[#allocation65_spill] sm:$0xff] %v7355_v1  ;;  %v4963_v1 = vsel %vm9197_vm5, %v4889_v36, 0.0  ;;  %v4679_v57 = vsub.f32 %v4615_v30, %v5538_v12  ;;  %v7373_v44 = vmul.f32 %v4678_v5, %v4678_v5  ;;  %v4660_v0 = vsub.f32 %v4596_v13, %v5539_v9  ;;  %v9201_v5 = vld [vmem:[#allocation30_spill] sm:$0xff] }
 0x219   :  { %9192 = vst [vmem:[#allocation22_spill] sm:$0xff] %v7358_v28  ;;  %v4584_v28 = vld [vmem:[#allocation3 + $0xd0] sm:$0xff]  ;;  %v7375_v32 = vadd.f32 %v4963_v1, %v4962_v19  ;;  %vm9200_vm1 = vnez %v9199_v58  ;;  %v7382_v36 = vadd.f32 %v7259_v2, %v7222_v42  ;;  %vm2210_vm15 = vcmp.gt.f32.partialorder %v1820_v29, 0.0  ;;  %v5542_v1 = vld [vmem:[#allocation6 + $0x178] sm:$0xff] }
 0x21a   :  { %9193 = vst [vmem:[#allocation66_spill] sm:$0xff] %v7360_v40  ;;  %v5154_v7 = vsel %vm9200_vm1, 1.0, %v8934_v50  ;;  %v4585_v40 = vld [vmem:[#allocation3 + $0xd8] sm:$0xff]  ;;  %vm9202_vm0 = vnez %v9201_v5  ;;  %v5541_v13 = vld [vmem:[#allocation6 + $0x170] sm:$0xff]  ;;  %v4669_v12 = vsub.f32 %v4605_v3, %v5542_v1  ;;  %v7387_v9 = vld [vmem:[#allocation2 + $0x140] sm:$0xff]  ;;  %v5383_v58 = vsel %vm2210_vm15, 1.0, %v8934_v50 }
 0x21b   :  { %9194 = vst [vmem:[#allocation23_spill] sm:$0xff] %v7362_v20  ;;  %v4661_v20 = vsub.f32 %v4597_v48, %v5540_v6  ;;  %v5155_v30 = vsel %vm9202_vm0, 1.0, %v8934_v50  ;;  %v4668_v19 = vsub.f32 %v4604_v55, %v5541_v13  ;;  %v9203_v48 = vld [vmem:[#allocation31_spill] sm:$0xff]  ;;  %v7395_v29 = vadd.f32 %v7210_v16, %v7091_v14  ;;  %v9208_v13 = vld [vmem:[#allocation32_spill] sm:$0xff]  ;;  %v4616_v14 = vld [vmem:[#allocation3 + $0x1d0] sm:$0xff] }
 0x21c   :  { %9195 = vst [vmem:[#allocation67_spill] sm:$0xff] %v7366_v46  ;;  %vm9204_vm13 = vnez %v9203_v48  ;;  %v4122_v5 = vadd.f32 %v7382_v36, %v7387_v9  ;;  %v7400_v55 = vmul.f32 %v4679_v57, %v4679_v57  ;;  %v7402_v3 = vadd.f32 1.0, %v5154_v7  ;;  %v5544_v48 = vld [vmem:[#allocation6 + $0xd8] sm:$0xff]  ;;  %vm9228_vm1 = vmmov %vm9205_vm3  ;;  %v9243_v46 = vld [vmem:[#allocation44_spill] sm:$0xff] }
 0x21d   :  { %9196 = vst [vmem:[#allocation68_spill] sm:$0xff] %v7370_v4  ;;  %v5136_v6 = vsel %vm9204_vm13, 1.0, %v8934_v50  ;;  %vm9209_vm10 = vnez %v9208_v13  ;;  %v4649_v54 = vsub.f32 %v4585_v40, %v5544_v48  ;;  %v4186_v43 = vadd.f32 %v7099_v61, %v7081_v39  ;;  %v4599_v39 = vld [vmem:[#allocation3 + $0x148] sm:$0xff]  ;;  %vm9241_vm0 = vmmov %vm9228_vm1  ;;  %v7637_v4 = vld [vmem:[#allocation2 + $0x1f0] sm:$0xff] }
 0x21e   :  { %9198 = vst [vmem:[#allocation24_spill] sm:$0xff] %v7373_v44  ;;  %v5543_v44 = vld [vmem:[#allocation6 + $0xd0] sm:$0xff]  ;;  %v5137_v1 = vsel %vm9209_vm10, 1.0, %v8934_v50  ;;  %v4250_v57 = vadd.f32 %v4122_v5, %v7395_v29  ;;  %v7416_v7 = vadd.f32 1.0, %v5136_v6  ;;  %v7420_v13 = vmul.f32 %v4669_v12, %v4669_v12 }
 0x21f   :  { %v4648_v42 = vsub.f32 %v4584_v28, %v5543_v44  ;;  %2460 = vst.msk [vmem:[#allocation2 + $0x148] sm:$0xff] %vm9205_vm3, %v5383_v58  ;;  %v7407_v28 = vadd.f32 1.0, %v5155_v30  ;;  %v7409_v44 = vmul.f32 %v4660_v0, %v4660_v0  ;;  %v7414_v58 = vmul.f32 %v4661_v20, %v4661_v20  ;;  %v9217_v0 = vld [vmem:[#allocation33_spill] sm:$0xff]  ;;  %v9219_v20 = vld [vmem:[#allocation34_spill] sm:$0xff] }
 0x220   :  { %9206 = vst [vmem:[#allocation25_spill] sm:$0xff] %v7400_v55  ;;  %v7418_v55 = vmul.f32 %v4668_v19, %v4668_v19  ;;  %v7422_v40 = vadd.f32 1.0, %v5137_v1  ;;  %vm9218_vm14 = vnez %v9217_v0  ;;  %vm9220_vm12 = vnez %v9219_v20  ;;  %v5545_v19 = vld [vmem:[#allocation6 + $0x1d0] sm:$0xff]  ;;  %v5548_v20 = vld [vmem:[#allocation6 + $0x148] sm:$0xff] }
 0x221   :  { %9207 = vst [vmem:[#allocation26_spill] sm:$0xff] %v7402_v3  ;;  %v5144_v30 = vsel %vm9218_vm14, 1.0, %v8934_v50  ;;  %v7427_v48 = vmul.f32 %v4648_v42, %v4648_v42  ;;  %v4314_v3 = vadd.f32 %v4250_v57, %v4186_v43  ;;  %v5145_v6 = vsel %vm9220_vm12, 1.0, %v8934_v50  ;;  %v5547_v43 = vld [vmem:[#allocation6 + $0x140] sm:$0xff]  ;;  %vm9253_vm12 = vmmov %vm9241_vm0 }
 0x222   :  { %9210 = vst [vmem:[#allocation70_spill] sm:$0xff] %v7407_v28  ;;  %v4598_v28 = vld [vmem:[#allocation3 + $0x140] sm:$0xff]  ;;  %v7432_v5 = vmul.f32 %v4649_v54, %v4649_v54  ;;  %v4680_v12 = vsub.f32 %v4616_v14, %v5545_v19  ;;  %v7439_v42 = vadd.f32 %v7293_v49, %v7243_v51  ;;  %v4663_v54 = vsub.f32 %v4599_v39, %v5548_v20 }
 0x223   :  { %9211 = vst [vmem:[#allocation27_spill] sm:$0xff] %v7409_v44  ;;  %vm4378_vm6 = vcmp.gt.f32.partialorder %v4314_v3, 0.0  ;;  %v4662_v57 = vsub.f32 %v4598_v28, %v5547_v43  ;;  %v7450_v51 = vadd.f32 %v7237_v33, %v7144_v62  ;;  %v9227_v3 = vld [vmem:[#allocation71_spill] sm:$0xff]  ;;  %v7456_v39 = vadd.f32 1.0, %v5144_v30  ;;  %v4586_v44 = vld [vmem:[#allocation3 + $0xe0] sm:$0xff]  ;;  %v4587_v62 = vld [vmem:[#allocation3 + $0xe8] sm:$0xff] }
 0x224   :  { %9212 = vst [vmem:[#allocation28_spill] sm:$0xff] %v7414_v58  ;;  %v9222_v58 = vld [vmem:[#allocation35_spill] sm:$0xff]  ;;  %v7458_v19 = vadd.f32 1.0, %v5145_v6  ;;  %v7460_v43 = vmul.f32 %v4680_v12, %v4680_v12  ;;  %v9235_v6 = vld [vmem:[#allocation37_spill] sm:$0xff]  ;;  %vm9244_vm13 = vnez %v9243_v46 }
 0x225   :  { %9213 = vst [vmem:[#allocation69_spill] sm:$0xff] %v7416_v7  ;;  %vm9223_vm7 = vnez %v9222_v58  ;;  %v4588_v7 = vld [vmem:[#allocation3 + $0xf0] sm:$0xff]  ;;  %vm9236_vm15 = vnez %v9235_v6  ;;  %v5126_v6 = vsel %vm6389_vm9, 1.0, %v8934_v50 }
 0x226   :  { %9214 = vst [vmem:[#allocation29_spill] sm:$0xff] %v7418_v55  ;;  %v1878_v55 = vpop.f32.mrf.mxu2  ;;  %v5124_v0 = vsel %vm9223_vm7, 1.0, %v8934_v50  ;;  %v7442_v14 = vld [vmem:[#allocation2 + $0x148] sm:$0xff]  ;;  %v7475_v12 = vsel %vm9236_vm15, 1.0, %v8934_v50  ;;  %vm9271_vm15 = vmmov %vm9241_vm0 }
 0x227   :  { %9215 = vst [vmem:[#allocation30_spill] sm:$0xff] %v7420_v13  ;;  %v5546_v13 = vld [vmem:[#allocation6 + $0x1d8] sm:$0xff]  ;;  %vm2215_vm2 = vcmp.gt.f32.partialorder %v1878_v55, 0.0  ;;  %v4123_v28 = vadd.f32 %v7439_v42, %v7442_v14  ;;  %v7464_v60 = vadd.f32 1.0, %v5124_v0  ;;  %v7479_v0 = vmul.f32 %v4663_v54, %v4663_v54 }
 0x228   :  { %9216 = vst [vmem:[#allocation31_spill] sm:$0xff] %v7422_v40  ;;  %v4681_v1 = vsub.f32 %v4617_v27, %v5546_v13  ;;  %v5432_v40 = vsel %vm4378_vm6, 1.0, %v8934_v50  ;;  %v5388_v27 = vsel %vm2215_vm2, 1.0, %v8934_v50  ;;  %v9224_v13 = vld [vmem:[#allocation36_spill] sm:$0xff]  ;;  %vm9261_vm6 = vmmov %vm9241_vm0 }
 0x229   :  { %9221 = vst [vmem:[#allocation32_spill] sm:$0xff] %v7432_v5  ;;  %vm9225_vm5 = vnez %v9224_v13  ;;  %v4826_v55 = vadd.f32 %v5432_v40, %v9227_v3  ;;  %v4606_v13 = vld [vmem:[#allocation3 + $0x180] sm:$0xff]  ;;  %v4187_v40 = vadd.f32 %v7154_v31, %v7126_v35  ;;  %v4251_v30 = vadd.f32 %v4123_v28, %v7450_v51  ;;  %v5551_v5 = vld [vmem:[#allocation6 + $0xe8] sm:$0xff] }
 0x22a   :  { %v5125_v58 = vsel %vm9225_vm5, 1.0, %v8934_v50  ;;  %9226 = vst [vmem:[#allocation33_spill] sm:$0xff] %v7450_v51  ;;  %v7462_v20 = vmul.f32 %v4681_v1, %v4681_v1  ;;  %v9233_v3 = vld [vmem:[#allocation72_spill] sm:$0xff]  ;;  %v7477_v1 = vmul.f32 %v4662_v57, %v4662_v57  ;;  %v5552_v57 = vld [vmem:[#allocation6 + $0xf0] sm:$0xff]  ;;  %vm9268_vm5 = vmmov %vm9241_vm0 }
 0x22b   :  { %2465 = vst.msk [vmem:[#allocation2 + $0x250] sm:$0xff] %vm9228_vm1, %v5388_v27  ;;  %v4890_v41 = vmul.f32 %v4826_v55, %v9233_v3  ;;  %v7470_v27 = vadd.f32 1.0, %v5125_v58  ;;  %v5550_v35 = vld [vmem:[#allocation6 + $0xe0] sm:$0xff]  ;;  %v4315_v58 = vadd.f32 %v4251_v30, %v4187_v40  ;;  %v9245_v40 = vld [vmem:[#allocation38_spill] sm:$0xff] }
 0x22c   :  { %9229 = vst [vmem:[#allocation34_spill] sm:$0xff] %v7456_v39  ;;  %v4650_v55 = vsub.f32 %v4586_v44, %v5550_v35  ;;  %vm9246_vm14 = vnez %v9245_v40 }
 0x22d   :  { %9230 = vst [vmem:[#allocation35_spill] sm:$0xff] %v7458_v19  ;;  %v5549_v19 = vld [vmem:[#allocation6 + $0x180] sm:$0xff]  ;;  %v4965_v28 = vsel %vm9241_vm0, %v4890_v41, 0.0  ;;  %vm4379_vm3 = vcmp.gt.f32.partialorder %v4315_v58, 0.0  ;;  %v7494_v30 = vsel %vm9246_vm14, 1.0, %v8934_v50  ;;  %v9252_v58 = vld [vmem:[#allocation73_spill] sm:$0xff] }
 0x22e   :  { %9231 = vst [vmem:[#allocation36_spill] sm:$0xff] %v7460_v43  ;;  %v4607_v43 = vld [vmem:[#allocation3 + $0x188] sm:$0xff]  ;;  %v7481_v39 = vsub.f32 %v4606_v13, %v5549_v19  ;;  %v4966_v54 = vadd.f32 %v4965_v28, %v7375_v32  ;;  %v5127_v19 = vsel %vm9244_vm13, 1.0, %v8934_v50  ;;  %v5553_v13 = vld [vmem:[#allocation6 + $0xf8] sm:$0xff]  ;;  %v1880_v41 = vpop.f32.mrf.mxu2  ;;  %v5433_v32 = vsel %vm4379_vm3, 1.0, %v8934_v50 }
 0x22f   :  { %9232 = vst [vmem:[#allocation71_spill] sm:$0xff] %v7462_v20  ;;  %v4589_v20 = vld [vmem:[#allocation3 + $0xf8] sm:$0xff]  ;;  %v7500_v35 = vmul.f32 %v4650_v55, %v4650_v55  ;;  %v4827_v3 = vadd.f32 %v5433_v32, %v9252_v58  ;;  %vm2216_vm7 = vcmp.gt.f32.partialorder %v1880_v41, 0.0  ;;  %v7552_v41 = vadd.f32 %v7395_v29, %v7099_v61  ;;  %v3306_v58 = vld [vmem:[#allocation2 + $0x1b0] sm:$0xff] }
 0x230   :  { %9234 = vst [vmem:[#allocation72_spill] sm:$0xff] %v7470_v27  ;;  %v4653_v44 = vsub.f32 %v4589_v20, %v5553_v13  ;;  %v5128_v20 = vsel %vm6450_vm4, 1.0, %v8934_v50  ;;  %v7514_v13 = vadd.f32 1.0, %v5127_v19  ;;  %vm9259_vm4 = vmmov %vm9241_vm0  ;;  %v7539_v19 = vadd.f32 %v7257_v56, %v7102_v37  ;;  %v7635_v27 = vld [vmem:[#allocation2 + $0x220] sm:$0xff] }
 0x231   :  { %9237 = vst [vmem:[#allocation37_spill] sm:$0xff] %v7475_v12  ;;  %v4651_v12 = vsub.f32 %v4587_v62, %v5551_v5  ;;  %v5554_v5 = vld [vmem:[#allocation6 + $0x188] sm:$0xff]  ;;  %v7570_v61 = vadd.f32 %v7382_v36, %v7210_v16  ;;  %v7586_v16 = vadd.f32 %v7439_v42, %v7237_v33  ;;  %vm9276_vm3 = vmmov %vm9259_vm4 }
 0x232   :  { %9238 = vst [vmem:[#allocation97_spill] sm:$0xff] %v7477_v1  ;;  %v4652_v1 = vsub.f32 %v4588_v7, %v5552_v57  ;;  %v7496_v62 = vsub.f32 %v4607_v43, %v5554_v5  ;;  %v7512_v57 = vadd.f32 1.0, %v5126_v6  ;;  %v7518_v40 = vmul.f32 %v4653_v44, %v4653_v44  ;;  %v9257_v5 = vld [vmem:[#allocation74_spill] sm:$0xff]  ;;  %vm9283_vm14 = vmmov %vm9276_vm3 }
 0x233   :  { %9239 = vst [vmem:[#allocation98_spill] sm:$0xff] %v7479_v0  ;;  %v1838_v0 = vpop.f32.mrf.mxu3  ;;  %v7510_v43 = vmul.f32 %v4651_v12, %v4651_v12  ;;  %v4891_v46 = vmul.f32 %v4827_v3, %v9257_v5  ;;  %v4188_v12 = vadd.f32 %v7136_v23, %v7114_v38  ;;  %v7530_v6 = vadd.f32 %v7186_v53, %v7173_v11  ;;  %v3371_v3 = vld [vmem:[#allocation2 + $0x1c0] sm:$0xff] }
 0x234   :  { %9240 = vst [vmem:[#allocation99_spill] sm:$0xff] %v7481_v39  ;;  %vm2211_vm10 = vcmp.gt.f32.partialorder %v1838_v0, 0.0  ;;  %v9250_v0 = vld [vmem:[#allocation50_spill] sm:$0xff]  ;;  %v7516_v55 = vmul.f32 %v4652_v1, %v4652_v1  ;;  %v7535_v1 = vadd.f32 %v7226_v52, %v7002_v10  ;;  %v7543_v44 = vadd.f32 %v7287_v59, %v7163_v45  ;;  %v7562_v45 = vld [vmem:[#allocation2 + $0x180] sm:$0xff] }
 0x235   :  { %9247 = vst [vmem:[#allocation43_spill] sm:$0xff] %v7494_v30  ;;  %v5384_v7 = vsel %vm2211_vm10, 1.0, %v8934_v50  ;;  %vm9251_vm9 = vnez %v9250_v0  ;;  %v5389_v0 = vsel %vm2216_vm7, 1.0, %v8934_v50  ;;  %v4967_v38 = vsel %vm9261_vm6, %v4891_v46, 0.0  ;;  %vm9289_vm7 = vmmov %vm9276_vm3 }
 0x236   :  { %9248 = vst [vmem:[#allocation44_spill] sm:$0xff] %v7496_v62  ;;  %v5129_v28 = vsel %vm9251_vm9, 1.0, %v8934_v50  ;;  %v7522_v62 = vadd.f32 1.0, %v5128_v20  ;;  %v7548_v11 = vadd.f32 %v7265_v24, %v7075_v15  ;;  %v7556_v10 = vadd.f32 %v7387_v9, %v7259_v2  ;;  %v7560_v20 = vld [vmem:[#allocation2 + $0x170] sm:$0xff]  ;;  %vm9284_vm9 = vmmov %vm9276_vm3 }
 0x237   :  { %2461 = vst.msk [vmem:[#allocation2 + $0x150] sm:$0xff] %vm9253_vm12, %v5384_v7  ;;  %v7524_v32 = vadd.f32 1.0, %v5129_v28  ;;  %v7558_v37 = vadd.f32 %v4967_v38, %v4966_v54  ;;  %v3176_v28 = vld [vmem:[#allocation2 + $0x190] sm:$0xff]  ;;  %v7566_v15 = vadd.f32 %v7248_v21, %v7055_v47  ;;  %v7574_v2 = vadd.f32 %v7442_v14, %v7293_v49  ;;  %v3241_v54 = vld [vmem:[#allocation2 + $0x1a0] sm:$0xff]  ;;  %v1858_v38 = vpop.f32.mrf.mxu1 }
 0x238   :  { %9254 = vst [vmem:[#allocation38_spill] sm:$0xff] %v7510_v43  ;;  %v7578_v5 = vadd.f32 %v7304_v25, %v7133_v17  ;;  %v7582_v47 = vadd.f32 %v7450_v51, %v7154_v31  ;;  %v7597_v17 = vadd.f32 %v7543_v44, %v7186_v53  ;;  %v7604_v33 = vadd.f32 %v7556_v10, %v7257_v56  ;;  %v3436_v56 = vld [vmem:[#allocation2 + $0x1d0] sm:$0xff] }
 0x239   :  { %9255 = vst [vmem:[#allocation49_spill] sm:$0xff] %v7514_v13  ;;  %v3884_v39 = vadd.f32 %v3371_v3, %v3306_v58  ;;  %v7612_v53 = vadd.f32 %v7570_v61, %v7226_v52  ;;  %v7616_v30 = vadd.f32 %v7574_v2, %v7287_v59  ;;  %vm2213_vm1 = vcmp.gt.f32.partialorder %v1858_v38, 0.0  ;;  %v2529_v13 = vld [vmem:[#allocation2 + $0x1e0] sm:$0xff] }
 0x23a   :  { %9256 = vst [vmem:[#allocation50_spill] sm:$0xff] %v7518_v40  ;;  %v7621_v40 = vadd.f32 %v7586_v16, %v7248_v21  ;;  %v5386_v43 = vsel %vm2213_vm1, 1.0, %v8934_v50  ;;  %v7625_v18 = vadd.f32 %v3176_v28, %v7562_v45  ;;  %v3882_v59 = vadd.f32 %v3306_v58, %v3241_v54 }
 0x23b   :  { %9258 = vst [vmem:[#allocation73_spill] sm:$0xff] %v7524_v32  ;;  %v1840_v7 = vpop.f32.mrf.mxu3  ;;  %v4140_v21 = vadd.f32 %v3884_v39, %v3436_v56 }
 0x23c   :  { %2466 = vst.msk [vmem:[#allocation2 + $0x258] sm:$0xff] %vm9259_vm4, %v5389_v0  ;;  %vm2212_vm2 = vcmp.gt.f32.partialorder %v1840_v7, 0.0  ;;  %v7593_v0 = vadd.f32 %v7539_v19, %v7136_v23  ;;  %v7608_v7 = vadd.f32 %v7562_v45, %v7560_v20  ;;  %v3820_v23 = vadd.f32 %v3241_v54, %v3176_v28 }
 0x23d   :  { %9260 = vst [vmem:[#allocation74_spill] sm:$0xff] %v7543_v44  ;;  %v5385_v49 = vsel %vm2212_vm2, 1.0, %v8934_v50 }
 0x23e   :  { %9262 = vst [vmem:[#allocation100_spill] sm:$0xff] %v7566_v15  ;;  %v7588_v46 = vld [vmem:[#allocation2 + $0x150] sm:$0xff]  ;;  %v4076_v38 = vadd.f32 %v3820_v23, %v7608_v7  ;;  %v7662_v15 = vld [vmem:[#allocation2 + $0x1a8] sm:$0xff] }
 0x23f   :  { %9263 = vst [vmem:[#allocation101_spill] sm:$0xff] %v7574_v2  ;;  %v4124_v31 = vadd.f32 %v7556_v10, %v7588_v46  ;;  %v3690_v52 = vadd.f32 %v7588_v46, %v7387_v9  ;;  %v7641_v9 = vadd.f32 %v7616_v30, %v7304_v25 }
 0x240   :  { %9264 = vst [vmem:[#allocation102_spill] sm:$0xff] %v7578_v5  ;;  %v4136_v5 = vadd.f32 %v3820_v23, %v3306_v58  ;;  %v4268_v58 = vadd.f32 %v4140_v21, %v4076_v38  ;;  %v7669_v23 = vadd.f32 %v7637_v4, %v2529_v13 }
 0x241   :  { %9265 = vst [vmem:[#allocation103_spill] sm:$0xff] %v7582_v47  ;;  %v4134_v47 = vadd.f32 %v7625_v18, %v3241_v54  ;;  %v7666_v54 = vld [vmem:[#allocation2 + $0x1c8] sm:$0xff] }
 0x242   :  { %9266 = vst [vmem:[#allocation104_spill] sm:$0xff] %v7586_v16 }
 0x243   :  { %9267 = vst [vmem:[#allocation105_spill] sm:$0xff] %v7597_v17  ;;  %v1898_v26 = vpop.f32.mrf.mxu3  ;;  %v4138_v17 = vadd.f32 %v3882_v59, %v3371_v3  ;;  %v9281_v59 = vld [vmem:[#allocation77_spill] sm:$0xff] }
 0x244   :  { %2462 = vst.msk [vmem:[#allocation2 + $0x158] sm:$0xff] %vm9268_vm5, %v5385_v49  ;;  %v4252_v49 = vadd.f32 %v4124_v31, %v7539_v19  ;;  %v7632_v31 = vadd.f32 %v7604_v33, %v7265_v24  ;;  %vm2217_vm13 = vcmp.gt.f32.partialorder %v1898_v26, 0.0  ;;  %v7646_v24 = vld [vmem:[#allocation2 + $0x178] sm:$0xff] }
 0x245   :  { %9269 = vst [vmem:[#allocation106_spill] sm:$0xff] %v7616_v30  ;;  %v5390_v25 = vsel %vm2217_vm13, 1.0, %v8934_v50  ;;  %v7664_v30 = vld [vmem:[#allocation2 + $0x1b8] sm:$0xff] }
 0x246   :  { %9270 = vst [vmem:[#allocation107_spill] sm:$0xff] %v7621_v40  ;;  %v4316_v32 = vadd.f32 %v4252_v49, %v4188_v12  ;;  %v7644_v12 = vld [vmem:[#allocation2 + $0x230] sm:$0xff]  ;;  %v7648_v49 = vld [vmem:[#allocation2 + $0x188] sm:$0xff] }
 0x247   :  { %2463 = vst.msk [vmem:[#allocation2 + $0x160] sm:$0xff] %vm9271_vm15, %v5386_v43  ;;  %v4132_v43 = vadd.f32 %v7608_v7, %v3176_v28  ;;  %v9275_v28 = vld [vmem:[#allocation75_spill] sm:$0xff]  ;;  %v7677_v3 = vadd.f32 %v7648_v49, %v7646_v24 }
 0x248   :  { %9272 = vst [vmem:[#allocation108_spill] sm:$0xff] %v7641_v9  ;;  %vm4380_vm0 = vcmp.gt.f32.partialorder %v4316_v32, 0.0  ;;  %v7655_v9 = vld [vmem:[#allocation2 + $0x198] sm:$0xff]  ;;  %v4010_v32 = vadd.f32 %v3690_v52, %v7382_v36  ;;  %v7673_v36 = vadd.f32 %v7644_v12, %v7635_v27 }
 0x249   :  { %9273 = vst [vmem:[#allocation109_spill] sm:$0xff] %v7644_v12  ;;  %v5434_v39 = vsel %vm4380_vm0, 1.0, %v8934_v50  ;;  %v7683_v38 = vadd.f32 %v7655_v9, %v7648_v49  ;;  %v7692_v12 = vadd.f32 %v7664_v30, %v7662_v15 }
 0x24a   :  { %9274 = vst [vmem:[#allocation110_spill] sm:$0xff] %v7648_v49  ;;  %v4828_v40 = vadd.f32 %v5434_v39, %v9275_v28  ;;  %v1860_v39 = vpop.f32.mrf.mxu1 }
 0x24b   :  { %v7651_v56 = vld [vmem:[#allocation2 + $0x158] sm:$0xff]  ;;  %2467 = vst.msk [vmem:[#allocation2 + $0x260] sm:$0xff] %vm9276_vm3, %v5390_v25  ;;  %vm2214_vm10 = vcmp.gt.f32.partialorder %v1860_v39, 0.0 }
 0x24c   :  { %v4125_v26 = vadd.f32 %v7574_v2, %v7651_v56  ;;  %9277 = vst [vmem:[#allocation75_spill] sm:$0xff] %v7664_v30  ;;  %v4892_v25 = vmul.f32 %v4828_v40, %v9281_v59  ;;  %v5387_v21 = vsel %vm2214_vm10, 1.0, %v8934_v50  ;;  %v7696_v40 = vadd.f32 %v7666_v54, %v7664_v30  ;;  %v7709_v2 = vpop.f32.mrf.mxu3 }
 0x24d   :  { %9278 = vst [vmem:[#allocation111_spill] sm:$0xff] %v7666_v54  ;;  %v7706_v51 = vadd.f32 %v7651_v56, %v7442_v14 }
 0x24e   :  { %9279 = vst [vmem:[#allocation112_spill] sm:$0xff] %v7669_v23  ;;  %v4253_v28 = vadd.f32 %v4125_v26, %v7543_v44  ;;  %v2981_v13 = vld [vmem:[#allocation2 + $0x160] sm:$0xff]  ;;  %v4202_v26 = vadd.f32 %v4010_v32, %v7395_v29  ;;  %v4969_v39 = vsel %vm9283_vm14, %v4892_v25, 0.0  ;;  %v7711_v29 = vpop.f32.mrf.mxu2 }
 0x24f   :  { %9280 = vst [vmem:[#allocation113_spill] sm:$0xff] %v7673_v36  ;;  %v7688_v36 = vadd.f32 %v7662_v15, %v7655_v9  ;;  %v3692_v23 = vadd.f32 %v2981_v13, %v7588_v46  ;;  %v4970_v44 = vadd.f32 %v4969_v39, %v7558_v37  ;;  %v3754_v16 = vadd.f32 %v7560_v20, %v2981_v13  ;;  %v9287_v39 = vld [vmem:[#allocation76_spill] sm:$0xff] }
 0x250   :  { %9282 = vst [vmem:[#allocation77_spill] sm:$0xff] %v7692_v12  ;;  %v4317_v59 = vadd.f32 %v4253_v28, %v7530_v6  ;;  %v4126_v49 = vadd.f32 %v3690_v52, %v2981_v13 }
 0x251   :  { %2464 = vst.msk [vmem:[#allocation2 + $0x168] sm:$0xff] %vm9284_vm9, %v5387_v21  ;;  %v4012_v6 = vadd.f32 %v3692_v23, %v7556_v10  ;;  %v4072_v46 = vadd.f32 %v7608_v7, %v3692_v23  ;;  %v4128_v25 = vadd.f32 %v3692_v23, %v7560_v20  ;;  %v4070_v28 = vadd.f32 %v3754_v16, %v3690_v52  ;;  %v9288_v23 = vld [vmem:[#allocation78_spill] sm:$0xff] }
 0x252   :  { %9285 = vst [vmem:[#allocation114_spill] sm:$0xff] %v7709_v2  ;;  %vm4381_vm12 = vcmp.gt.f32.partialorder %v4317_v59, 0.0  ;;  %v4074_v14 = vadd.f32 %v7625_v18, %v3754_v16  ;;  %v4130_v21 = vadd.f32 %v3754_v16, %v7562_v45  ;;  %v7723_v20 = vpop.f32.mrf.mxu1 }
 0x253   :  { %9286 = vst [vmem:[#allocation115_spill] sm:$0xff] %v7711_v29  ;;  %v5435_v37 = vsel %vm4381_vm12, 1.0, %v8934_v50  ;;  %v4204_v2 = vadd.f32 %v4012_v6, %v7539_v19  ;;  %v4254_v29 = vadd.f32 %v4126_v49, %v7570_v61  ;;  %v4256_v59 = vadd.f32 %v4128_v25, %v7604_v33 }
 0x254   :  { %v4829_v13 = vadd.f32 %v5435_v37, %v9287_v39  ;;  %v4258_v10 = vadd.f32 %v4130_v21, %v4010_v32  ;;  %v4260_v12 = vadd.f32 %v4132_v43, %v4012_v6  ;;  %v4262_v7 = vadd.f32 %v4134_v47, %v4070_v28  ;;  %v2659_v21 = vld [vmem:[#allocation2 + $0x200] sm:$0xff]  ;;  %v2724_v39 = vld [vmem:[#allocation2 + $0x210] sm:$0xff] }
 0x255   :  { %v4264_v54 = vadd.f32 %v4136_v5, %v4072_v46  ;;  %v4266_v30 = vadd.f32 %v4138_v17, %v4074_v14  ;;  %v4318_v18 = vadd.f32 %v4254_v29, %v7535_v1  ;;  %v4320_v45 = vadd.f32 %v4256_v59, %v7548_v11  ;;  %v9293_v59 = vld [vmem:[#allocation79_spill] sm:$0xff] }
 0x256   :  { %v4893_v52 = vmul.f32 %v4829_v13, %v9288_v23  ;;  %v4322_v16 = vadd.f32 %v4258_v10, %v7552_v41  ;;  %v4324_v19 = vadd.f32 %v4260_v12, %v7593_v0  ;;  %v4326_v61 = vadd.f32 %v4262_v7, %v7612_v53  ;;  %v7733_v1 = vpop.f32.mrf.mxu2  ;;  %v9290_v12 = vld [vmem:[#allocation81_spill] sm:$0xff]  ;;  %v3437_v13 = vld [vmem:[#allocation2 + $0x1d8] sm:$0xff] }
 0x257   :  { %v4328_v33 = vadd.f32 %v4264_v54, %v7632_v31  ;;  %v4330_v5 = vadd.f32 %v4266_v30, %v4202_v26  ;;  %v4332_v43 = vadd.f32 %v4268_v58, %v4204_v2  ;;  %vm4382_vm4 = vcmp.gt.f32.partialorder %v4318_v18, 0.0  ;;  %v7739_v2 = vpop.f32.mrf.mxu3  ;;  %v9291_v54 = vld [vmem:[#allocation85_spill] sm:$0xff]  ;;  %v9292_v26 = vld [vmem:[#allocation91_spill] sm:$0xff] }
 0x258   :  { %v4971_v47 = vsel %vm9289_vm7, %v4893_v52, 0.0  ;;  %vm4384_vm6 = vcmp.gt.f32.partialorder %v4320_v45, 0.0  ;;  %vm4386_vm2 = vcmp.gt.f32.partialorder %v4322_v16, 0.0  ;;  %vm4388_vm5 = vcmp.gt.f32.partialorder %v4324_v19, 0.0  ;;  %v9294_v7 = vld [vmem:[#allocation83_spill] sm:$0xff]  ;;  %v9295_v52 = vld [vmem:[#allocation13_spill] sm:$0xff] }
 0x259   :  { %v4972_v49 = vadd.f32 %v4971_v47, %v4970_v44  ;;  %vm4390_vm1 = vcmp.gt.f32.partialorder %v4326_v61, 0.0  ;;  %vm4392_vm15 = vcmp.gt.f32.partialorder %v4328_v33, 0.0  ;;  %vm4394_vm0 = vcmp.gt.f32.partialorder %v4330_v5, 0.0  ;;  %v2982_v19 = vld [vmem:[#allocation2 + $0x168] sm:$0xff] }
 0x25a   :  { %vm4396_vm13 = vcmp.gt.f32.partialorder %v4332_v43, 0.0  ;;  %v5436_v11 = vsel %vm4382_vm4, 1.0, %v8934_v50  ;;  %v5438_v41 = vsel %vm4384_vm6, 1.0, %v8934_v50  ;;  %v5440_v0 = vsel %vm4386_vm2, 1.0, %v8934_v50  ;;  %v7749_v46 = vpop.f32.mrf.mxu1 }
 0x25b   :  { %v5442_v30 = vsel %vm4388_vm5, 1.0, %v8934_v50  ;;  %v5444_v44 = vsel %vm4390_vm1, 1.0, %v8934_v50  ;;  %v5446_v17 = vsel %vm4392_vm15, 1.0, %v8934_v50  ;;  %v5448_v53 = vsel %vm4394_vm0, 1.0, %v8934_v50  ;;  %vm9332_vm15 = vmmov %vm9276_vm3 }
 0x25c   :  { %v5450_v31 = vsel %vm4396_vm13, 1.0, %v8934_v50  ;;  %v4830_v32 = vadd.f32 %v5436_v11, %v9290_v12  ;;  %v4832_v58 = vadd.f32 %v5438_v41, %v9291_v54  ;;  %v4834_v29 = vadd.f32 %v5440_v0, %v9292_v26  ;;  %vm9334_vm0 = vmmov %vm9276_vm3 }
 0x25d   :  { %v4836_v6 = vadd.f32 %v5442_v30, %v7272_v8  ;;  %v4838_v25 = vadd.f32 %v5444_v44, %v7368_v22  ;;  %v4840_v37 = vadd.f32 %v5446_v17, %v7464_v60  ;;  %v4842_v28 = vadd.f32 %v5448_v53, %v7512_v57  ;;  %v7765_v22 = vld [vmem:[#allocation2 + $0x240] sm:$0xff]  ;;  %v7767_v60 = vld [vmem:[#allocation2 + $0x250] sm:$0xff]  ;;  %v9296_v30 = vld [vmem:[#allocation75_spill] sm:$0xff] }
 0x25e   :  { %v4844_v14 = vadd.f32 %v5450_v31, %v7522_v62  ;;  %v4894_v10 = vmul.f32 %v4830_v32, %v9293_v59  ;;  %v7757_v23 = vmul.f32 %v4832_v58, %v9294_v7  ;;  %v7760_v8 = vmul.f32 %v4834_v29, %v9295_v52  ;;  %v7787_v47 = vpop.f32.mrf.mxu2  ;;  %v9297_v44 = vld [vmem:[#allocation111_spill] sm:$0xff]  ;;  %v9298_v17 = vld [vmem:[#allocation77_spill] sm:$0xff]  ;;  %v9300_v58 = vld [vmem:[#allocation110_spill] sm:$0xff] }
 0x25f   :  { %v7763_v18 = vmul.f32 %v4836_v6, %v7282_v63  ;;  %v7770_v62 = vmul.f32 %v4838_v25, %v7364_v34  ;;  %v7773_v57 = vmul.f32 %v4840_v37, %v7427_v48  ;;  %v7776_v45 = vmul.f32 %v4842_v28, %v7500_v35  ;;  %v7806_v41 = vpop.f32.mrf.mxu3  ;;  %v9299_v53 = vld [vmem:[#allocation101_spill] sm:$0xff]  ;;  %v9301_v29 = vld [vmem:[#allocation104_spill] sm:$0xff]  ;;  %v9303_v37 = vld [vmem:[#allocation74_spill] sm:$0xff] }
 0x260   :  { %v7779_v16 = vmul.f32 %v4844_v14, %v7516_v55  ;;  %v4973_v63 = vsel %vm9276_vm3, %v4894_v10, 0.0  ;;  %v7782_v61 = vadd.f32 %v2724_v39, %v2659_v21  ;;  %v4077_v33 = vadd.f32 %v7688_v36, %v7677_v3  ;;  %v9302_v6 = vld [vmem:[#allocation33_spill] sm:$0xff]  ;;  %v9305_v10 = vld [vmem:[#allocation100_spill] sm:$0xff]  ;;  %vm9335_vm3 = vmmov %vm9334_vm0 }
 0x261   :  { %v4141_v34 = vadd.f32 %v7696_v40, %v3437_v13  ;;  %v7789_v48 = vadd.f32 %v4973_v63, %v4972_v49  ;;  %v7793_v35 = vadd.f32 %v7767_v60, %v7765_v22  ;;  %v7796_v55 = vadd.f32 %v2659_v21, %v7637_v4 }
 0x262   :  { %v4133_v5 = vadd.f32 %v7677_v3, %v7655_v9  ;;  %v4011_v43 = vadd.f32 %v7706_v51, %v7439_v42  ;;  %v3693_v11 = vadd.f32 %v2982_v19, %v7651_v56  ;;  %v3755_v40 = vadd.f32 %v7646_v24, %v2982_v19  ;;  %v7819_v32 = vpop.f32.mrf.mxu1 }
 0x263   :  { %v4135_v49 = vadd.f32 %v7683_v38, %v7662_v15  ;;  %v7809_v0 = vadd.f32 %v2724_v39, %v7635_v27  ;;  %v4127_v4 = vadd.f32 %v7706_v51, %v2982_v19  ;;  %v4137_v9 = vadd.f32 %v7688_v36, %v9296_v30 }
 0x264   :  { %v4139_v42 = vadd.f32 %v9298_v17, %v9297_v44  ;;  %v4013_v56 = vadd.f32 %v3693_v11, %v9299_v53  ;;  %v4071_v31 = vadd.f32 %v3755_v40, %v7706_v51  ;;  %v4073_v12 = vadd.f32 %v7677_v3, %v3693_v11  ;;  %v9304_v51 = vld [vmem:[#allocation106_spill] sm:$0xff] }
 0x265   :  { %v4269_v15 = vadd.f32 %v4141_v34, %v4077_v33  ;;  %v4075_v27 = vadd.f32 %v7683_v38, %v3755_v40  ;;  %v4129_v54 = vadd.f32 %v3693_v11, %v7646_v24  ;;  %v4131_v26 = vadd.f32 %v3755_v40, %v9300_v58  ;;  %v9306_v38 = vld [vmem:[#allocation105_spill] sm:$0xff]  ;;  %v9307_v24 = vld [vmem:[#allocation107_spill] sm:$0xff]  ;;  %v9308_v34 = vld [vmem:[#allocation102_spill] sm:$0xff] }
 0x266   :  { %v4255_v36 = vadd.f32 %v4127_v4, %v9301_v29  ;;  %v4203_v25 = vadd.f32 %v4011_v43, %v9302_v6  ;;  %v4205_v28 = vadd.f32 %v4013_v56, %v9303_v37  ;;  %v4261_v14 = vadd.f32 %v4133_v5, %v4013_v56  ;;  %v7831_v33 = vpop.f32.mrf.mxu2  ;;  %v9309_v40 = vld [vmem:[#allocation103_spill] sm:$0xff]  ;;  %v9310_v5 = vld [vmem:[#allocation108_spill] sm:$0xff]  ;;  %v9311_v44 = vld [vmem:[#allocation114_spill] sm:$0xff] }
 0x267   :  { %v4263_v21 = vadd.f32 %v4135_v49, %v4071_v31  ;;  %v4257_v39 = vadd.f32 %v4129_v54, %v9304_v51  ;;  %v4259_v3 = vadd.f32 %v4131_v26, %v4011_v43  ;;  %v4265_v13 = vadd.f32 %v4137_v9, %v4073_v12  ;;  %v7837_v43 = vpop.f32.mrf.mxu3  ;;  %v9312_v54 = vld [vmem:[#allocation82_spill] sm:$0xff] }
 0x268   :  { %v4267_v59 = vadd.f32 %v4139_v42, %v4075_v27  ;;  %v4319_v7 = vadd.f32 %v4255_v36, %v9305_v10  ;;  %v4325_v52 = vadd.f32 %v4261_v14, %v9306_v38  ;;  %v4333_v63 = vadd.f32 %v4269_v15, %v4205_v28  ;;  %v9313_v26 = vld [vmem:[#allocation86_spill] sm:$0xff]  ;;  %v9314_v36 = vld [vmem:[#allocation92_spill] sm:$0xff]  ;;  %v2530_v10 = vld [vmem:[#allocation2 + $0x1e8] sm:$0xff] }
 0x269   :  { %v4327_v19 = vadd.f32 %v4263_v21, %v9307_v24  ;;  %v4321_v11 = vadd.f32 %v4257_v39, %v9308_v34  ;;  %v4323_v4 = vadd.f32 %v4259_v3, %v9309_v40  ;;  %v4329_v49 = vadd.f32 %v4265_v13, %v9310_v5  ;;  %v9316_v28 = vld [vmem:[#allocation68_spill] sm:$0xff]  ;;  %v9318_v39 = vld [vmem:[#allocation49_spill] sm:$0xff]  ;;  %v9323_v34 = vld [vmem:[#allocation58_spill] sm:$0xff] }
 0x26a   :  { %v4331_v30 = vadd.f32 %v4267_v59, %v4203_v25  ;;  %vm2218_vm10 = vcmp.gt.f32.partialorder %v9311_v44, 0.0  ;;  %vm4383_vm14 = vcmp.gt.f32.partialorder %v4319_v7, 0.0  ;;  %vm4389_vm9 = vcmp.gt.f32.partialorder %v4325_v52, 0.0  ;;  %v7843_v56 = vpop.f32.mrf.mxu1  ;;  %v9315_v25 = vld [vmem:[#allocation55_spill] sm:$0xff]  ;;  %v9317_v21 = vld [vmem:[#allocation72_spill] sm:$0xff]  ;;  %v9319_v13 = vld [vmem:[#allocation73_spill] sm:$0xff] }
 0x26b   :  { %vm4391_vm12 = vcmp.gt.f32.partialorder %v4327_v19, 0.0  ;;  %vm4397_vm7 = vcmp.gt.f32.partialorder %v4333_v63, 0.0  ;;  %vm4385_vm4 = vcmp.gt.f32.partialorder %v4321_v11, 0.0  ;;  %vm4387_vm6 = vcmp.gt.f32.partialorder %v4323_v4, 0.0  ;;  %v9320_v7 = vld [vmem:[#allocation80_spill] sm:$0xff]  ;;  %v9322_v19 = vld [vmem:[#allocation93_spill] sm:$0xff] }
 0x26c   :  { %vm4393_vm2 = vcmp.gt.f32.partialorder %v4329_v49, 0.0  ;;  %vm4395_vm5 = vcmp.gt.f32.partialorder %v4331_v30, 0.0  ;;  %v5437_v9 = vsel %vm4383_vm14, 1.0, %v8934_v50  ;;  %v5439_v17 = vsel %vm4385_vm4, 1.0, %v8934_v50  ;;  %v9321_v52 = vld [vmem:[#allocation84_spill] sm:$0xff]  ;;  %v7863_v40 = vld [vmem:[#allocation2 + $0x228] sm:$0xff]  ;;  %vm9340_vm4 = vmmov %vm9334_vm0 }
 0x26d   :  { %v5441_v42 = vsel %vm4387_vm6, 1.0, %v8934_v50  ;;  %v5443_v53 = vsel %vm4389_vm9, 1.0, %v8934_v50  ;;  %v5445_v31 = vsel %vm4391_vm12, 1.0, %v8934_v50  ;;  %v5447_v12 = vsel %vm4393_vm2, 1.0, %v8934_v50  ;;  %v7865_v4 = vld [vmem:[#allocation2 + $0x1f8] sm:$0xff]  ;;  %vm9337_vm9 = vmmov %vm9334_vm0 }
 0x26e   :  { %v5449_v15 = vsel %vm4395_vm5, 1.0, %v8934_v50  ;;  %v5451_v27 = vsel %vm4397_vm7, 1.0, %v8934_v50  ;;  %v4831_v58 = vadd.f32 %v5437_v9, %v9312_v54  ;;  %v4833_v29 = vadd.f32 %v5439_v17, %v9313_v26  ;;  %v7867_v5 = vld [vmem:[#allocation2 + $0x238] sm:$0xff]  ;;  %v7869_v49 = vpop.f32.mrf.mxu2  ;;  %v9325_v17 = vld [vmem:[#allocation32_spill] sm:$0xff]  ;;  %vm9339_vm7 = vmmov %vm9334_vm0 }
 0x26f   :  { %v4835_v6 = vadd.f32 %v5441_v42, %v9314_v36  ;;  %v4837_v37 = vadd.f32 %v5443_v53, %v9315_v25  ;;  %v4839_v14 = vadd.f32 %v5445_v31, %v9316_v28  ;;  %v4841_v51 = vadd.f32 %v5447_v12, %v9317_v21  ;;  %v9324_v30 = vld [vmem:[#allocation67_spill] sm:$0xff]  ;;  %v9326_v53 = vld [vmem:[#allocation38_spill] sm:$0xff]  ;;  %v7897_v25 = vld [vmem:[#allocation2 + $0x248] sm:$0xff]  ;;  %v7901_v28 = vpop.f32.mrf.mxu3 }
 0x270   :  { %v4843_v3 = vadd.f32 %v5449_v15, %v9318_v39  ;;  %v4845_v59 = vadd.f32 %v5451_v27, %v9319_v13  ;;  %v4895_v38 = vmul.f32 %v4831_v58, %v9320_v7  ;;  %v4897_v24 = vmul.f32 %v4833_v29, %v9321_v52  ;;  %v9327_v12 = vld [vmem:[#allocation50_spill] sm:$0xff]  ;;  %v9328_v27 = vld [vmem:[#allocation39_spill] sm:$0xff]  ;;  %v9330_v58 = vld [vmem:[#allocation112_spill] sm:$0xff] }
 0x271   :  { %v4899_v63 = vmul.f32 %v4835_v6, %v9322_v19  ;;  %v7861_v11 = vmul.f32 %v4837_v37, %v9323_v34  ;;  %v7872_v9 = vmul.f32 %v4839_v14, %v9324_v30  ;;  %v7875_v42 = vmul.f32 %v4841_v51, %v9325_v17  ;;  %v9331_v29 = vld [vmem:[#allocation109_spill] sm:$0xff]  ;;  %v7899_v37 = vld [vmem:[#allocation2 + $0x258] sm:$0xff]  ;;  %vm9341_vm2 = vmmov %vm9334_vm0 }
 0x272   :  { %v7878_v31 = vmul.f32 %v4843_v3, %v9326_v53  ;;  %v7881_v15 = vmul.f32 %v4845_v59, %v9327_v12  ;;  %vm9329_vm1 = vnez %v9328_v27  ;;  %v7890_v26 = vadd.f32 %v7782_v61, %v9330_v58  ;;  %v9333_v14 = vld [vmem:[#allocation113_spill] sm:$0xff]  ;;  %v7910_v3 = vld [vmem:[#allocation2 + $0x218] sm:$0xff]  ;;  %vm9342_vm5 = vmmov %vm9334_vm0 }
 0x273   :  { %v7886_v54 = vsel %vm9329_vm1, 1.0, %v8934_v50  ;;  %v7894_v36 = vadd.f32 %v9331_v29, %v7765_v22  ;;  %v4975_v6 = vsel %vm9332_vm15, %v4895_v38, 0.0  ;;  %v7905_v21 = vadd.f32 %v7793_v35, %v9333_v14  ;;  %v7908_v39 = vld [vmem:[#allocation2 + $0x208] sm:$0xff]  ;;  %v2038_v38 = vpop.f32.mrf.mxu1  ;;  %v9336_v19 = vld [vmem:[#allocation115_spill] sm:$0xff] }
 0x274   :  { %v4976_v51 = vadd.f32 %v4975_v6, %v7789_v48  ;;  %v7913_v22 = vadd.f32 %v7865_v4, %v2530_v10  ;;  %v7917_v13 = vadd.f32 %v7867_v5, %v7863_v40  ;;  %v4977_v59 = vsel %vm9334_vm0, %v7757_v23, 0.0 }
 0x275   :  { %v7923_v7 = vadd.f32 %v7809_v0, %v7796_v55  ;;  %v5391_v48 = vsel %vm2218_vm10, 1.0, %v8934_v50  ;;  %vm2219_vm13 = vcmp.gt.f32.partialorder %v7723_v20, 0.0  ;;  %v7931_v52 = vadd.f32 %v7899_v37, %v7897_v25  ;;  %vm9338_vm10 = vmmov %vm9334_vm0 }
 0x276   :  { %v4978_v10 = vadd.f32 %v4977_v59, %v4976_v51  ;;  %2468 = vst.msk [vmem:[#allocation2 + $0x268] sm:$0xff] %vm9335_vm3, %v5391_v48  ;;  %v5392_v23 = vsel %vm2219_vm13, 1.0, %v8934_v50  ;;  %vm2221_vm14 = vcmp.gt.f32.partialorder %v9336_v19, 0.0  ;;  %v4979_v55 = vsel %vm9337_vm9, %v4897_v24, 0.0  ;;  %vm9343_vm3 = vmmov %vm9334_vm0 }
 0x277   :  { %v7939_v44 = vadd.f32 %v7910_v3, %v7908_v39  ;;  %2469 = vst.msk [vmem:[#allocation2 + $0x270] sm:$0xff] %vm9338_vm10, %v5392_v23  ;;  %v5394_v20 = vsel %vm2221_vm14, 1.0, %v8934_v50  ;;  %vm2223_vm12 = vcmp.gt.f32.partialorder %v7739_v2, 0.0  ;;  %v4981_v34 = vsel %vm9339_vm7, %v7760_v8, 0.0  ;;  %vm9345_vm7 = vmmov %vm9334_vm0  ;;  %v2078_v29 = vpop.f32.mrf.mxu3 }
 0x278   :  { %v4980_v30 = vadd.f32 %v4979_v55, %v4978_v10  ;;  %2471 = vst.msk [vmem:[#allocation2 + $0x280] sm:$0xff] %vm9340_vm4, %v5394_v20  ;;  %v5396_v17 = vsel %vm2223_vm12, 1.0, %v8934_v50  ;;  %vm2220_vm6 = vcmp.gt.f32.partialorder %v7749_v46, 0.0  ;;  %v4983_v24 = vsel %vm9341_vm2, %v4899_v63, 0.0  ;;  %v7958_v46 = vpop.f32.mrf.mxu2  ;;  %v2545_v63 = vld [vmem:[#allocation2 + $0x260] sm:$0xff]  ;;  %vm9344_vm12 = vmmov %vm9334_vm0 }
 0x279   :  { %2473 = vst.msk [vmem:[#allocation2 + $0x290] sm:$0xff] %vm9342_vm5, %v5396_v17  ;;  %v5393_v53 = vsel %vm2220_vm6, 1.0, %v8934_v50  ;;  %vm2222_vm1 = vcmp.gt.f32.partialorder %v7733_v1, 0.0  ;;  %vm2224_vm15 = vcmp.gt.f32.partialorder %v7806_v41, 0.0  ;;  %vm2225_vm13 = vcmp.gt.f32.partialorder %v7819_v32, 0.0  ;;  %vm9346_vm4 = vmmov %vm9334_vm0 }
 0x27a   :  { %v4982_v2 = vadd.f32 %v4981_v34, %v4980_v30  ;;  %2470 = vst.msk [vmem:[#allocation2 + $0x278] sm:$0xff] %vm9334_vm0, %v5393_v53  ;;  %v5395_v8 = vsel %vm2222_vm1, 1.0, %v8934_v50  ;;  %v5397_v12 = vsel %vm2224_vm15, 1.0, %v8934_v50  ;;  %v5398_v27 = vsel %vm2225_vm13, 1.0, %v8934_v50  ;;  %vm9347_vm1 = vmmov %vm9334_vm0 }
 0x27b   :  { %2472 = vst.msk [vmem:[#allocation2 + $0x288] sm:$0xff] %vm9343_vm3, %v5395_v8  ;;  %vm2227_vm14 = vcmp.gt.f32.partialorder %v7787_v47, 0.0  ;;  %vm2229_vm9 = vcmp.gt.f32.partialorder %v7837_v43, 0.0  ;;  %vm2226_vm10 = vcmp.gt.f32.partialorder %v7843_v56, 0.0  ;;  %v4985_v1 = vsel %vm9344_vm12, %v7763_v18, 0.0  ;;  %v2040_v47 = vpop.f32.mrf.mxu1  ;;  %vm9348_vm13 = vmmov %vm9334_vm0 }
 0x27c   :  { %v4984_v41 = vadd.f32 %v4983_v24, %v4982_v2  ;;  %2474 = vst.msk [vmem:[#allocation2 + $0x298] sm:$0xff] %vm9345_vm7, %v5397_v12  ;;  %v5400_v32 = vsel %vm2227_vm14, 1.0, %v8934_v50  ;;  %v5402_v58 = vsel %vm2229_vm9, 1.0, %v8934_v50  ;;  %v5399_v6 = vsel %vm2226_vm10, 1.0, %v8934_v50  ;;  %vm9349_vm14 = vmmov %vm9334_vm0 }
 0x27d   :  { %2475 = vst.msk [vmem:[#allocation2 + $0x2a0] sm:$0xff] %vm9346_vm4, %v5398_v27  ;;  %vm2228_vm6 = vcmp.gt.f32.partialorder %v7831_v33, 0.0  ;;  %vm2230_vm2 = vcmp.gt.f32.partialorder %v7901_v28, 0.0  ;;  %vm2231_vm5 = vcmp.gt.f32.partialorder %v2038_v38, 0.0  ;;  %v7975_v18 = vadd.f32 %v2545_v63, %v7767_v60  ;;  %v2546_v10 = vld [vmem:[#allocation2 + $0x268] sm:$0xff]  ;;  %vm9350_vm9 = vmmov %vm9334_vm0 }
 0x27e   :  { %v4986_v43 = vadd.f32 %v4985_v1, %v4984_v41  ;;  %2477 = vst.msk [vmem:[#allocation2 + $0x2b0] sm:$0xff] %vm9347_vm1, %v5400_v32  ;;  %v5401_v56 = vsel %vm2228_vm6, 1.0, %v8934_v50  ;;  %vm2233_vm15 = vcmp.gt.f32.partialorder %v7869_v49, 0.0  ;;  %v4987_v51 = vsel %vm9334_vm0, %v7861_v11, 0.0  ;;  %v2547_v55 = vld [vmem:[#allocation2 + $0x270] sm:$0xff]  ;;  %vm9351_vm10 = vmmov %vm9334_vm0 }
 0x27f   :  { %v7984_v33 = vadd.f32 %v7931_v52, %v7917_v13  ;;  %2479 = vst.msk [vmem:[#allocation2 + $0x2c0] sm:$0xff] %vm9348_vm13, %v5402_v58  ;;  %v5403_v28 = vsel %vm2230_vm2, 1.0, %v8934_v50  ;;  %vm2235_vm3 = vcmp.gt.f32.partialorder %v2078_v29, 0.0  ;;  %v4989_v60 = vsel %vm9349_vm14, %v7770_v62, 0.0  ;;  %v2549_v20 = vld [vmem:[#allocation2 + $0x280] sm:$0xff]  ;;  %vm9352_vm7 = vmmov %vm9334_vm0 }
 0x280   :  { %v4988_v59 = vadd.f32 %v4987_v51, %v4986_v43  ;;  %v3951_v48 = vadd.f32 %v7939_v44, %v7913_v22  ;;  %2476 = vst.msk [vmem:[#allocation2 + $0x2a8] sm:$0xff] %vm9350_vm9, %v5399_v6  ;;  %v5404_v11 = vsel %vm2231_vm5, 1.0, %v8934_v50  ;;  %v3505_v23 = vadd.f32 %v7908_v39, %v7865_v4  ;;  %v2614_v34 = vld [vmem:[#allocation2 + $0x290] sm:$0xff]  ;;  %vm9353_vm6 = vmmov %vm9334_vm0 }
 0x281   :  { %v7999_v19 = vadd.f32 %v7867_v5, %v7897_v25  ;;  %2478 = vst.msk [vmem:[#allocation2 + $0x2b8] sm:$0xff] %vm9351_vm10, %v5401_v56  ;;  %v5406_v62 = vsel %vm2233_vm15, 1.0, %v8934_v50  ;;  %vm2232_vm12 = vcmp.gt.f32.partialorder %v2040_v47, 0.0  ;;  %v8007_v22 = vadd.f32 %v7975_v18, %v7894_v36  ;;  %vm9354_vm2 = vmmov %vm9334_vm0 }
 0x282   :  { %v4990_v38 = vadd.f32 %v4989_v60, %v4988_v59  ;;  %2480 = vst.msk [vmem:[#allocation2 + $0x2c8] sm:$0xff] %vm9352_vm7, %v5403_v28  ;;  %v5408_v4 = vsel %vm2235_vm3, 1.0, %v8934_v50  ;;  %vm2234_vm4 = vcmp.gt.f32.partialorder %v7958_v46, 0.0  ;;  %v4991_v5 = vsel %vm9353_vm6, %v7872_v9, 0.0  ;;  %vm9355_vm5 = vmmov %vm9334_vm0  ;;  %v2613_v28 = vld [vmem:[#allocation2 + $0x288] sm:$0xff] }
 0x283   :  { %v8016_v49 = vadd.f32 %v2546_v10, %v7899_v37  ;;  %v8020_v25 = vadd.f32 %v7910_v3, %v7863_v40  ;;  %2481 = vst.msk [vmem:[#allocation2 + $0x2d0] sm:$0xff] %vm9354_vm2, %v5404_v11  ;;  %v5405_v39 = vsel %vm2232_vm12, 1.0, %v8934_v50  ;;  %v4206_v30 = vadd.f32 %v7905_v21, %v7890_v26  ;;  %v8032_v37 = vpop.f32.mrf.mxu2  ;;  %vm9356_vm1 = vmmov %vm9334_vm0  ;;  %v8042_v12 = vpop.f32.mrf.mxu1  ;;  %v2678_v29 = vld [vmem:[#allocation2 + $0x298] sm:$0xff] }
 0x284   :  { %v4992_v17 = vadd.f32 %v4991_v5, %v4990_v38  ;;  %v8027_v24 = vadd.f32 %v7984_v33, %v3951_v48  ;;  %v3518_v53 = vadd.f32 %v2547_v55, %v2545_v63  ;;  %v8029_v9 = vld [vmem:[#allocation2 + $0x2a0] sm:$0xff]  ;;  %2483 = vst.msk [vmem:[#allocation2 + $0x2e0] sm:$0xff] %vm9355_vm5, %v5406_v62  ;;  %v4993_v40 = vsel %vm9356_vm1, %v7773_v57, 0.0  ;;  %vm9357_vm15 = vmmov %vm9334_vm0  ;;  %v8091_v62 = vpop.f32.mrf.mxu3 }
 0x285   :  { %v3520_v3 = vadd.f32 %v2549_v20, %v2547_v55  ;;  %v8036_v2 = vadd.f32 %v2614_v34, %v2549_v20  ;;  %v2744_v8 = vld [vmem:[#allocation2 + $0x2b0] sm:$0xff]  ;;  %2485 = vst.msk [vmem:[#allocation2 + $0x2f0] sm:$0xff] %vm9357_vm15, %v5408_v4  ;;  %v5407_v26 = vsel %vm2234_vm4, 1.0, %v8934_v50  ;;  %v4997_v63 = vsel %vm9334_vm0, %v7776_v45, 0.0  ;;  %vm9358_vm13 = vmmov %vm9334_vm0  ;;  %v2548_v45 = vld [vmem:[#allocation2 + $0x278] sm:$0xff] }
 0x286   :  { %v5001_v27 = vsel %vm9358_vm13, %v7779_v16, 0.0  ;;  %v8050_v57 = vadd.f32 %v8007_v22, %v7923_v7  ;;  %v4994_v1 = vadd.f32 %v4993_v40, %v4992_v17  ;;  %v2809_v41 = vld [vmem:[#allocation2 + $0x2c0] sm:$0xff]  ;;  %vm9359_vm3 = vmmov %vm9334_vm0  ;;  %v3953_v32 = vadd.f32 %v8020_v25, %v3505_v23 }
 0x287   :  { %2482 = vst.msk [vmem:[#allocation2 + $0x2d8] sm:$0xff] %vm9359_vm3, %v5405_v39  ;;  %vm9360_vm14 = vmmov %vm9334_vm0  ;;  %v8058_v58 = vadd.f32 %v8016_v49, %v7999_v19  ;;  %v8061_v16 = vadd.f32 %v2744_v8, %v8029_v9  ;;  %v8069_v47 = vadd.f32 %v3518_v53, %v7793_v35  ;;  %v3956_v43 = vadd.f32 %v7809_v0, %v7894_v36  ;;  %v2743_v59 = vld [vmem:[#allocation2 + $0x2a8] sm:$0xff] }
 0x288   :  { %v4995_v46 = vsel %vm9360_vm14, %v7875_v42, 0.0  ;;  %vm9361_vm9 = vmmov %vm9334_vm0  ;;  %v3954_v42 = vadd.f32 %v7782_v61, %v9333_v14  ;;  %v8074_v56 = vadd.f32 %v3520_v3, %v7975_v18  ;;  %v8077_v51 = vadd.f32 %v8036_v2, %v3518_v53  ;;  %v2808_v23 = vld [vmem:[#allocation2 + $0x2b8] sm:$0xff] }
 0x289   :  { %2484 = vst.msk [vmem:[#allocation2 + $0x2e8] sm:$0xff] %vm9361_vm9, %v5407_v26  ;;  %v4996_v7 = vadd.f32 %v4995_v46, %v4994_v1  ;;  %vm9362_vm10 = vmmov %vm9334_vm0  ;;  %v4142_v60 = vadd.f32 %v8061_v16, %v2809_v41  ;;  %v3519_v14 = vadd.f32 %v2548_v45, %v2546_v10  ;;  %v3583_v35 = vadd.f32 %v2678_v29, %v2613_v28  ;;  %v2873_v55 = vld [vmem:[#allocation2 + $0x2c8] sm:$0xff] }
 0x28a   :  { %v4999_v6 = vsel %vm9362_vm10, %v7878_v31, 0.0  ;;  %vm9363_vm12 = vmmov %vm9334_vm0  ;;  %v2874_v48 = vld [vmem:[#allocation2 + $0x2d0] sm:$0xff]  ;;  %v8083_v11 = vadd.f32 %v8058_v58, %v3953_v32  ;;  %v8087_v0 = vadd.f32 %v7939_v44, %v7917_v13  ;;  %v3584_v36 = vadd.f32 %v8029_v9, %v2614_v34 }
 0x28b   :  { %v4998_v31 = vadd.f32 %v4997_v63, %v4996_v7  ;;  %v5003_v61 = vsel %vm9363_vm12, %v7881_v15, 0.0  ;;  %v4270_v18 = vadd.f32 %v4142_v60, %v8077_v51  ;;  %v4210_v15 = vadd.f32 %v8069_v47, %v3954_v42  ;;  %v8103_v34 = vld [vmem:[#allocation2 + $0x2e0] sm:$0xff]  ;;  %v8105_v39 = vpop.f32.mrf.mxu1  ;;  %v8113_v63 = vpop.f32.mrf.mxu2  ;;  %vm9366_vm6 = vmmov %vm9334_vm0 }
 0x28c   :  { %v8094_v10 = vadd.f32 %v2613_v28, %v2548_v45  ;;  %v8096_v20 = vadd.f32 %v2808_v23, %v2743_v59  ;;  %v4212_v4 = vadd.f32 %v8074_v56, %v3956_v43  ;;  %v8099_v5 = vadd.f32 %v2809_v41, %v2744_v8  ;;  %vm9372_vm15 = vmmov %vm9334_vm0 }
 0x28d   :  { %v5000_v38 = vadd.f32 %v4999_v6, %v4998_v31  ;;  %v4334_v13 = vadd.f32 %v4270_v18, %v4206_v30  ;;  %v8101_v44 = vadd.f32 %v2874_v48, %v2809_v41  ;;  %v8108_v17 = vadd.f32 %v3519_v14, %v7931_v52  ;;  %v8120_v41 = vld [vmem:[#allocation2 + $0x2f0] sm:$0xff]  ;;  %vm9378_vm14 = vmmov %vm9334_vm0 }
 0x28e   :  { %v8110_v53 = vadd.f32 %v3583_v35, %v3519_v14  ;;  %v4143_v26 = vadd.f32 %v8096_v20, %v2873_v55  ;;  %v8115_v1 = vadd.f32 %v3584_v36, %v3520_v3  ;;  %v8117_v30 = vadd.f32 %v2743_v59, %v2678_v29  ;;  %v9364_v3 = vld [vmem:[#allocation87_spill] sm:$0xff]  ;;  %v9365_v59 = vld [vmem:[#allocation88_spill] sm:$0xff]  ;;  %vm9379_vm10 = vmmov %vm9334_vm0 }
 0x28f   :  { %v5002_v40 = vadd.f32 %v5001_v27, %v5000_v38  ;;  %vm4398_vm7 = vcmp.gt.f32.partialorder %v4334_v13, 0.0  ;;  %v4144_v8 = vadd.f32 %v8099_v5, %v2874_v48  ;;  %v8125_v27 = vadd.f32 %v8103_v34, %v2874_v48  ;;  %v8135_v42 = vld [vmem:[#allocation2 + $0x2d8] sm:$0xff] }
 0x290   :  { %v5452_v46 = vsel %vm4398_vm7, 1.0, %v8934_v50  ;;  %v4271_v32 = vadd.f32 %v4143_v26, %v8110_v53  ;;  %v8129_v45 = vadd.f32 %v8061_v16, %v8036_v2  ;;  %v4146_v6 = vadd.f32 %v8101_v44, %v8103_v34 }
 0x291   :  { %v5004_v52 = vadd.f32 %v5003_v61, %v5002_v40  ;;  %v4846_v7 = vadd.f32 %v5452_v46, %v9364_v3  ;;  %v4272_v29 = vadd.f32 %v4144_v8, %v8115_v1  ;;  %v8138_v43 = vadd.f32 %v8099_v5, %v3584_v36  ;;  %v2138_v40 = vpop.f32.mrf.mxu3 }
 0x292   :  { %v8140_v28 = vadd.f32 %v2873_v55, %v2808_v23  ;;  %v4335_v60 = vadd.f32 %v4271_v32, %v8027_v24  ;;  %v4148_v2 = vadd.f32 %v8125_v27, %v8120_v41  ;;  %v8148_v61 = vadd.f32 %v8117_v30, %v8094_v10 }
 0x293   :  { %v4910_v31 = vmul.f32 %v4846_v7, %v9365_v59  ;;  %v4336_v14 = vadd.f32 %v4272_v29, %v8050_v57  ;;  %v4274_v48 = vadd.f32 %v4146_v6, %v8129_v45  ;;  %v8154_v18 = vadd.f32 %v8135_v42, %v2873_v55  ;;  %v9367_v57 = vld [vmem:[#allocation90_spill] sm:$0xff]  ;;  %v2158_v3 = vpop.f32.mrf.mxu1  ;;  %v9368_v7 = vld [vmem:[#allocation16_spill] sm:$0xff] }
 0x294   :  { %vm4399_vm4 = vcmp.gt.f32.partialorder %v4335_v60, 0.0  ;;  %v4276_v36 = vadd.f32 %v4148_v2, %v8138_v43  ;;  %v4145_v24 = vadd.f32 %v8140_v28, %v8135_v42  ;;  %v8163_v55 = vadd.f32 %v8096_v20, %v3583_v35  ;;  %v8167_v60 = vld [vmem:[#allocation2 + $0x2e8] sm:$0xff]  ;;  %v9371_v35 = vld [vmem:[#allocation62_spill] sm:$0xff] }
 0x295   :  { %v5005_v23 = vsel %vm9366_vm6, %v4910_v31, 0.0  ;;  %v5453_v38 = vsel %vm4399_vm4, 1.0, %v8934_v50  ;;  %vm4400_vm2 = vcmp.gt.f32.partialorder %v4336_v14, 0.0  ;;  %v4338_v13 = vadd.f32 %v4274_v48, %v4210_v15  ;;  %v9369_v2 = vld [vmem:[#allocation89_spill] sm:$0xff]  ;;  %vm9382_vm4 = vmmov %vm9334_vm0 }
 0x296   :  { %v5006_v26 = vadd.f32 %v5005_v23, %v5004_v52  ;;  %v4847_v8 = vadd.f32 %v5453_v38, %v9367_v57  ;;  %v5454_v46 = vsel %vm4400_vm2, 1.0, %v8934_v50  ;;  %v4340_v32 = vadd.f32 %v4276_v36, %v4212_v4  ;;  %v2178_v4 = vpop.f32.mrf.mxu2  ;;  %v9370_v31 = vld [vmem:[#allocation61_spill] sm:$0xff] }
 0x297   :  { %v4848_v29 = vadd.f32 %v5454_v46, %v9368_v7  ;;  %vm4402_vm5 = vcmp.gt.f32.partialorder %v4338_v13, 0.0  ;;  %v4273_v6 = vadd.f32 %v4145_v24, %v8148_v61  ;;  %v4147_v59 = vadd.f32 %v8154_v18, %v8167_v60  ;;  %v9373_v13 = vld [vmem:[#allocation69_spill] sm:$0xff]  ;;  %v9374_v7 = vld [vmem:[#allocation63_spill] sm:$0xff] }
 0x298   :  { %v4911_v15 = vmul.f32 %v4847_v8, %v9369_v2  ;;  %v5456_v52 = vsel %vm4402_vm5, 1.0, %v8934_v50  ;;  %vm4404_vm1 = vcmp.gt.f32.partialorder %v4340_v32, 0.0  ;;  %v4211_v24 = vadd.f32 %v8108_v17, %v8087_v0  ;;  %v9375_v2 = vld [vmem:[#allocation27_spill] sm:$0xff] }
 0x299   :  { %v4912_v14 = vmul.f32 %v4848_v29, %v9370_v31  ;;  %v4850_v48 = vadd.f32 %v5456_v52, %v9371_v35  ;;  %v5458_v36 = vsel %vm4404_vm1, 1.0, %v8934_v50  ;;  %v4337_v23 = vadd.f32 %v4273_v6, %v8083_v11  ;;  %v9377_v31 = vld [vmem:[#allocation17_spill] sm:$0xff]  ;;  %v9380_v35 = vld [vmem:[#allocation96_spill] sm:$0xff]  ;;  %vm9383_vm1 = vmmov %vm9334_vm0 }
 0x29a   :  { %v5007_v38 = vsel %vm9372_vm15, %v4911_v15, 0.0  ;;  %v4852_v57 = vadd.f32 %v5458_v36, %v9373_v13  ;;  %v4275_v8 = vadd.f32 %v4147_v59, %v8163_v55  ;;  %vm2236_vm3 = vcmp.gt.f32.partialorder %v8091_v62, 0.0  ;;  %v2140_v36 = vpop.f32.mrf.mxu3  ;;  %vm9384_vm15 = vmmov %vm9334_vm0 }
 0x29b   :  { %v5008_v46 = vadd.f32 %v5007_v38, %v5006_v26  ;;  %v5009_v32 = vsel %vm9334_vm0, %v4912_v14, 0.0  ;;  %v4914_v29 = vmul.f32 %v4850_v48, %v9374_v7  ;;  %vm4401_vm13 = vcmp.gt.f32.partialorder %v4337_v23, 0.0  ;;  %v9381_v23 = vld [vmem:[#allocation21_spill] sm:$0xff] }
 0x29c   :  { %v8185_v52 = vmul.f32 %v4852_v57, %v9375_v2  ;;  %v5455_v11 = vsel %vm4401_vm13, 1.0, %v8934_v50  ;;  %v4339_v6 = vadd.f32 %v4275_v8, %v4211_v24  ;;  %v3957_v0 = vadd.f32 %v8020_v25, %v7999_v19 }
 0x29d   :  { %v5010_v15 = vadd.f32 %v5009_v32, %v5008_v46  ;;  %v4849_v59 = vadd.f32 %v5455_v11, %v9377_v31  ;;  %v5409_v26 = vsel %vm2236_vm3, 1.0, %v8934_v50  ;;  %v5013_v14 = vsel %vm9378_vm14, %v4914_v29, 0.0  ;;  %v9385_v46 = vld [vmem:[#allocation64_spill] sm:$0xff]  ;;  %vm9386_vm14 = vmmov %vm9334_vm0  ;;  %v9392_v31 = vld [vmem:[#allocation37_spill] sm:$0xff] }
 0x29e   :  { %9376 = vst [vmem:[#allocation76_spill] sm:$0xff] %v8185_v52  ;;  %vm4403_vm9 = vcmp.gt.f32.partialorder %v4339_v6, 0.0  ;;  %vm2237_vm12 = vcmp.gt.f32.partialorder %v8042_v12, 0.0  ;;  %vm2239_vm7 = vcmp.gt.f32.partialorder %v8032_v37, 0.0  ;;  %vm2241_vm6 = vcmp.gt.f32.partialorder %v2138_v40, 0.0  ;;  %v2160_v12 = vpop.f32.mrf.mxu1 }
 0x29f   :  { %2486 = vst.msk [vmem:[#allocation2 + $0x2f8] sm:$0xff] %vm9379_vm10, %v5409_v26  ;;  %v4913_v48 = vmul.f32 %v4849_v59, %v9380_v35  ;;  %v5457_v62 = vsel %vm4403_vm9, 1.0, %v8934_v50  ;;  %v5410_v19 = vsel %vm2237_vm12, 1.0, %v8934_v50  ;;  %v5412_v25 = vsel %vm2239_vm7, 1.0, %v8934_v50  ;;  %vm9387_vm12 = vmmov %vm9334_vm0  ;;  %v9394_v26 = vld [vmem:[#allocation43_spill] sm:$0xff]  ;;  %v9396_v35 = vld [vmem:[#allocation40_spill] sm:$0xff] }
 0x2a0   :  { %v4851_v24 = vadd.f32 %v5457_v62, %v9381_v23  ;;  %2487 = vst.msk [vmem:[#allocation2 + $0x300] sm:$0xff] %vm9382_vm4, %v5410_v19  ;;  %vm2238_vm2 = vcmp.gt.f32.partialorder %v8105_v39, 0.0  ;;  %vm2240_vm5 = vcmp.gt.f32.partialorder %v8113_v63, 0.0  ;;  %v5414_v38 = vsel %vm2241_vm6, 1.0, %v8934_v50  ;;  %v2180_v39 = vpop.f32.mrf.mxu2  ;;  %vm9388_vm7 = vmmov %vm9334_vm0 }
 0x2a1   :  { %v5011_v37 = vsel %vm9383_vm1, %v4913_v48, 0.0  ;;  %2489 = vst.msk [vmem:[#allocation2 + $0x310] sm:$0xff] %vm9384_vm15, %v5412_v25  ;;  %v5411_v13 = vsel %vm2238_vm2, 1.0, %v8934_v50  ;;  %v5413_v57 = vsel %vm2240_vm5, 1.0, %v8934_v50  ;;  %vm2242_vm13 = vcmp.gt.f32.partialorder %v2140_v36, 0.0  ;;  %vm9389_vm4 = vmmov %vm9334_vm0  ;;  %v4618_v25 = vld [vmem:[#allocation3 + $0x1e0] sm:$0xff] }
 0x2a2   :  { %v5012_v8 = vadd.f32 %v5011_v37, %v5010_v15  ;;  %v4915_v32 = vmul.f32 %v4851_v24, %v9385_v46  ;;  %2491 = vst.msk [vmem:[#allocation2 + $0x320] sm:$0xff] %vm9334_vm0, %v5414_v38  ;;  %vm2243_vm3 = vcmp.gt.f32.partialorder %v2158_v3, 0.0  ;;  %v5415_v63 = vsel %vm2242_vm13, 1.0, %v8934_v50  ;;  %vm9391_vm2 = vmmov %vm9334_vm0  ;;  %v9402_v38 = vld [vmem:[#allocation41_spill] sm:$0xff] }
 0x2a3   :  { %2488 = vst.msk [vmem:[#allocation2 + $0x308] sm:$0xff] %vm9386_vm14, %v5411_v13  ;;  %v5416_v40 = vsel %vm2243_vm3, 1.0, %v8934_v50  ;;  %vm2245_vm9 = vcmp.gt.f32.partialorder %v2178_v4, 0.0  ;;  %vm2244_vm10 = vcmp.gt.f32.partialorder %v2160_v12, 0.0  ;;  %v8217_v7 = vadd.f32 %v8094_v10, %v8016_v49  ;;  %vm9400_vm1 = vmmov %vm9334_vm0 }
 0x2a4   :  { %v8221_v29 = vadd.f32 %v8167_v60, %v8135_v42  ;;  %v5014_v2 = vadd.f32 %v5013_v14, %v5012_v8  ;;  %2490 = vst.msk [vmem:[#allocation2 + $0x318] sm:$0xff] %vm9387_vm12, %v5413_v57  ;;  %v5418_v3 = vsel %vm2245_vm9, 1.0, %v8934_v50  ;;  %v8227_v11 = vadd.f32 %v8140_v28, %v8117_v30  ;;  %vm9401_vm15 = vmmov %vm9334_vm0  ;;  %v9404_v57 = vld [vmem:[#allocation44_spill] sm:$0xff] }
 0x2a5   :  { %v5015_v4 = vsel %vm9388_vm7, %v4915_v32, 0.0  ;;  %2492 = vst.msk [vmem:[#allocation2 + $0x328] sm:$0xff] %vm9389_vm4, %v5415_v63  ;;  %v5417_v49 = vsel %vm2244_vm10, 1.0, %v8934_v50  ;;  %vm2246_vm6 = vcmp.gt.f32.partialorder %v2180_v39, 0.0  ;;  %v8234_v10 = vadd.f32 %v8120_v41, %v8103_v34  ;;  %v9398_v34 = vld [vmem:[#allocation99_spill] sm:$0xff]  ;;  %vm9406_vm13 = vmmov %vm9400_vm1 }
 0x2a6   :  { %v3067_v6 = vld [vmem:[#allocation2 + $0x2f8] sm:$0xff]  ;;  %v8236_v42 = vadd.f32 %v5015_v4, %v5014_v2  ;;  %2493 = vst.msk [vmem:[#allocation2 + $0x330] sm:$0xff] %vm9391_vm2, %v5416_v40  ;;  %v5419_v30 = vsel %vm2246_vm6, 1.0, %v8934_v50  ;;  %v8242_v59 = vadd.f32 1.0, %v9392_v31  ;;  %v8245_v14 = vadd.f32 1.0, %v9394_v26  ;;  %v9407_v2 = vld [vmem:[#allocation42_spill] sm:$0xff] }
 0x2a7   :  { %v4149_v15 = vadd.f32 %v8221_v29, %v3067_v6  ;;  %vm9397_vm5 = vnez %v9396_v35  ;;  %v8252_v62 = vmul.f32 %v9398_v34, %v9398_v34  ;;  %v3068_v19 = vld [vmem:[#allocation2 + $0x300] sm:$0xff]  ;;  %2495 = vst.msk [vmem:[#allocation2 + $0x340] sm:$0xff] %vm9400_vm1, %v5418_v3  ;;  %v4213_v36 = vadd.f32 %v8217_v7, %v3957_v0  ;;  %v4608_v0 = vld [vmem:[#allocation3 + $0x190] sm:$0xff] }
 0x2a8   :  { %9390 = vst [vmem:[#allocation78_spill] sm:$0xff] %v8236_v42  ;;  %v5139_v48 = vsel %vm9397_vm5, 1.0, %v8934_v50  ;;  %v8258_v23 = vadd.f32 %v8101_v44, %v8061_v16  ;;  %v4150_v12 = vadd.f32 %v8234_v10, %v3068_v19  ;;  %v4790_v37 = vadd.f32 1.0, %v7886_v54  ;;  %v5555_v4 = vld [vmem:[#allocation6 + $0x1e0] sm:$0xff]  ;;  %v5556_v26 = vld [vmem:[#allocation6 + $0x190] sm:$0xff] }
 0x2a9   :  { %9393 = vst [vmem:[#allocation81_spill] sm:$0xff] %v8242_v59  ;;  %v4277_v24 = vadd.f32 %v4149_v15, %v8227_v11  ;;  %vm9403_vm0 = vnez %v9402_v38  ;;  %v8269_v8 = vmul.f32 %v9404_v57, %v9404_v57  ;;  %v4214_v16 = vadd.f32 %v8077_v51, %v7905_v21  ;;  %v3133_v15 = vld [vmem:[#allocation2 + $0x310] sm:$0xff] }
 0x2aa   :  { %9395 = vst [vmem:[#allocation85_spill] sm:$0xff] %v8245_v14  ;;  %v5146_v13 = vsel %vm9403_vm0, 1.0, %v8934_v50  ;;  %v8275_v46 = vadd.f32 %v3067_v6, %v8167_v60  ;;  %v8278_v54 = vadd.f32 %v3068_v19, %v8120_v41  ;;  %v4278_v39 = vadd.f32 %v4150_v12, %v8258_v23  ;;  %v3132_v63 = vld [vmem:[#allocation2 + $0x308] sm:$0xff]  ;;  %v3198_v12 = vld [vmem:[#allocation2 + $0x320] sm:$0xff] }
 0x2ab   :  { %9399 = vst [vmem:[#allocation91_spill] sm:$0xff] %v8252_v62  ;;  %v4341_v32 = vadd.f32 %v4277_v24, %v4213_v36  ;;  %v4791_v40 = vadd.f32 1.0, %v5139_v48  ;;  %vm9408_vm3 = vnez %v9407_v2  ;;  %v8284_v21 = vsub.f32 %v4618_v25, %v5555_v4  ;;  %v4609_v25 = vld [vmem:[#allocation3 + $0x198] sm:$0xff]  ;;  %v9436_v62 = vld [vmem:[#allocation56_spill] sm:$0xff] }
 0x2ac   :  { %2494 = vst.msk [vmem:[#allocation2 + $0x338] sm:$0xff] %vm9401_vm15, %v5417_v49  ;;  %v5147_v3 = vsel %vm9408_vm3, 1.0, %v8934_v50  ;;  %v8288_v49 = vadd.f32 %v8154_v18, %v8096_v20  ;;  %v4342_v60 = vadd.f32 %v4278_v39, %v4214_v16  ;;  %v8290_v41 = vadd.f32 %v3132_v63, %v3067_v6  ;;  %v9411_v36 = vld [vmem:[#allocation31_spill] sm:$0xff]  ;;  %v9412_v16 = vld [vmem:[#allocation28_spill] sm:$0xff] }
 0x2ad   :  { %9405 = vst [vmem:[#allocation79_spill] sm:$0xff] %v8269_v8  ;;  %vm4405_vm14 = vcmp.gt.f32.partialorder %v4341_v32, 0.0  ;;  %v8293_v31 = vadd.f32 1.0, %v5146_v13  ;;  %v4672_v35 = vsub.f32 %v4608_v0, %v5556_v26  ;;  %v4215_v48 = vadd.f32 %v8110_v53, %v7984_v33  ;;  %v3197_v33 = vld [vmem:[#allocation2 + $0x318] sm:$0xff]  ;;  %v3273_v8 = vld [vmem:[#allocation2 + $0x380] sm:$0xff] }
 0x2ae   :  { %2496 = vst.msk [vmem:[#allocation2 + $0x348] sm:$0xff] %vm9406_vm13, %v5419_v30  ;;  %v4151_v30 = vadd.f32 %v8275_v46, %v3132_v63  ;;  %v5459_v34 = vsel %vm4405_vm14, 1.0, %v8934_v50  ;;  %vm4406_vm9 = vcmp.gt.f32.partialorder %v4342_v60, 0.0  ;;  %v4152_v24 = vadd.f32 %v8278_v54, %v3133_v15  ;;  %v5557_v60 = vld [vmem:[#allocation6 + $0x198] sm:$0xff] }
 0x2af   :  { %9409 = vst [vmem:[#allocation83_spill] sm:$0xff] %v8284_v21  ;;  %v4853_v20 = vadd.f32 %v5459_v34, %v9411_v36  ;;  %v8303_v38 = vadd.f32 %v8125_v27, %v8099_v5  ;;  %v5460_v13 = vsel %vm4406_vm9, 1.0, %v8934_v50  ;;  %v8306_v57 = vadd.f32 %v3133_v15, %v3068_v19  ;;  %v9416_v36 = vld [vmem:[#allocation97_spill] sm:$0xff] }
 0x2b0   :  { %9410 = vst [vmem:[#allocation13_spill] sm:$0xff] %v8293_v31  ;;  %v4279_v6 = vadd.f32 %v4151_v30, %v8288_v49  ;;  %v4854_v32 = vadd.f32 %v5460_v13, %v4790_v37  ;;  %v4153_v2 = vadd.f32 %v8290_v41, %v3197_v33  ;;  %v8312_v4 = vadd.f32 1.0, %v5147_v3 }
 0x2b1   :  { %v8309_v0 = vmul.f32 %v4853_v20, %v9412_v16  ;;  %v4673_v30 = vsub.f32 %v4609_v25, %v5557_v60  ;;  %v8314_v26 = vmul.f32 %v4672_v35, %v4672_v35  ;;  %v4154_v34 = vadd.f32 %v8306_v57, %v3198_v12  ;;  %v9420_v35 = vld [vmem:[#allocation47_spill] sm:$0xff] }
 0x2b2   :  { %v4343_v39 = vadd.f32 %v4279_v6, %v4215_v48  ;;  %9414 = vst [vmem:[#allocation111_spill] sm:$0xff] %v8312_v4  ;;  %v8319_v19 = vadd.f32 %v8221_v29, %v8140_v28  ;;  %v8322_v42 = vmul.f32 %v4854_v32, %v9416_v36  ;;  %v4280_v37 = vadd.f32 %v4152_v24, %v8303_v38  ;;  %v9418_v48 = vld [vmem:[#allocation45_spill] sm:$0xff]  ;;  %v9422_v32 = vld [vmem:[#allocation48_spill] sm:$0xff] }
 0x2b3   :  { %9413 = vst [vmem:[#allocation75_spill] sm:$0xff] %v8309_v0  ;;  %vm9419_vm10 = vnez %v9418_v48  ;;  %v8330_v25 = vadd.f32 %v8234_v10, %v8101_v44  ;;  %vm9421_vm7 = vnez %v9420_v35  ;;  %v4216_v28 = vadd.f32 %v8115_v1, %v8007_v22  ;;  %v9426_v35 = vld [vmem:[#allocation98_spill] sm:$0xff] }
 0x2b4   :  { %9415 = vst [vmem:[#allocation77_spill] sm:$0xff] %v8314_v26  ;;  %v5158_v3 = vsel %vm9419_vm10, 1.0, %v8934_v50  ;;  %vm4407_vm12 = vcmp.gt.f32.partialorder %v4343_v39, 0.0  ;;  %v5148_v20 = vsel %vm9421_vm7, 1.0, %v8934_v50  ;;  %v4281_v24 = vadd.f32 %v4153_v2, %v8319_v19  ;;  %v3208_v26 = vld [vmem:[#allocation2 + $0x370] sm:$0xff] }
 0x2b5   :  { %9417 = vst [vmem:[#allocation101_spill] sm:$0xff] %v8322_v42  ;;  %v5461_v6 = vsel %vm4407_vm12, 1.0, %v8934_v50  ;;  %v4282_v13 = vadd.f32 %v4154_v34, %v8330_v25  ;;  %vm9423_vm4 = vnez %v9422_v32  ;;  %v8343_v60 = vmul.f32 %v4673_v30, %v4673_v30  ;;  %v3262_v34 = vld [vmem:[#allocation2 + $0x328] sm:$0xff] }
 0x2b6   :  { %v4855_v16 = vadd.f32 %v5461_v6, %v4791_v40  ;;  %v5149_v44 = vsel %vm9423_vm4, 1.0, %v8934_v50  ;;  %v4217_v39 = vadd.f32 %v8148_v61, %v8058_v58  ;;  %v4344_v36 = vadd.f32 %v4280_v37, %v4216_v28  ;;  %v3263_v40 = vld [vmem:[#allocation2 + $0x330] sm:$0xff] }
 0x2b7   :  { %9424 = vst [vmem:[#allocation110_spill] sm:$0xff] %v8343_v60  ;;  %v8347_v48 = vadd.f32 1.0, %v5158_v3  ;;  %v4218_v22 = vadd.f32 %v8129_v45, %v8069_v47  ;;  %v8354_v6 = vadd.f32 1.0, %v5148_v20  ;;  %v8356_v32 = vadd.f32 %v3198_v12, %v3133_v15  ;;  %v2551_v15 = vld [vmem:[#allocation2 + $0x290] sm:$0xff] }
 0x2b8   :  { %v8352_v2 = vmul.f32 %v4855_v16, %v9426_v35  ;;  %v8358_v30 = vadd.f32 %v3197_v33, %v3132_v63  ;;  %v4345_v42 = vadd.f32 %v4281_v24, %v4217_v39  ;;  %v8360_v0 = vadd.f32 1.0, %v5149_v44  ;;  %v3328_v16 = vld [vmem:[#allocation2 + $0x340] sm:$0xff]  ;;  %v3078_v44 = vld [vmem:[#allocation2 + $0x350] sm:$0xff] }
 0x2b9   :  { %9425 = vst [vmem:[#allocation104_spill] sm:$0xff] %v8347_v48  ;;  %v4220_v58 = vadd.f32 %v8138_v43, %v8074_v56  ;;  %v4219_v47 = vadd.f32 %v8163_v55, %v8108_v17  ;;  %v4346_v37 = vadd.f32 %v4282_v13, %v4218_v22  ;;  %vm4408_vm6 = vcmp.gt.f32.partialorder %v4344_v36, 0.0  ;;  %v3327_v43 = vld [vmem:[#allocation2 + $0x338] sm:$0xff]  ;;  %v3143_v39 = vld [vmem:[#allocation2 + $0x360] sm:$0xff] }
 0x2ba   :  { %9427 = vst [vmem:[#allocation33_spill] sm:$0xff] %v8352_v2  ;;  %v4155_v3 = vadd.f32 %v8358_v30, %v3262_v34  ;;  %v3902_v28 = vadd.f32 %v3263_v40, %v3198_v12  ;;  %v4156_v20 = vadd.f32 %v8356_v32, %v3263_v40  ;;  %v8370_v63 = vadd.f32 %v8227_v11, %v8217_v7  ;;  %v9433_v2 = vld [vmem:[#allocation18_spill] sm:$0xff] }
 0x2bb   :  { %9428 = vst [vmem:[#allocation74_spill] sm:$0xff] %v8354_v6  ;;  %v3524_v24 = vadd.f32 %v8029_v9, %v2551_v15  ;;  %v8375_v56 = vadd.f32 %v8275_v46, %v8154_v18  ;;  %v8379_v17 = vadd.f32 %v8278_v54, %v8125_v27  ;;  %vm4409_vm2 = vcmp.gt.f32.partialorder %v4345_v42, 0.0 }
 0x2bc   :  { %9429 = vst [vmem:[#allocation106_spill] sm:$0xff] %v8360_v0  ;;  %v5462_v12 = vsel %vm4408_vm6, 1.0, %v8934_v50  ;;  %v3841_v13 = vadd.f32 %v3262_v34, %v3197_v33  ;;  %vm4410_vm5 = vcmp.gt.f32.partialorder %v4346_v37, 0.0  ;;  %v4158_v36 = vadd.f32 %v3902_v28, %v3328_v16  ;;  %v3392_v37 = vld [vmem:[#allocation2 + $0x348] sm:$0xff] }
 0x2bd   :  { %9430 = vst [vmem:[#allocation100_spill] sm:$0xff] %v8375_v56  ;;  %v4283_v7 = vadd.f32 %v4155_v3, %v8375_v56  ;;  %v4284_v9 = vadd.f32 %v4156_v20, %v8379_v17  ;;  %v5463_v18 = vsel %vm4409_vm2, 1.0, %v8934_v50  ;;  %v3903_v22 = vadd.f32 %v3327_v43, %v3262_v34  ;;  %v3079_v3 = vld [vmem:[#allocation2 + $0x358] sm:$0xff]  ;;  %v3144_v20 = vld [vmem:[#allocation2 + $0x368] sm:$0xff] }
 0x2be   :  { %9431 = vst [vmem:[#allocation105_spill] sm:$0xff] %v8379_v17  ;;  %v4157_v35 = vadd.f32 %v3841_v13, %v3327_v43  ;;  %v8387_v27 = vadd.f32 %v8306_v57, %v8234_v10  ;;  %v8391_v42 = vadd.f32 %v8290_v41, %v8221_v29  ;;  %v8395_v33 = vadd.f32 %v8358_v30, %v8275_v46  ;;  %v3209_v29 = vld [vmem:[#allocation2 + $0x378] sm:$0xff]  ;;  %v8420_v0 = vld [vmem:[#allocation2 + $0x388] sm:$0xff] }
 0x2bf   :  { %v8397_v15 = vadd.f32 %v3143_v39, %v3078_v44  ;;  %v8400_v34 = vadd.f32 %v5462_v12, %v9433_v2  ;;  %v8403_v52 = vsel %vm4410_vm5, 1.0, %v8934_v50  ;;  %v3904_v10 = vadd.f32 %v3328_v16, %v3263_v40  ;;  %v8415_v2 = vld [vmem:[#allocation2 + $0x390] sm:$0xff] }
 0x2c0   :  { %9432 = vst [vmem:[#allocation107_spill] sm:$0xff] %v8391_v42  ;;  %v3905_v60 = vadd.f32 %v3392_v37, %v3327_v43  ;;  %v8406_v48 = vadd.f32 %v5463_v18, %v9436_v62  ;;  %v8408_v46 = vadd.f32 %v4283_v7, %v4219_v47  ;;  %v8410_v14 = vadd.f32 %v4284_v9, %v4220_v58 }
 0x2c1   :  { %9434 = vst [vmem:[#allocation102_spill] sm:$0xff] %v8400_v34  ;;  %v8413_v59 = vadd.f32 %v4158_v36, %v8387_v27  ;;  %v4285_v12 = vadd.f32 %v4157_v35, %v8391_v42  ;;  %v4159_v34 = vadd.f32 %v3903_v22, %v3392_v37  ;;  %v3786_v40 = vadd.f32 %v3328_v16, %v3078_v44 }
 0x2c2   :  { %9435 = vst [vmem:[#allocation103_spill] sm:$0xff] %v8403_v52  ;;  %v8418_v43 = vadd.f32 %v3392_v37, %v3079_v3  ;;  %v8422_v6 = vadd.f32 %v3144_v20, %v3079_v3  ;;  %v3850_v62 = vadd.f32 %v3208_v26, %v3143_v39  ;;  %v8424_v47 = vadd.f32 %v3209_v29, %v3144_v20 }
 0x2c3   :  { %9437 = vst [vmem:[#allocation108_spill] sm:$0xff] %v8406_v48  ;;  %v8426_v58 = vadd.f32 %v3273_v8, %v3208_v26  ;;  %v8429_v7 = vadd.f32 %v8420_v0, %v3209_v29  ;;  %v3914_v9 = vadd.f32 %v8415_v2, %v3273_v8  ;;  %v3972_v36 = vadd.f32 %v8099_v5, %v3524_v24 }
 0x2c4   :  { %9438 = vst [vmem:[#allocation114_spill] sm:$0xff] %v8410_v14  ;;  %v4040_v16 = vadd.f32 %v8356_v32, %v8278_v54  ;;  %v4041_v18 = vadd.f32 %v3841_v13, %v8290_v41  ;;  %v4042_v35 = vadd.f32 %v3902_v28, %v8306_v57  ;;  %v8438_v37 = vadd.f32 %v3903_v22, %v8358_v30  ;;  %v8449_v57 = vld [vmem:[#allocation2 + $0x398] sm:$0xff]  ;;  %v8451_v30 = vld [vmem:[#allocation2 + $0x3a0] sm:$0xff] }
 0x2c5   :  { %9439 = vst [vmem:[#allocation82_spill] sm:$0xff] %v8429_v7  ;;  %v8441_v48 = vadd.f32 %v3904_v10, %v8356_v32  ;;  %v8443_v4 = vadd.f32 %v3905_v60, %v3841_v13  ;;  %v4102_v31 = vadd.f32 %v3902_v28, %v3786_v40  ;;  %v4103_v52 = vadd.f32 %v3903_v22, %v8418_v43 }
 0x2c6   :  { %v4104_v5 = vadd.f32 %v3904_v10, %v8397_v15  ;;  %v4105_v24 = vadd.f32 %v3905_v60, %v8422_v6  ;;  %v4106_v54 = vadd.f32 %v3850_v62, %v3786_v40  ;;  %v4160_v21 = vadd.f32 %v3904_v10, %v3078_v44 }
 0x2c7   :  { %v4161_v41 = vadd.f32 %v3905_v60, %v3079_v3  ;;  %v4162_v14 = vadd.f32 %v3786_v40, %v3143_v39  ;;  %vm4411_vm1 = vcmp.gt.f32.partialorder %v8408_v46, 0.0  ;;  %v4163_v32 = vadd.f32 %v8418_v43, %v3144_v20 }
 0x2c8   :  { %v4164_v28 = vadd.f32 %v8397_v15, %v3208_v26  ;;  %v4165_v13 = vadd.f32 %v8422_v6, %v3209_v29  ;;  %v4166_v22 = vadd.f32 %v3850_v62, %v3273_v8  ;;  %v4167_v50 = vadd.f32 %v8424_v47, %v8420_v0 }
 0x2c9   :  { %v4168_v60 = vadd.f32 %v8426_v58, %v8415_v2  ;;  %v4169_v44 = vadd.f32 %v8429_v7, %v8449_v57  ;;  %v4170_v39 = vadd.f32 %v3914_v9, %v8451_v30  ;;  %v4222_v3 = vadd.f32 %v8258_v23, %v8077_v51 }
 0x2ca   :  { %v4223_v26 = vadd.f32 %v8288_v49, %v8110_v53  ;;  %v4224_v8 = vadd.f32 %v8303_v38, %v8115_v1  ;;  %v4225_v20 = vadd.f32 %v8319_v19, %v8148_v61  ;;  %v4226_v10 = vadd.f32 %v8330_v25, %v8129_v45 }
 0x2cb   :  { %v4227_v29 = vadd.f32 %v8375_v56, %v8163_v55  ;;  %v4228_v40 = vadd.f32 %v8379_v17, %v3972_v36  ;;  %v4229_v51 = vadd.f32 %v8391_v42, %v8227_v11  ;;  %v4230_v53 = vadd.f32 %v8387_v27, %v8258_v23 }
 0x2cc   :  { %v4231_v1 = vadd.f32 %v8395_v33, %v8288_v49  ;;  %v4232_v62 = vadd.f32 %v8303_v38, %v4040_v16  ;;  %v4287_v61 = vadd.f32 %v4159_v34, %v8395_v33  ;;  %v4288_v9 = vadd.f32 %v4160_v21, %v4040_v16 }
 0x2cd   :  { %v4289_v45 = vadd.f32 %v4161_v41, %v4041_v18  ;;  %v4290_v7 = vadd.f32 %v4162_v14, %v4042_v35  ;;  %v4291_v55 = vadd.f32 %v4163_v32, %v8438_v37  ;;  %v4292_v36 = vadd.f32 %v4164_v28, %v8441_v48 }
 0x2ce   :  { %v4293_v17 = vadd.f32 %v4165_v13, %v8443_v4  ;;  %v4294_v11 = vadd.f32 %v4166_v22, %v4102_v31  ;;  %v4295_v42 = vadd.f32 %v4167_v50, %v4103_v52  ;;  %v4234_v23 = vadd.f32 %v8330_v25, %v4042_v35 }
 0x2cf   :  { %v4296_v27 = vadd.f32 %v4168_v60, %v4104_v5  ;;  %v4297_v56 = vadd.f32 %v4169_v44, %v4105_v24  ;;  %v4298_v49 = vadd.f32 %v4170_v39, %v4106_v54  ;;  %v4233_v38 = vadd.f32 %v8319_v19, %v4041_v18  ;;  %v9441_v18 = vld [vmem:[#allocation114_spill] sm:$0xff] }
 0x2d0   :  { %v4349_v33 = vadd.f32 %v4285_v12, %v8370_v63  ;;  %v4350_v21 = vadd.f32 %v8413_v59, %v4222_v3  ;;  %v4351_v14 = vadd.f32 %v4287_v61, %v4223_v26  ;;  %v4352_v34 = vadd.f32 %v4288_v9, %v4224_v8  ;;  %v9442_v26 = vld [vmem:[#allocation83_spill] sm:$0xff]  ;;  %v9448_v9 = vld [vmem:[#allocation13_spill] sm:$0xff] }
 0x2d1   :  { %v4353_v16 = vadd.f32 %v4289_v45, %v4225_v20  ;;  %v4354_v41 = vadd.f32 %v4290_v7, %v4226_v10  ;;  %v4355_v32 = vadd.f32 %v4291_v55, %v4227_v29  ;;  %v4356_v28 = vadd.f32 %v4292_v36, %v4228_v40  ;;  %v9443_v20 = vld [vmem:[#allocation66_spill] sm:$0xff]  ;;  %v9444_v10 = vld [vmem:[#allocation103_spill] sm:$0xff] }
 0x2d2   :  { %v4357_v13 = vadd.f32 %v4293_v17, %v4229_v51  ;;  %v4358_v31 = vadd.f32 %v4294_v11, %v4230_v53  ;;  %v4359_v50 = vadd.f32 %v4295_v42, %v4231_v1  ;;  %v9440_v52 = vmov 0.0   ;;  %v9445_v40 = vld [vmem:[#allocation23_spill] sm:$0xff]  ;;  %v9446_v53 = vld [vmem:[#allocation34_spill] sm:$0xff] }
 0x2d3   :  { %v5465_v25 = vsel %vm4411_vm1, 1.0, %v9440_v52  ;;  %v4360_v35 = vadd.f32 %v4296_v27, %v4232_v62  ;;  %v4361_v5 = vadd.f32 %v4297_v56, %v4233_v38  ;;  %v4362_v19 = vadd.f32 %v4298_v49, %v4234_v23  ;;  %v9447_v62 = vld [vmem:[#allocation35_spill] sm:$0xff]  ;;  %v9450_v11 = vld [vmem:[#allocation74_spill] sm:$0xff] }
 0x2d4   :  { %vm4412_vm15 = vcmp.gt.f32.partialorder %v9441_v18, 0.0  ;;  %vm4413_vm0 = vcmp.gt.f32.partialorder %v4349_v33, 0.0  ;;  %vm4414_vm13 = vcmp.gt.f32.partialorder %v4350_v21, 0.0  ;;  %vm4415_vm3 = vcmp.gt.f32.partialorder %v4351_v14, 0.0  ;;  %v9449_v55 = vld [vmem:[#allocation111_spill] sm:$0xff]  ;;  %v9451_v27 = vld [vmem:[#allocation106_spill] sm:$0xff] }
 0x2d5   :  { %vm4416_vm14 = vcmp.gt.f32.partialorder %v4352_v34, 0.0  ;;  %vm4417_vm9 = vcmp.gt.f32.partialorder %v4353_v16, 0.0  ;;  %vm4418_vm10 = vcmp.gt.f32.partialorder %v4354_v41, 0.0  ;;  %vm4419_vm12 = vcmp.gt.f32.partialorder %v4355_v32, 0.0  ;;  %v9452_v38 = vld [vmem:[#allocation94_spill] sm:$0xff]  ;;  %v9453_v21 = vld [vmem:[#allocation15_spill] sm:$0xff] }
 0x2d6   :  { %vm4420_vm7 = vcmp.gt.f32.partialorder %v4356_v28, 0.0  ;;  %vm4421_vm4 = vcmp.gt.f32.partialorder %v4357_v13, 0.0  ;;  %vm4422_vm6 = vcmp.gt.f32.partialorder %v4358_v31, 0.0  ;;  %vm4423_vm2 = vcmp.gt.f32.partialorder %v4359_v50, 0.0  ;;  %v9454_v34 = vld [vmem:[#allocation59_spill] sm:$0xff]  ;;  %v9455_v41 = vld [vmem:[#allocation20_spill] sm:$0xff] }
 0x2d7   :  { %vm4424_vm5 = vcmp.gt.f32.partialorder %v4360_v35, 0.0  ;;  %vm4425_vm11 = vcmp.gt.f32.partialorder %v4361_v5, 0.0  ;;  %vm4426_vm8 = vcmp.gt.f32.partialorder %v4362_v19, 0.0  ;;  %v5466_v59 = vsel %vm4412_vm15, 1.0, %v9440_v52  ;;  %v9456_v28 = vld [vmem:[#allocation26_spill] sm:$0xff]  ;;  %v9459_v5 = vld [vmem:[#allocation85_spill] sm:$0xff] }
 0x2d8   :  { %v5467_v63 = vsel %vm4413_vm0, 1.0, %v9440_v52  ;;  %v5468_v56 = vsel %vm4414_vm13, 1.0, %v9440_v52  ;;  %v5469_v17 = vsel %vm4415_vm3, 1.0, %v9440_v52  ;;  %v5470_v42 = vsel %vm4416_vm14, 1.0, %v9440_v52  ;;  %v9457_v31 = vld [vmem:[#allocation70_spill] sm:$0xff]  ;;  %v9460_v18 = vld [vmem:[#allocation104_spill] sm:$0xff] }
 0x2d9   :  { %v5471_v46 = vsel %vm4417_vm9, 1.0, %v9440_v52  ;;  %v5472_v12 = vsel %vm4418_vm10, 1.0, %v9440_v52  ;;  %v5473_v7 = vsel %vm4419_vm12, 1.0, %v9440_v52  ;;  %v5474_v24 = vsel %vm4420_vm7, 1.0, %v9440_v52 }
 0x2da   :  { %v5475_v54 = vsel %vm4421_vm4, 1.0, %v9440_v52  ;;  %v5476_v22 = vsel %vm4422_vm6, 1.0, %v9440_v52  ;;  %v5477_v60 = vsel %vm4423_vm2, 1.0, %v9440_v52  ;;  %v5478_v44 = vsel %vm4424_vm5, 1.0, %v9440_v52 }
 0x2db   :  { %v5479_v39 = vsel %vm4425_vm11, 1.0, %v9440_v52  ;;  %v5480_v3 = vsel %vm4426_vm8, 1.0, %v9440_v52  ;;  %v4746_v8 = vmul.f32 %v9442_v26, %v9442_v26  ;;  %v4858_v29 = vadd.f32 %v9444_v10, %v9443_v20  ;;  %v9466_v26 = vld [vmem:[#allocation22_spill] sm:$0xff]  ;;  %v9467_v20 = vld [vmem:[#allocation29_spill] sm:$0xff] }
 0x2dc   :  { %v4859_v51 = vadd.f32 %v5465_v25, %v9445_v40  ;;  %v4860_v1 = vadd.f32 %v5466_v59, %v9446_v53  ;;  %v4861_v61 = vadd.f32 %v5467_v63, %v9447_v62  ;;  %v4862_v45 = vadd.f32 %v5468_v56, %v9448_v9  ;;  %v9458_v25 = vld [vmem:[#allocation81_spill] sm:$0xff]  ;;  %v9461_v63 = vld [vmem:[#allocation54_spill] sm:$0xff]  ;;  %v9469_v40 = vld [vmem:[#allocation91_spill] sm:$0xff] }
 0x2dd   :  { %v4863_v36 = vadd.f32 %v5469_v17, %v9449_v55  ;;  %v4864_v23 = vadd.f32 %v5470_v42, %v9450_v11  ;;  %v4865_v49 = vadd.f32 %v5471_v46, %v9451_v27  ;;  %v4866_v33 = vadd.f32 %v5472_v12, %v9452_v38  ;;  %v9462_v56 = vld [vmem:[#allocation102_spill] sm:$0xff]  ;;  %v9463_v42 = vld [vmem:[#allocation57_spill] sm:$0xff]  ;;  %v9464_v46 = vld [vmem:[#allocation108_spill] sm:$0xff] }
 0x2de   :  { %v4867_v14 = vadd.f32 %v5473_v7, %v9453_v21  ;;  %v4868_v16 = vadd.f32 %v5474_v24, %v9454_v34  ;;  %v4869_v32 = vadd.f32 %v5475_v54, %v9455_v41  ;;  %v4870_v13 = vadd.f32 %v5476_v22, %v9456_v28  ;;  %v9465_v7 = vld [vmem:[#allocation65_spill] sm:$0xff]  ;;  %v9468_v10 = vld [vmem:[#allocation30_spill] sm:$0xff]  ;;  %v9470_v53 = vld [vmem:[#allocation79_spill] sm:$0xff] }
 0x2df   :  { %v4871_v50 = vadd.f32 %v5477_v60, %v9457_v31  ;;  %v4872_v35 = vadd.f32 %v5478_v44, %v9458_v25  ;;  %v4873_v19 = vadd.f32 %v5479_v39, %v9459_v5  ;;  %v4874_v59 = vadd.f32 %v5480_v3, %v9460_v18  ;;  %v9471_v62 = vld [vmem:[#allocation77_spill] sm:$0xff]  ;;  %v9472_v9 = vld [vmem:[#allocation110_spill] sm:$0xff]  ;;  %v9474_v38 = vld [vmem:[#allocation95_spill] sm:$0xff] }
 0x2e0   :  { %v4920_v17 = vmul.f32 %v9462_v56, %v9461_v63  ;;  %v4921_v12 = vmul.f32 %v9464_v46, %v9463_v42  ;;  %v4922_v24 = vmul.f32 %v4858_v29, %v9465_v7  ;;  %v4923_v54 = vmul.f32 %v4859_v51, %v9466_v26  ;;  %v9473_v11 = vld [vmem:[#allocation14_spill] sm:$0xff]  ;;  %v9475_v34 = vld [vmem:[#allocation19_spill] sm:$0xff]  ;;  %v9476_v51 = vld [vmem:[#allocation60_spill] sm:$0xff] }
 0x2e1   :  { %v4924_v22 = vmul.f32 %v4860_v1, %v9467_v20  ;;  %v4925_v60 = vmul.f32 %v4861_v61, %v9468_v10  ;;  %v4926_v44 = vmul.f32 %v4862_v45, %v9469_v40  ;;  %v4927_v39 = vmul.f32 %v4863_v36, %v9470_v53  ;;  %v9477_v1 = vld [vmem:[#allocation24_spill] sm:$0xff]  ;;  %v9478_v45 = vld [vmem:[#allocation25_spill] sm:$0xff]  ;;  %v9483_v25 = vld [vmem:[#allocation78_spill] sm:$0xff] }
 0x2e2   :  { %v4928_v3 = vmul.f32 %v4864_v23, %v9471_v62  ;;  %v4929_v55 = vmul.f32 %v4865_v49, %v9472_v9  ;;  %v4930_v27 = vmul.f32 %v4866_v33, %v9473_v11  ;;  %v4931_v21 = vmul.f32 %v4867_v14, %v9474_v38  ;;  %v9479_v36 = vld [vmem:[#allocation76_spill] sm:$0xff]  ;;  %v9482_v33 = vld [vmem:[#allocation71_spill] sm:$0xff]  ;;  %v9486_v63 = vld [vmem:[#allocation101_spill] sm:$0xff] }
 0x2e3   :  { %v8545_v29 = vmul.f32 %v4868_v16, %v9475_v34  ;;  %v8548_v41 = vmul.f32 %v4869_v32, %v9476_v51  ;;  %v8551_v61 = vmul.f32 %v4870_v13, %v9477_v1  ;;  %v8554_v28 = vmul.f32 %v4871_v50, %v9478_v45  ;;  %v9481_v49 = vld [vmem:[#allocation36_spill] sm:$0xff]  ;;  %v9484_v5 = vld [vmem:[#allocation75_spill] sm:$0xff]  ;;  %v9488_v56 = vld [vmem:[#allocation33_spill] sm:$0xff] }
 0x2e4   :  { %vm9480_vm8 = vcmask 130048   ;;  %v8559_v31 = vmul.f32 %v4872_v35, %v9481_v49  ;;  %v8562_v14 = vmul.f32 %v4873_v19, %v9482_v33  ;;  %v8564_v16 = vmul.f32 %v4874_v59, %v4746_v8  ;;  %v3404_v38 = vld [vmem:[#allocation2 + $0x3a8] sm:$0xff] }
 0x2e5   :  { %v5017_v23 = vsel %vm9480_vm8, %v9479_v36, 0.0  ;;  %vm9485_vm11 = vmmov %vm9480_vm8  ;;  %v3915_v11 = vadd.f32 %v8449_v57, %v8420_v0 }
 0x2e6   :  { %v5018_v32 = vadd.f32 %v5017_v23, %v9483_v25  ;;  %v5019_v13 = vsel %vm9485_vm11, %v9484_v5, 0.0  ;;  %vm9487_vm1 = vmmov %vm9480_vm8 }
 0x2e7   :  { %v5021_v50 = vsel %vm9487_vm1, %v9486_v63, 0.0  ;;  %vm9489_vm15 = vmmov %vm9487_vm1  ;;  %v4171_v45 = vadd.f32 %v3915_v11, %v3404_v38 }
 0x2e8   :  { %v5020_v18 = vadd.f32 %v5019_v13, %v5018_v32  ;;  %v5023_v42 = vsel %vm9489_vm15, %v9488_v56, 0.0  ;;  %vm9490_vm0 = vmmov %vm9487_vm1  ;;  %v9506_v56 = vld [vmem:[#allocation46_spill] sm:$0xff] }
 0x2e9   :  { %v5025_v7 = vsel %vm9490_vm0, %v4920_v17, 0.0  ;;  %vm9491_vm13 = vmmov %vm9490_vm0  ;;  %v3916_v17 = vadd.f32 %v8451_v30, %v8415_v2  ;;  %v9498_v30 = vld [vmem:[#allocation82_spill] sm:$0xff]  ;;  %vm9507_vm8 = vnez %v9506_v56 }
 0x2ea   :  { %v5022_v46 = vadd.f32 %v5021_v50, %v5020_v18  ;;  %v5027_v8 = vsel %vm9491_vm13, %v4921_v12, 0.0  ;;  %vm9492_vm3 = vmmov %vm9490_vm0  ;;  %v3468_v12 = vld [vmem:[#allocation2 + $0x3b0] sm:$0xff]  ;;  %v4109_v23 = vadd.f32 %v9498_v30, %v8422_v6 }
 0x2eb   :  { %v5029_v26 = vsel %vm9492_vm3, %v4922_v24, 0.0  ;;  %vm9493_vm14 = vmmov %vm9490_vm0  ;;  %v3917_v24 = vadd.f32 %v3404_v38, %v8449_v57  ;;  %v4172_v0 = vadd.f32 %v3916_v17, %v3468_v12  ;;  %v9499_v57 = vld [vmem:[#allocation100_spill] sm:$0xff] }
 0x2ec   :  { %v5024_v35 = vadd.f32 %v5023_v42, %v5022_v46  ;;  %v5031_v10 = vsel %vm9493_vm14, %v4923_v54, 0.0  ;;  %vm9494_vm9 = vmmov %vm9490_vm0  ;;  %v3469_v54 = vld [vmem:[#allocation2 + $0x3b8] sm:$0xff]  ;;  %v4619_v42 = vld [vmem:[#allocation3 + $0x1e8] sm:$0xff] }
 0x2ed   :  { %v5033_v53 = vsel %vm9494_vm9, %v4924_v22, 0.0  ;;  %vm9495_vm10 = vmmov %vm9490_vm0  ;;  %v4107_v22 = vadd.f32 %v8424_v47, %v8418_v43  ;;  %v4173_v49 = vadd.f32 %v3917_v24, %v3469_v54  ;;  %v9501_v43 = vld [vmem:[#allocation105_spill] sm:$0xff] }
 0x2ee   :  { %v5026_v19 = vadd.f32 %v5025_v7, %v5024_v35  ;;  %v5035_v62 = vsel %vm9495_vm10, %v4925_v60, 0.0  ;;  %vm9496_vm12 = vmmov %vm9490_vm0  ;;  %v4108_v60 = vadd.f32 %v8426_v58, %v8397_v15  ;;  %v4236_v47 = vadd.f32 %v8441_v48, %v9501_v43  ;;  %v9508_v35 = vld [vmem:[#allocation51_spill] sm:$0xff]  ;;  %v9513_v7 = vld [vmem:[#allocation53_spill] sm:$0xff] }
 0x2ef   :  { %v5037_v51 = vsel %vm9496_vm12, %v4926_v44, 0.0  ;;  %vm9497_vm7 = vmmov %vm9490_vm0  ;;  %v4235_v44 = vadd.f32 %v8438_v37, %v9499_v57  ;;  %v4299_v32 = vadd.f32 %v4171_v45, %v4107_v22  ;;  %v4301_v18 = vadd.f32 %v4173_v49, %v4109_v23 }
 0x2f0   :  { %v5028_v59 = vadd.f32 %v5027_v8, %v5026_v19  ;;  %v5039_v36 = vsel %vm9497_vm7, %v4927_v39, 0.0  ;;  %vm9500_vm4 = vmmov %vm9490_vm0  ;;  %v4300_v15 = vadd.f32 %v4172_v0, %v4108_v60  ;;  %v9503_v39 = vld [vmem:[#allocation107_spill] sm:$0xff]  ;;  %v5159_v48 = vsel %vm9507_vm8, 1.0, %v9440_v52  ;;  %v4620_v19 = vld [vmem:[#allocation3 + $0x1f0] sm:$0xff] }
 0x2f1   :  { %v5041_v33 = vsel %vm9500_vm4, %v4928_v3, 0.0  ;;  %vm9502_vm6 = vmmov %vm9490_vm0  ;;  %v4237_v13 = vadd.f32 %v8443_v4, %v9503_v39  ;;  %v4363_v6 = vadd.f32 %v4299_v32, %v4235_v44  ;;  %vm9509_vm11 = vcmp.ge.f32.partialorder %v9508_v35, 0.5 }
 0x2f2   :  { %v5030_v20 = vadd.f32 %v5029_v26, %v5028_v59  ;;  %v5043_v58 = vsel %vm9502_vm6, %v4929_v55, 0.0  ;;  %vm9504_vm2 = vmmov %vm9490_vm0  ;;  %v4364_v37 = vadd.f32 %v4300_v15, %v4236_v47  ;;  %v9510_v55 = vld [vmem:[#allocation52_spill] sm:$0xff]  ;;  %vm9514_vm3 = vnez %v9513_v7  ;;  %v4621_v59 = vld [vmem:[#allocation3 + $0x1f8] sm:$0xff] }
 0x2f3   :  { %v5045_v63 = vsel %vm9504_vm2, %v4930_v27, 0.0  ;;  %vm9505_vm5 = vmmov %vm9490_vm0  ;;  %vm9511_vm1 = vcmp.ge.f32.partialorder %v9510_v55, 0.5  ;;  %v4365_v4 = vadd.f32 %v4301_v18, %v4237_v13  ;;  %vm4427_vm0 = vcmp.gt.f32.partialorder %v4363_v6, 0.0  ;;  %v5558_v26 = vld [vmem:[#allocation6 + $0x1e8] sm:$0xff] }
 0x2f4   :  { %v5032_v40 = vadd.f32 %v5031_v10, %v5030_v20  ;;  %v5047_v3 = vsel %vm9505_vm5, %v4931_v21, 0.0  ;;  %vm382_vm15 = vmor %vm9511_vm1, %vm9509_vm11  ;;  %v5160_v21 = vsel %vm9514_vm3, 1.0, %v9440_v52  ;;  %vm4428_vm14 = vcmp.gt.f32.partialorder %v4364_v37, 0.0 }
 0x2f5   :  { %vm9512_vm13 = vmmov %vm9504_vm2  ;;  %v4683_v20 = vsub.f32 %v4619_v42, %v5558_v26  ;;  %v4811_v10 = vadd.f32 1.0, %v5159_v48  ;;  %vm4429_vm10 = vcmp.gt.f32.partialorder %v4365_v4, 0.0  ;;  %v4812_v17 = vadd.f32 1.0, %v5160_v21 }
 0x2f6   :  { %v5034_v9 = vadd.f32 %v5033_v53, %v5032_v40  ;;  %v5049_v27 = vsel %vm9512_vm13, %v8545_v29, 0.0  ;;  %vm9515_vm9 = vmmov %vm9504_vm2  ;;  %v5161_v53 = vsel %vm382_vm15, 1.0, %v9440_v52  ;;  %v5559_v29 = vld [vmem:[#allocation6 + $0x1f0] sm:$0xff]  ;;  %v5482_v12 = vsel %vm4428_vm14, 1.0, %v9440_v52 }
 0x2f7   :  { %v5051_v40 = vsel %vm9515_vm9, %v8548_v41, 0.0  ;;  %v4684_v11 = vsub.f32 %v4620_v19, %v5559_v29  ;;  %vm9516_vm12 = vmmov %vm9504_vm2  ;;  %v4747_v54 = vmul.f32 %v4683_v20, %v4683_v20  ;;  %v4813_v22 = vadd.f32 1.0, %v5161_v53 }
 0x2f8   :  { %v5036_v34 = vadd.f32 %v5035_v62, %v5034_v9  ;;  %v5481_v62 = vsel %vm4427_vm0, 1.0, %v9440_v52  ;;  %v5053_v38 = vsel %vm9516_vm12, %v8551_v61, 0.0  ;;  %vm9517_vm7 = vmmov %vm9504_vm2  ;;  %v5483_v60 = vsel %vm4429_vm10, 1.0, %v9440_v52 }
 0x2f9   :  { %v4875_v41 = vadd.f32 %v5481_v62, %v4811_v10  ;;  %v4748_v0 = vmul.f32 %v4684_v11, %v4684_v11  ;;  %vm9518_vm4 = vmmov %vm9504_vm2  ;;  %v4877_v23 = vadd.f32 %v5483_v60, %v4813_v22 }
 0x2fa   :  { %v5038_v1 = vadd.f32 %v5037_v51, %v5036_v34  ;;  %v5560_v34 = vld [vmem:[#allocation6 + $0x1f8] sm:$0xff]  ;;  %vm9519_vm6 = vmmov %vm9504_vm2 }
 0x2fb   :  { %v4685_v24 = vsub.f32 %v4621_v59, %v5560_v34  ;;  %v4939_v49 = vmul.f32 %v4875_v41, %v4747_v54  ;;  %v5059_v57 = vsel %vm9519_vm6, %v8562_v14, 0.0  ;;  %vm9520_vm5 = vmmov %vm9504_vm2 }
 0x2fc   :  { %v5040_v2 = vadd.f32 %v5039_v36, %v5038_v1  ;;  %v5055_v1 = vsel %vm9517_vm7, %v8554_v28, 0.0  ;;  %v4876_v36 = vadd.f32 %v5482_v12, %v4812_v17  ;;  %v5061_v28 = vsel %vm9504_vm2, %v8564_v16, 0.0  ;;  %vm9521_vm8 = vmmov %vm9504_vm2 }
 0x2fd   :  { %v4749_v30 = vmul.f32 %v4685_v24, %v4685_v24  ;;  %v5063_v43 = vsel %vm9520_vm5, %v4939_v49, 0.0  ;;  %vm9522_vm11 = vmmov %vm9504_vm2 }
 0x2fe   :  { %v5042_v25 = vadd.f32 %v5041_v33, %v5040_v2  ;;  %v5057_v2 = vsel %vm9518_vm4, %v8559_v31, 0.0  ;;  %v4940_v33 = vmul.f32 %v4876_v36, %v4748_v0 }
 0x2ff   :  { %v4941_v52 = vmul.f32 %v4877_v23, %v4749_v30 }
 0x300   :  { %v5044_v5 = vadd.f32 %v5043_v58, %v5042_v25  ;;  %v5065_v32 = vsel %vm9521_vm8, %v4940_v33, 0.0 }
 0x301   :  { %v5067_v15 = vsel %vm9522_vm11, %v4941_v52, 0.0 }
 0x302   :  { %v5046_v50 = vadd.f32 %v5045_v63, %v5044_v5 }
 0x304   :  { %v5048_v46 = vadd.f32 %v5047_v3, %v5046_v50 }
 0x306   :  { %v5050_v8 = vadd.f32 %v5049_v27, %v5048_v46 }
 0x308   :  { %v5052_v9 = vadd.f32 %v5051_v40, %v5050_v8 }
 0x30a   :  { %v5054_v51 = vadd.f32 %v5053_v38, %v5052_v9 }
 0x30c   :  { %v5056_v45 = vadd.f32 %v5055_v1, %v5054_v51 }
 0x30e   :  { %v5058_v61 = vadd.f32 %v5057_v2, %v5056_v45 }
 0x310   :  { %v5060_v44 = vadd.f32 %v5059_v57, %v5058_v61 }
 0x312   :  { %v5062_v25 = vadd.f32 %v5061_v28, %v5060_v44 }
 0x314   :  { %v5064_v47 = vadd.f32 %v5063_v43, %v5062_v25 }
 0x316   :  { %v5066_v31 = vadd.f32 %v5065_v32, %v5064_v47 }
 0x318   :  { %v5068_v58 = vadd.f32 %v5067_v15, %v5066_v31 }
 0x31a   :  { %5069 = vadd.xlane.f32.xlu0 %v5068_v58 }
 0x38d   :  { %v5070_v5 = vpop.xlane.xlu0 %5069 }
 0x38e   :  { %v5071_v39 = vrot.slane %v5070_v5, 4 }
 0x390   :  { %v5072_v14 = vadd.f32 %v5071_v39, %v5070_v5 }
 0x392   :  { %v5073_v13 = vrot.slane %v5072_v14, 2 }
 0x394   :  { %v5074_v18 = vadd.f32 %v5073_v13, %v5072_v14 }
 0x396   :  { %v5075_v6 = vrot.slane %v5074_v18, 1 }
 0x398   :  { %v5076_v63 = vadd.f32 %v5075_v6, %v5074_v18 }
 0x39a   :  { %5487 = vpush %v5076_v63 }
 0x3cb   :  { %s5488_s4 = spop %5487 }
 0x3cc   :  { %v5078_v16 = vstv %s5488_s4 }
 0x3cd   :  { %5079 = vst [vmem:[#allocation9] sm:$0xff] %v5078_v16 }
 0x3ce   :  { %5090 = dma.vmem_to_hbm [thread:$0]  %s5086_s30, 128, %s5088_s28, [#allocation5]  }
 0x3cf   :  { %5661 = dma.done.wait [#allocation5], 128  }
 0x3d0   :  { %5662 = vsyncadd [#allocation5], 4294967168 }
 0x3d1   :  { %5095 = vsyncpa [#allocation4], 1 }
 0x3d2   :  { %5096 = vsyncpa [#allocation7], 1 }
 0x3d3   :  { %5097 = vsyncpa [#allocation5], 1 }

</bundles_post_ra>
